<compile_context>
chip_gen: v7x
topology: tpu7x:2x2x1
jax: 0.10.0
libtpu: 0.0.40
codegen_flags: <defaults>
</compile_context>

<pallas_src>
import math

import jax
import jax.numpy as jnp
from jax.experimental import pallas as pl
from jax.experimental.pallas import tpu as pltpu

NUM_GROUPS = 32
EPS = 1e-6


def _nbytes(shape, dtype):
    return math.prod(shape) * jnp.dtype(dtype).itemsize


def _vmem_caps():
    """(physical VMEM bytes, usable budget with headroom)."""
    try:
        phys = int(pltpu.get_tpu_info().vmem_capacity_bytes)
    except Exception:
        phys = 64 << 20          # conservative: v7x has 64 MiB per TensorCore
    phys = max(phys, 32 << 20)
    budget = (phys * 3) // 4     # leave headroom for compiler-internal scratch
    return phys, budget


def _vmem_estimate(C, HW, tq, tk):
    """Rough VMEM usage for the chosen tiles (double-buffered pipeline blocks)."""
    est = 0
    est += 2 * _nbytes((1, C, tq), jnp.float32)       # x query tile (f32, residual)
    est += 2 * _nbytes((1, C, tq), jnp.float32)       # output tile
    est += 2 * _nbytes((1, C, tk), jnp.bfloat16)      # x kv tile (bf16 stream)
    est += 2 * 2 * _nbytes((1, C, 1), jnp.float32)    # GroupNorm scale / shift
    est += 2 * 4 * _nbytes((C, C), jnp.bfloat16)      # q/k/v/proj weights
    est += 2 * 4 * _nbytes((C, 1), jnp.float32)       # biases
    # Persistent scratch.
    est += _nbytes((tq, C), jnp.bfloat16)             # cached q tile
    est += 2 * _nbytes((C, HW), jnp.bfloat16)         # K / V caches
    est += _nbytes((tq, C), jnp.float32)              # attention accumulator
    est += 2 * _nbytes((tq, 1), jnp.float32)          # running max / denom
    # In-kernel temporaries (logits, probs, casts) -- rough upper bound.
    est += 3 * _nbytes((tq, tk), jnp.float32)
    est += 2 * _nbytes((C, max(tq, tk)), jnp.float32)
    return est


def _pick_tiles(C, HW, budget):
    """Lane-dense tiles; tq capped at 512, tk as large as the VMEM budget allows."""
    cands = [t for t in (4096, 2048, 1024, 512, 256, 128) if t <= HW and HW % t == 0]
    if not cands:
        cands = [HW]             # odd spatial size: single full-extent (masked) tile
    tq = next((t for t in cands if t <= 512), cands[-1])
    for tk in cands:             # largest first: tk is the grid-overhead lever
        if _vmem_estimate(C, HW, tq, tk) <= budget:
            return tq, tk
    return tq, cands[-1]


def attn_block(x_nchw, params):
    """x_nchw: (B, C, H, W) float32.  params: dict of weights (see __main__)."""
    B, C, H, W = x_nchw.shape
    HW = H * W
    G = NUM_GROUPS
    assert C % G == 0, "GroupNorm(32) requires C % 32 == 0"

    # Free reshape -- kernel works on (B, C, HW), no NCHW<->NHWC transpose.
    x = x_nchw.reshape(B, C, HW)
    x_kv = x.astype(jnp.bfloat16)          # kv stream in bf16 (halves its HBM bytes)

    # --- GroupNorm statistics (global over the image => precomputed here) ---
    # Two-pass variance to avoid cancellation; folded with gamma/beta into
    # per-(b, c) scale/shift applied inside the kernel.
    xg = x.reshape(B, G, (C // G) * HW)
    mean = jnp.mean(xg, axis=-1)                                     # (B, G)
    var = jnp.mean(jnp.square(xg - mean[..., None]), axis=-1)        # (B, G)
    rstd = jax.lax.rsqrt(var + EPS)
    mean_c = jnp.repeat(mean, C // G, axis=1)                        # (B, C)
    rstd_c = jnp.repeat(rstd, C // G, axis=1)                        # (B, C)
    gamma = params["gn_w"][None, :]
    beta = params["gn_b"][None, :]
    scale = (gamma * rstd_c)[..., None].astype(jnp.float32)          # (B, C, 1)
    shift = (beta - mean_c * gamma * rstd_c)[..., None].astype(jnp.float32)

    # bf16 weights for the MXU (f32 accumulation inside the kernel).
    # w_q is pre-transposed (free, one-time) so the cached q ends up (tq, C).
    wq_t = params["w_q"].T.astype(jnp.bfloat16)    # (C_in, C_out)
    wk = params["w_k"].astype(jnp.bfloat16)
    wv = params["w_v"].astype(jnp.bfloat16)
    wp = params["w_p"].astype(jnp.bfloat16)
    bq = params["b_q"].reshape(1, C).astype(jnp.float32)
    bk = params["b_k"].reshape(C, 1).astype(jnp.float32)
    bv = params["b_v"].reshape(C, 1).astype(jnp.float32)
    bp = params["b_p"].reshape(C, 1).astype(jnp.float32)

    phys_vmem, budget = _vmem_caps()
    tq, tk = _pick_tiles(C, HW, budget)
    n_q = pl.cdiv(HW, tq)
    n_kv = pl.cdiv(HW, tk)
    att_scale = float(C) ** (-0.5)

    def kernel(xq_ref, xkv_ref, scale_ref, shift_ref,
               wqt_ref, bq_ref, wk_ref, bk_ref, wv_ref, bv_ref, wp_ref, bp_ref,
               o_ref,
               q_s, k_cache, v_cache, acc_s, m_s, l_s):
        qi = pl.program_id(1)
        ki = pl.program_id(2)

        scale_c = scale_ref[0]                         # (C, 1) f32
        shift_c = shift_ref[0]                         # (C, 1) f32

        @pl.when(ki == 0)
        def _init_q():
            # Normalize + project the query tile once per (b, q-tile); cache it
            # as (tq, C) so the per-kv-step logits matmul is a plain (m,k)@(k,n).
            hn_q = (xq_ref[0] * scale_c + shift_c).astype(jnp.bfloat16)   # (C, tq)
            qf = jax.lax.dot_general(hn_q, wqt_ref[...],
                                     (((0,), (0,)), ((), ())),
                                     preferred_element_type=jnp.float32)  # (tq, C)
            qf = qf + bq_ref[...]
            q_s[...] = (qf * att_scale).astype(jnp.bfloat16)   # fold 1/sqrt(C)
            m_s[...] = jnp.full(m_s.shape, -jnp.inf, dtype=jnp.float32)
            l_s[...] = jnp.zeros(l_s.shape, dtype=jnp.float32)
            acc_s[...] = jnp.zeros(acc_s.shape, dtype=jnp.float32)

        kv_off = pl.multiple_of(ki * tk, tk)

        @pl.when(qi == 0)
        def _fill_kv_cache():
            # K/V are normalized + projected once per (b, kv-tile) and cached in
            # VMEM; all later q-tiles reuse them (no recompute, no extra HBM reads).
            hn_kv = (xkv_ref[0].astype(jnp.float32) * scale_c + shift_c
                     ).astype(jnp.bfloat16)                               # (C, tk)
            k_t = (jnp.dot(wk_ref[...], hn_kv, preferred_element_type=jnp.float32)
                   + bk_ref[...]).astype(jnp.bfloat16)
            v_t = (jnp.dot(wv_ref[...], hn_kv, preferred_element_type=jnp.float32)
                   + bv_ref[...]).astype(jnp.bfloat16)
            k_cache[:, pl.ds(kv_off, tk)] = k_t
            v_cache[:, pl.ds(kv_off, tk)] = v_t

        k_t = k_cache[:, pl.ds(kv_off, tk)]                               # (C, tk)
        v_t = v_cache[:, pl.ds(kv_off, tk)]                               # (C, tk)

        # logits[i, j] = sum_c q[i, c] * k[c, j]   -- plain NN matmul.
        s = jnp.dot(q_s[...], k_t, preferred_element_type=jnp.float32)    # (tq, tk)

        # Online softmax update (f32 stats).
        m_prev = m_s[...]
        m_new = jnp.maximum(m_prev, jnp.max(s, axis=-1, keepdims=True))
        alpha = jnp.exp(m_prev - m_new)
        p = jnp.exp(s - m_new)                                            # (tq, tk)
        l_s[...] = alpha * l_s[...] + jnp.sum(p, axis=-1, keepdims=True)
        # acc[i, c] += sum_j p[i, j] * v[c, j]  -- NT, the standard flash pattern.
        acc_s[...] = alpha * acc_s[...] + jax.lax.dot_general(
            p.astype(jnp.bfloat16), v_t, (((1,), (1,)), ((), ())),
            preferred_element_type=jnp.float32)                           # (tq, C)
        m_s[...] = m_new

        @pl.when(ki == n_kv - 1)
        def _finalize():
            h = (acc_s[...] * pl.reciprocal(l_s[...], approx=True)
                 ).astype(jnp.bfloat16)                                   # (tq, C)
            # proj[c, i] = sum_c' Wp[c, c'] * h[i, c']  -> (C, tq), no transpose.
            proj = jax.lax.dot_general(wp_ref[...], h, (((1,), (1,)), ((), ())),
                                       preferred_element_type=jnp.float32)
            proj = proj + bp_ref[...]
            o_ref[0] = (xq_ref[0] + proj).astype(o_ref.dtype)   # residual in f32

    xq_spec = pl.BlockSpec((1, C, tq), lambda b, qi, ki: (b, 0, qi))
    # kv-x stream is only needed while the cache is being filled (qi == 0);
    # afterwards the index map pins block 0 so the pipeline stops re-fetching it.
    xkv_spec = pl.BlockSpec((1, C, tk),
                            lambda b, qi, ki: (b, 0, jnp.where(qi == 0, ki, 0)))
    vec_spec = pl.BlockSpec((1, C, 1), lambda b, qi, ki: (b, 0, 0))
    mat_spec = pl.BlockSpec((C, C), lambda b, qi, ki: (0, 0))
    brow_spec = pl.BlockSpec((1, C), lambda b, qi, ki: (0, 0))
    bcol_spec = pl.BlockSpec((C, 1), lambda b, qi, ki: (0, 0))
    out_spec = pl.BlockSpec((1, C, tq), lambda b, qi, ki: (b, 0, qi))

    vmem_limit = int(min(max(_vmem_estimate(C, HW, tq, tk) + (8 << 20), 32 << 20),
                         phys_vmem - (4 << 20)))

    out = pl.pallas_call(
        kernel,
        out_shape=jax.ShapeDtypeStruct((B, C, HW), x.dtype),
        grid=(B, n_q, n_kv),
        in_specs=[
            xq_spec,                 # x (query tile, f32)
            xkv_spec,                # x (kv tile, bf16 stream)
            vec_spec, vec_spec,      # folded GroupNorm scale / shift
            mat_spec, brow_spec,     # wq^T, bq (row)
            mat_spec, bcol_spec,     # wk, bk
            mat_spec, bcol_spec,     # wv, bv
            mat_spec, bcol_spec,     # wp, bp
        ],
        out_specs=out_spec,
        scratch_shapes=[
            pltpu.VMEM((tq, C), jnp.bfloat16),   # cached q projection (transposed)
            pltpu.VMEM((C, HW), jnp.bfloat16),   # K cache (all kv tiles, per batch)
            pltpu.VMEM((C, HW), jnp.bfloat16),   # V cache
            pltpu.VMEM((tq, C), jnp.float32),    # attention accumulator
            pltpu.VMEM((tq, 1), jnp.float32),    # running max
            pltpu.VMEM((tq, 1), jnp.float32),    # running denominator
        ],
        compiler_params=pltpu.CompilerParams(
            # q-tile axis must stay sequential: q-tiles > 0 read the K/V cache
            # that qi == 0 filled.  Batch stays megacore-parallel.
            dimension_semantics=("parallel", "arbitrary", "arbitrary"),
            vmem_limit_bytes=vmem_limit),
    )(x, x_kv, scale, shift, wq_t, bq, wk, bk, wv, bv, wp, bp)

    return out.reshape(B, C, H, W)


def attn_block_reference(x, params):
    """Pure-JAX f32 reference mirroring the PyTorch forward exactly (NCHW)."""
    B, C, H, W = x.shape
    G = NUM_GROUPS
    cs = C // G
    xr = x.reshape(B, G, cs, H, W)
    mean = xr.mean(axis=(2, 3, 4), keepdims=True)
    var = xr.var(axis=(2, 3, 4), keepdims=True)
    hn = (xr - mean) / jnp.sqrt(var + EPS)
    hn = hn.reshape(B, C, H, W)
    hn = hn * params["gn_w"][None, :, None, None] + params["gn_b"][None, :, None, None]

    def conv1x1(h, Wm, b):
        return jnp.einsum("oc,bchw->bohw", Wm, h) + b[None, :, None, None]

    q = conv1x1(hn, params["w_q"], params["b_q"])
    k = conv1x1(hn, params["w_k"], params["b_k"])
    v = conv1x1(hn, params["w_v"], params["b_v"])
    HWn = H * W
    q = jnp.transpose(q.reshape(B, C, HWn), (0, 2, 1))
    k = k.reshape(B, C, HWn)
    w_ = jnp.einsum("bic,bcj->bij", q, k) * (int(C) ** (-0.5))
    w_ = jax.nn.softmax(w_, axis=2)
    v = v.reshape(B, C, HWn)
    h_ = jnp.einsum("bcj,bij->bci", v, w_)
    h_ = h_.reshape(B, C, H, W)
    h_ = conv1x1(h_, params["w_p"], params["b_p"])
    return x + h_


if __name__ == "__main__":
    B, C, H, W = 2, 64, 16, 16   # C must be a multiple of 32 (GroupNorm groups)

    key = jax.random.PRNGKey(0)
    ks = jax.random.split(key, 11)

    params = {
        "gn_w": 1.0 + 0.05 * jax.random.normal(ks[0], (C,), jnp.float32),
        "gn_b": 0.05 * jax.random.normal(ks[1], (C,), jnp.float32),
        # 1x1 conv weights: (C_out, C_in) (kernel dims of size 1 dropped)
        "w_q": jax.random.normal(ks[2], (C, C), jnp.float32) / math.sqrt(C),
        "b_q": 0.05 * jax.random.normal(ks[3], (C,), jnp.float32),
        "w_k": jax.random.normal(ks[4], (C, C), jnp.float32) / math.sqrt(C),
        "b_k": 0.05 * jax.random.normal(ks[5], (C,), jnp.float32),
        "w_v": jax.random.normal(ks[6], (C, C), jnp.float32) / math.sqrt(C),
        "b_v": 0.05 * jax.random.normal(ks[7], (C,), jnp.float32),
        "w_p": jax.random.normal(ks[8], (C, C), jnp.float32) / math.sqrt(C),
        "b_p": 0.05 * jax.random.normal(ks[9], (C,), jnp.float32),
    }

    x = jax.random.normal(ks[10], (B, C, H, W), jnp.float32)

    out = jax.block_until_ready(attn_block(x, params))
    ref = jax.block_until_ready(attn_block_reference(x, params))

    assert out.shape == (B, C, H, W)
    max_err = float(jnp.max(jnp.abs(out - ref)))
    # bf16 MXU inputs / bf16 kv stream (f32 accumulation) => relaxed tolerance.
    assert jnp.allclose(out, ref, atol=5e-2, rtol=5e-2), max_err
    print("KERNEL_OK")
</pallas_src>

<mosaic_0001>
module attributes {stable_mosaic.version = 11 : i64} {
  func.func @kernel(%arg0: i32, %arg1: i32, %arg2: i32, %arg3: memref<1x64x256xf32, #tpu.memory_space<vmem>>, %arg4: memref<1x64x256xbf16, #tpu.memory_space<vmem>>, %arg5: memref<1x64x1xf32, #tpu.memory_space<vmem>>, %arg6: memref<1x64x1xf32, #tpu.memory_space<vmem>>, %arg7: memref<64x64xbf16, #tpu.memory_space<vmem>>, %arg8: memref<1x64xf32, #tpu.memory_space<vmem>>, %arg9: memref<64x64xbf16, #tpu.memory_space<vmem>>, %arg10: memref<64x1xf32, #tpu.memory_space<vmem>>, %arg11: memref<64x64xbf16, #tpu.memory_space<vmem>>, %arg12: memref<64x1xf32, #tpu.memory_space<vmem>>, %arg13: memref<64x64xbf16, #tpu.memory_space<vmem>>, %arg14: memref<64x1xf32, #tpu.memory_space<vmem>>, %arg15: memref<1x64x256xf32, #tpu.memory_space<vmem>>, %arg16: memref<256x64xbf16, #tpu.memory_space<vmem>>, %arg17: memref<64x256xbf16, #tpu.memory_space<vmem>>, %arg18: memref<64x256xbf16, #tpu.memory_space<vmem>>, %arg19: memref<256x64xf32, #tpu.memory_space<vmem>>, %arg20: memref<256x1xf32, #tpu.memory_space<vmem>>, %arg21: memref<256x1xf32, #tpu.memory_space<vmem>>) attributes {dimension_semantics = [#tpu.dimension_semantics<parallel>, #tpu.dimension_semantics<arbitrary>, #tpu.dimension_semantics<arbitrary>], iteration_bounds = array<i64: 2, 1, 1>, scalar_prefetch = 0 : i64, scratch_operands = 6 : i64, tpu.core_type = #tpu.core_type<tc>, window_params = [{transform_indices = @transform_0, window_bounds = array<i64: 1, 64, 256>}, {transform_indices = @transform_1, window_bounds = array<i64: 1, 64, 256>}, {transform_indices = @transform_2, window_bounds = array<i64: 1, 64, 1>}, {transform_indices = @transform_3, window_bounds = array<i64: 1, 64, 1>}, {pipeline_mode = #tpu.pipeline_mode<synchronous>, transform_indices = @transform_4, window_bounds = array<i64: 64, 64>}, {pipeline_mode = #tpu.pipeline_mode<synchronous>, transform_indices = @transform_5, window_bounds = array<i64: 1, 64>}, {pipeline_mode = #tpu.pipeline_mode<synchronous>, transform_indices = @transform_6, window_bounds = array<i64: 64, 64>}, {pipeline_mode = #tpu.pipeline_mode<synchronous>, transform_indices = @transform_7, window_bounds = array<i64: 64, 1>}, {pipeline_mode = #tpu.pipeline_mode<synchronous>, transform_indices = @transform_8, window_bounds = array<i64: 64, 64>}, {pipeline_mode = #tpu.pipeline_mode<synchronous>, transform_indices = @transform_9, window_bounds = array<i64: 64, 1>}, {pipeline_mode = #tpu.pipeline_mode<synchronous>, transform_indices = @transform_10, window_bounds = array<i64: 64, 64>}, {pipeline_mode = #tpu.pipeline_mode<synchronous>, transform_indices = @transform_11, window_bounds = array<i64: 64, 1>}, {transform_indices = @transform_12, window_bounds = array<i64: 1, 64, 256>}]} {
    %c0 = arith.constant 0 : index
    %c0_0 = arith.constant 0 : index
    %c0_1 = arith.constant 0 : index
    %0 = vector.load %arg5[%c0, %c0_0, %c0_1] : memref<1x64x1xf32, #tpu.memory_space<vmem>>, vector<1x64x1xf32>
    %1 = vector.shape_cast %0 : vector<1x64x1xf32> to vector<64x1xf32>
    %c0_2 = arith.constant 0 : index
    %c0_3 = arith.constant 0 : index
    %c0_4 = arith.constant 0 : index
    %2 = vector.load %arg6[%c0_2, %c0_3, %c0_4] : memref<1x64x1xf32, #tpu.memory_space<vmem>>, vector<1x64x1xf32>
    %3 = vector.shape_cast %2 : vector<1x64x1xf32> to vector<64x1xf32>
    %c0_i32 = arith.constant 0 : i32
    %4 = arith.cmpi eq, %arg2, %c0_i32 : i32
    %5 = arith.extui %4 : i1 to i32
    %c0_i32_5 = arith.constant 0 : i32
    %6 = arith.cmpi ne, %5, %c0_i32_5 : i32
    scf.if %6 {
      %c0_29 = arith.constant 0 : index
      %c0_30 = arith.constant 0 : index
      %c0_31 = arith.constant 0 : index
      %44 = vector.load %arg3[%c0_29, %c0_30, %c0_31] : memref<1x64x256xf32, #tpu.memory_space<vmem>>, vector<1x64x256xf32>
      %45 = vector.shape_cast %44 : vector<1x64x256xf32> to vector<64x256xf32>
      %46 = vector.broadcast %1 : vector<64x1xf32> to vector<64x256xf32>
      %47 = arith.mulf %45, %46 : vector<64x256xf32>
      %48 = vector.broadcast %3 : vector<64x1xf32> to vector<64x256xf32>
      %49 = arith.addf %47, %48 : vector<64x256xf32>
      %50 = arith.truncf %49 : vector<64x256xf32> to vector<64x256xbf16>
      %c0_32 = arith.constant 0 : index
      %c0_33 = arith.constant 0 : index
      %51 = vector.load %arg7[%c0_32, %c0_33] : memref<64x64xbf16, #tpu.memory_space<vmem>>, vector<64x64xbf16>
      %cst_34 = arith.constant dense<0.000000e+00> : vector<256x64xf32>
      %52 = tpu.matmul %50, %51, %cst_34 {dimension_numbers = #tpu.dot_dimension_numbers<[0], [0], [1], [1], [0, 1, 1, 1], [], []>} : vector<64x256xbf16>, vector<64x64xbf16>, vector<256x64xf32> -> vector<256x64xf32>
      %c0_35 = arith.constant 0 : index
      %c0_36 = arith.constant 0 : index
      %53 = vector.load %arg8[%c0_35, %c0_36] : memref<1x64xf32, #tpu.memory_space<vmem>>, vector<1x64xf32>
      %54 = vector.broadcast %53 : vector<1x64xf32> to vector<256x64xf32>
      %55 = arith.addf %52, %54 : vector<256x64xf32>
      %cst_37 = arith.constant 1.250000e-01 : f32
      %56 = vector.broadcast %cst_37 : f32 to vector<256x64xf32>
      %57 = arith.mulf %55, %56 : vector<256x64xf32>
      %58 = arith.truncf %57 : vector<256x64xf32> to vector<256x64xbf16>
      %c0_38 = arith.constant 0 : index
      %c0_39 = arith.constant 0 : index
      %59 = vector.load %arg16[%c0_38, %c0_39] : memref<256x64xbf16, #tpu.memory_space<vmem>>, vector<256x64xbf16>
      tpu.vector_store %arg16[%c0_38, %c0_39], %58 {strides = array<i32>} : memref<256x64xbf16, #tpu.memory_space<vmem>>, vector<256x64xbf16>,
      %cst_40 = arith.constant 0xFF800000 : f32
      %60 = vector.broadcast %cst_40 : f32 to vector<256x1xf32>
      %c0_41 = arith.constant 0 : index
      %c0_42 = arith.constant 0 : index
      %61 = vector.load %arg20[%c0_41, %c0_42] : memref<256x1xf32, #tpu.memory_space<vmem>>, vector<256x1xf32>
      tpu.vector_store %arg20[%c0_41, %c0_42], %60 {strides = array<i32>} : memref<256x1xf32, #tpu.memory_space<vmem>>, vector<256x1xf32>,
      %cst_43 = arith.constant 0.000000e+00 : f32
      %62 = vector.broadcast %cst_43 : f32 to vector<256x1xf32>
      %c0_44 = arith.constant 0 : index
      %c0_45 = arith.constant 0 : index
      %63 = vector.load %arg21[%c0_44, %c0_45] : memref<256x1xf32, #tpu.memory_space<vmem>>, vector<256x1xf32>
      tpu.vector_store %arg21[%c0_44, %c0_45], %62 {strides = array<i32>} : memref<256x1xf32, #tpu.memory_space<vmem>>, vector<256x1xf32>,
      %cst_46 = arith.constant 0.000000e+00 : f32
      %64 = vector.broadcast %cst_46 : f32 to vector<256x64xf32>
      %c0_47 = arith.constant 0 : index
      %c0_48 = arith.constant 0 : index
      %65 = vector.load %arg19[%c0_47, %c0_48] : memref<256x64xf32, #tpu.memory_space<vmem>>, vector<256x64xf32>
      tpu.vector_store %arg19[%c0_47, %c0_48], %64 {strides = array<i32>} : memref<256x64xf32, #tpu.memory_space<vmem>>, vector<256x64xf32>,
    } else {
    }
    %c256_i32 = arith.constant 256 : i32
    %7 = arith.muli %arg2, %c256_i32 : i32
    %8 = tpu.assume_multiple %7, 256 : i32
    %c0_i32_6 = arith.constant 0 : i32
    %9 = arith.cmpi eq, %arg1, %c0_i32_6 : i32
    %10 = arith.extui %9 : i1 to i32
    %c0_i32_7 = arith.constant 0 : i32
    %11 = arith.cmpi ne, %10, %c0_i32_7 : i32
    scf.if %11 {
      %c0_29 = arith.constant 0 : index
      %c0_30 = arith.constant 0 : index
      %c0_31 = arith.constant 0 : index
      %44 = vector.load %arg4[%c0_29, %c0_30, %c0_31] : memref<1x64x256xbf16, #tpu.memory_space<vmem>>, vector<1x64x256xbf16>
      %45 = vector.shape_cast %44 : vector<1x64x256xbf16> to vector<64x256xbf16>
      %46 = arith.extf %45 : vector<64x256xbf16> to vector<64x256xf32>
      %47 = vector.broadcast %1 : vector<64x1xf32> to vector<64x256xf32>
      %48 = arith.mulf %46, %47 : vector<64x256xf32>
      %49 = vector.broadcast %3 : vector<64x1xf32> to vector<64x256xf32>
      %50 = arith.addf %48, %49 : vector<64x256xf32>
      %51 = arith.truncf %50 : vector<64x256xf32> to vector<64x256xbf16>
      %c0_32 = arith.constant 0 : index
      %c0_33 = arith.constant 0 : index
      %52 = vector.load %arg9[%c0_32, %c0_33] : memref<64x64xbf16, #tpu.memory_space<vmem>>, vector<64x64xbf16>
      %cst_34 = arith.constant dense<0.000000e+00> : vector<64x256xf32>
      %53 = tpu.matmul %52, %51, %cst_34 {dimension_numbers = #tpu.dot_dimension_numbers<[1], [0], [0], [1], [0, 0, 1, 1], [], []>} : vector<64x64xbf16>, vector<64x256xbf16>, vector<64x256xf32> -> vector<64x256xf32>
      %c0_35 = arith.constant 0 : index
      %c0_36 = arith.constant 0 : index
      %54 = vector.load %arg10[%c0_35, %c0_36] : memref<64x1xf32, #tpu.memory_space<vmem>>, vector<64x1xf32>
      %55 = vector.broadcast %54 : vector<64x1xf32> to vector<64x256xf32>
      %56 = arith.addf %53, %55 : vector<64x256xf32>
      %57 = arith.truncf %56 : vector<64x256xf32> to vector<64x256xbf16>
      %c0_37 = arith.constant 0 : index
      %c0_38 = arith.constant 0 : index
      %58 = vector.load %arg11[%c0_37, %c0_38] : memref<64x64xbf16, #tpu.memory_space<vmem>>, vector<64x64xbf16>
      %cst_39 = arith.constant dense<0.000000e+00> : vector<64x256xf32>
      %59 = tpu.matmul %58, %51, %cst_39 {dimension_numbers = #tpu.dot_dimension_numbers<[1], [0], [0], [1], [0, 0, 1, 1], [], []>} : vector<64x64xbf16>, vector<64x256xbf16>, vector<64x256xf32> -> vector<64x256xf32>
      %c0_40 = arith.constant 0 : index
      %c0_41 = arith.constant 0 : index
      %60 = vector.load %arg12[%c0_40, %c0_41] : memref<64x1xf32, #tpu.memory_space<vmem>>, vector<64x1xf32>
      %61 = vector.broadcast %60 : vector<64x1xf32> to vector<64x256xf32>
      %62 = arith.addf %59, %61 : vector<64x256xf32>
      %63 = arith.truncf %62 : vector<64x256xf32> to vector<64x256xbf16>
      %c0_42 = arith.constant 0 : index
      %64 = arith.index_cast %8 : i32 to index
      %65 = vector.load %arg17[%c0_42, %64] : memref<64x256xbf16, #tpu.memory_space<vmem>>, vector<64x256xbf16>
      tpu.vector_store %arg17[%c0_42, %64], %57 {strides = array<i32>} : memref<64x256xbf16, #tpu.memory_space<vmem>>, vector<64x256xbf16>,
      %c0_43 = arith.constant 0 : index
      %66 = arith.index_cast %8 : i32 to index
      %67 = vector.load %arg18[%c0_43, %66] : memref<64x256xbf16, #tpu.memory_space<vmem>>, vector<64x256xbf16>
      tpu.vector_store %arg18[%c0_43, %66], %63 {strides = array<i32>} : memref<64x256xbf16, #tpu.memory_space<vmem>>, vector<64x256xbf16>,
    } else {
    }
    %c0_8 = arith.constant 0 : index
    %12 = arith.index_cast %8 : i32 to index
    %13 = vector.load %arg17[%c0_8, %12] : memref<64x256xbf16, #tpu.memory_space<vmem>>, vector<64x256xbf16>
    %c0_9 = arith.constant 0 : index
    %14 = arith.index_cast %8 : i32 to index
    %15 = vector.load %arg18[%c0_9, %14] : memref<64x256xbf16, #tpu.memory_space<vmem>>, vector<64x256xbf16>
    %c0_10 = arith.constant 0 : index
    %c0_11 = arith.constant 0 : index
    %16 = vector.load %arg16[%c0_10, %c0_11] : memref<256x64xbf16, #tpu.memory_space<vmem>>, vector<256x64xbf16>
    %cst = arith.constant dense<0.000000e+00> : vector<256x256xf32>
    %17 = tpu.matmul %16, %13, %cst {dimension_numbers = #tpu.dot_dimension_numbers<[1], [0], [0], [1], [0, 0, 1, 1], [], []>} : vector<256x64xbf16>, vector<64x256xbf16>, vector<256x256xf32> -> vector<256x256xf32>
    %c0_12 = arith.constant 0 : index
    %c0_13 = arith.constant 0 : index
    %18 = vector.load %arg20[%c0_12, %c0_13] : memref<256x1xf32, #tpu.memory_space<vmem>>, vector<256x1xf32>
    %cst_14 = arith.constant dense<0xFF800000> : vector<256xf32>
    %19 = vector.multi_reduction <maximumf>, %17, %cst_14 [1] : vector<256x256xf32> to vector<256xf32>
    %20 = vector.shape_cast %19 : vector<256xf32> to vector<256x1xf32>
    %21 = arith.maximumf %18, %20 : vector<256x1xf32>
    %22 = arith.subf %18, %21 : vector<256x1xf32>
    %23 = math.exp %22 : vector<256x1xf32>
    %24 = vector.broadcast %21 : vector<256x1xf32> to vector<256x256xf32>
    %25 = arith.subf %17, %24 : vector<256x256xf32>
    %26 = math.exp %25 : vector<256x256xf32>
    %c0_15 = arith.constant 0 : index
    %c0_16 = arith.constant 0 : index
    %27 = vector.load %arg21[%c0_15, %c0_16] : memref<256x1xf32, #tpu.memory_space<vmem>>, vector<256x1xf32>
    %28 = arith.mulf %23, %27 : vector<256x1xf32>
    %cst_17 = arith.constant dense<0.000000e+00> : vector<256xf32>
    %29 = vector.multi_reduction <add>, %26, %cst_17 [1] : vector<256x256xf32> to vector<256xf32>
    %30 = vector.shape_cast %29 : vector<256xf32> to vector<256x1xf32>
    %31 = arith.addf %28, %30 : vector<256x1xf32>
    %c0_18 = arith.constant 0 : index
    %c0_19 = arith.constant 0 : index
    %32 = vector.load %arg21[%c0_18, %c0_19] : memref<256x1xf32, #tpu.memory_space<vmem>>, vector<256x1xf32>
    tpu.vector_store %arg21[%c0_18, %c0_19], %31 {strides = array<i32>} : memref<256x1xf32, #tpu.memory_space<vmem>>, vector<256x1xf32>,
    %c0_20 = arith.constant 0 : index
    %c0_21 = arith.constant 0 : index
    %33 = vector.load %arg19[%c0_20, %c0_21] : memref<256x64xf32, #tpu.memory_space<vmem>>, vector<256x64xf32>
    %34 = vector.broadcast %23 : vector<256x1xf32> to vector<256x64xf32>
    %35 = arith.mulf %34, %33 : vector<256x64xf32>
    %36 = arith.truncf %26 : vector<256x256xf32> to vector<256x256xbf16>
    %cst_22 = arith.constant dense<0.000000e+00> : vector<256x64xf32>
    %37 = tpu.matmul %36, %15, %cst_22 {dimension_numbers = #tpu.dot_dimension_numbers<[1], [1], [0], [0], [0, 0, 1, 0], [], []>} : vector<256x256xbf16>, vector<64x256xbf16>, vector<256x64xf32> -> vector<256x64xf32>
    %38 = arith.addf %35, %37 : vector<256x64xf32>
    %c0_23 = arith.constant 0 : index
    %c0_24 = arith.constant 0 : index
    %39 = vector.load %arg19[%c0_23, %c0_24] : memref<256x64xf32, #tpu.memory_space<vmem>>, vector<256x64xf32>
    tpu.vector_store %arg19[%c0_23, %c0_24], %38 {strides = array<i32>} : memref<256x64xf32, #tpu.memory_space<vmem>>, vector<256x64xf32>,
    %c0_25 = arith.constant 0 : index
    %c0_26 = arith.constant 0 : index
    %40 = vector.load %arg20[%c0_25, %c0_26] : memref<256x1xf32, #tpu.memory_space<vmem>>, vector<256x1xf32>
    tpu.vector_store %arg20[%c0_25, %c0_26], %21 {strides = array<i32>} : memref<256x1xf32, #tpu.memory_space<vmem>>, vector<256x1xf32>,
    %c0_i32_27 = arith.constant 0 : i32
    %41 = arith.cmpi eq, %arg2, %c0_i32_27 : i32
    %42 = arith.extui %41 : i1 to i32
    %c0_i32_28 = arith.constant 0 : i32
    %43 = arith.cmpi ne, %42, %c0_i32_28 : i32
    scf.if %43 {
      %c0_29 = arith.constant 0 : index
      %c0_30 = arith.constant 0 : index
      %44 = vector.load %arg19[%c0_29, %c0_30] : memref<256x64xf32, #tpu.memory_space<vmem>>, vector<256x64xf32>
      %c0_31 = arith.constant 0 : index
      %c0_32 = arith.constant 0 : index
      %45 = vector.load %arg21[%c0_31, %c0_32] : memref<256x1xf32, #tpu.memory_space<vmem>>, vector<256x1xf32>
      %46 = tpu.reciprocal %45 {approx = true} : vector<256x1xf32> -> vector<256x1xf32>
      %47 = vector.broadcast %46 : vector<256x1xf32> to vector<256x64xf32>
      %48 = arith.mulf %44, %47 : vector<256x64xf32>
      %49 = arith.truncf %48 : vector<256x64xf32> to vector<256x64xbf16>
      %c0_33 = arith.constant 0 : index
      %c0_34 = arith.constant 0 : index
      %50 = vector.load %arg13[%c0_33, %c0_34] : memref<64x64xbf16, #tpu.memory_space<vmem>>, vector<64x64xbf16>
      %cst_35 = arith.constant dense<0.000000e+00> : vector<64x256xf32>
      %51 = tpu.matmul %50, %49, %cst_35 {dimension_numbers = #tpu.dot_dimension_numbers<[1], [1], [0], [0], [0, 0, 1, 0], [], []>} : vector<64x64xbf16>, vector<256x64xbf16>, vector<64x256xf32> -> vector<64x256xf32>
      %c0_36 = arith.constant 0 : index
      %c0_37 = arith.constant 0 : index
      %52 = vector.load %arg14[%c0_36, %c0_37] : memref<64x1xf32, #tpu.memory_space<vmem>>, vector<64x1xf32>
      %53 = vector.broadcast %52 : vector<64x1xf32> to vector<64x256xf32>
      %54 = arith.addf %51, %53 : vector<64x256xf32>
      %c0_38 = arith.constant 0 : index
      %c0_39 = arith.constant 0 : index
      %c0_40 = arith.constant 0 : index
      %55 = vector.load %arg3[%c0_38, %c0_39, %c0_40] : memref<1x64x256xf32, #tpu.memory_space<vmem>>, vector<1x64x256xf32>
      %56 = vector.shape_cast %55 : vector<1x64x256xf32> to vector<64x256xf32>
      %57 = arith.addf %56, %54 : vector<64x256xf32>
      %c0_41 = arith.constant 0 : index
      %c0_42 = arith.constant 0 : index
      %c0_43 = arith.constant 0 : index
      %58 = vector.load %arg15[%c0_41, %c0_42, %c0_43] : memref<1x64x256xf32, #tpu.memory_space<vmem>>, vector<1x64x256xf32>
      %59 = vector.shape_cast %58 : vector<1x64x256xf32> to vector<64x256xf32>
      %60 = vector.shape_cast %57 : vector<64x256xf32> to vector<1x64x256xf32>
      tpu.vector_store %arg15[%c0_41, %c0_42, %c0_43], %60 {strides = array<i32>} : memref<1x64x256xf32, #tpu.memory_space<vmem>>, vector<1x64x256xf32>,
    } else {
    }
    return
  }
  func.func @transform_0(%arg0: i32, %arg1: i32, %arg2: i32) -> (i32, i32, i32) {
    %c0_i32 = arith.constant 0 : i32
    %c0_i32_0 = arith.constant 0 : i32
    return %arg0, %c0_i32, %arg1 : i32, i32, i32
  }
  func.func @transform_1(%arg0: i32, %arg1: i32, %arg2: i32) -> (i32, i32, i32) {
    %c0_i32 = arith.constant 0 : i32
    %0 = arith.cmpi eq, %arg1, %c0_i32 : i32
    %c0_i32_0 = arith.constant 0 : i32
    %1 = arith.select %0, %arg2, %c0_i32_0 : i32
    %c0_i32_1 = arith.constant 0 : i32
    %c0_i32_2 = arith.constant 0 : i32
    return %arg0, %c0_i32_1, %1 : i32, i32, i32
  }
  func.func @transform_2(%arg0: i32, %arg1: i32, %arg2: i32) -> (i32, i32, i32) {
    %c0_i32 = arith.constant 0 : i32
    %c0_i32_0 = arith.constant 0 : i32
    %c0_i32_1 = arith.constant 0 : i32
    return %arg0, %c0_i32, %c0_i32_0 : i32, i32, i32
  }
  func.func @transform_3(%arg0: i32, %arg1: i32, %arg2: i32) -> (i32, i32, i32) {
    %c0_i32 = arith.constant 0 : i32
    %c0_i32_0 = arith.constant 0 : i32
    %c0_i32_1 = arith.constant 0 : i32
    return %arg0, %c0_i32, %c0_i32_0 : i32, i32, i32
  }
  func.func @transform_4(%arg0: i32, %arg1: i32, %arg2: i32) -> (i32, i32) {
    %c0_i32 = arith.constant 0 : i32
    %c0_i32_0 = arith.constant 0 : i32
    %c0_i32_1 = arith.constant 0 : i32
    return %c0_i32, %c0_i32_0 : i32, i32
  }
  func.func @transform_5(%arg0: i32, %arg1: i32, %arg2: i32) -> (i32, i32) {
    %c0_i32 = arith.constant 0 : i32
    %c0_i32_0 = arith.constant 0 : i32
    %c0_i32_1 = arith.constant 0 : i32
    return %c0_i32, %c0_i32_0 : i32, i32
  }
  func.func @transform_6(%arg0: i32, %arg1: i32, %arg2: i32) -> (i32, i32) {
    %c0_i32 = arith.constant 0 : i32
    %c0_i32_0 = arith.constant 0 : i32
    %c0_i32_1 = arith.constant 0 : i32
    return %c0_i32, %c0_i32_0 : i32, i32
  }
  func.func @transform_7(%arg0: i32, %arg1: i32, %arg2: i32) -> (i32, i32) {
    %c0_i32 = arith.constant 0 : i32
    %c0_i32_0 = arith.constant 0 : i32
    %c0_i32_1 = arith.constant 0 : i32
    return %c0_i32, %c0_i32_0 : i32, i32
  }
  func.func @transform_8(%arg0: i32, %arg1: i32, %arg2: i32) -> (i32, i32) {
    %c0_i32 = arith.constant 0 : i32
    %c0_i32_0 = arith.constant 0 : i32
    %c0_i32_1 = arith.constant 0 : i32
    return %c0_i32, %c0_i32_0 : i32, i32
  }
  func.func @transform_9(%arg0: i32, %arg1: i32, %arg2: i32) -> (i32, i32) {
    %c0_i32 = arith.constant 0 : i32
    %c0_i32_0 = arith.constant 0 : i32
    %c0_i32_1 = arith.constant 0 : i32
    return %c0_i32, %c0_i32_0 : i32, i32
  }
  func.func @transform_10(%arg0: i32, %arg1: i32, %arg2: i32) -> (i32, i32) {
    %c0_i32 = arith.constant 0 : i32
    %c0_i32_0 = arith.constant 0 : i32
    %c0_i32_1 = arith.constant 0 : i32
    return %c0_i32, %c0_i32_0 : i32, i32
  }
  func.func @transform_11(%arg0: i32, %arg1: i32, %arg2: i32) -> (i32, i32) {
    %c0_i32 = arith.constant 0 : i32
    %c0_i32_0 = arith.constant 0 : i32
    %c0_i32_1 = arith.constant 0 : i32
    return %c0_i32, %c0_i32_0 : i32, i32
  }
  func.func @transform_12(%arg0: i32, %arg1: i32, %arg2: i32) -> (i32, i32, i32) {
    %c0_i32 = arith.constant 0 : i32
    %c0_i32_0 = arith.constant 0 : i32
    return %arg0, %c0_i32, %arg1 : i32, i32, i32
  }
}

</mosaic_0001>

<bundles_post_ra>
// kernel: tpu_custom_call.1
= control target key start
LH: loop header
LB: loop body
LE: loop exit
PB: predicated region body
PF: predicated region fallthrough
CT: control target
= control target key end

     0   :  { %17 = vsyncpa [#allocation9], 0  ;;  %s6551_s0 = inlined_call_operand.vmem [shape: f32[2,64,256], index: 0, kind: input, shape index: {}]   ;;  %s6552_s1 = inlined_call_operand.vmem [shape: bf16[2,64,256], index: 1, kind: input, shape index: {}]   ;;  %s6553_s2 = inlined_call_operand.vmem [shape: f32[2,64,1], index: 2, kind: input, shape index: {}]   ;;  %s6554_s3 = inlined_call_operand.vmem [shape: f32[2,64,1], index: 3, kind: input, shape index: {}]   ;;  %s6555_s4 = inlined_call_operand.vmem [shape: bf16[64,64], index: 4, kind: input, shape index: {}]   ;;  %s6556_s5 = inlined_call_operand.hbm [shape: f32[1,64], index: 5, kind: input, shape index: {}]   ;;  %s6557_s6 = inlined_call_operand.vmem [shape: bf16[64,64], index: 6, kind: input, shape index: {}]   ;;  %s6558_s7 = inlined_call_operand.vmem [shape: f32[64,1], index: 7, kind: input, shape index: {}]   ;;  %s6559_s8 = inlined_call_operand.vmem [shape: bf16[64,64], index: 8, kind: input, shape index: {}]   ;;  %s6560_s9 = inlined_call_operand.vmem [shape: f32[64,1], index: 9, kind: input, shape index: {}]   ;;  %s6561_s10 = inlined_call_operand.hbm [shape: bf16[64,64], index: 10, kind: input, shape index: {}]   ;;  %s6562_s11 = inlined_call_operand.vmem [shape: f32[64,1], index: 11, kind: input, shape index: {}]   ;;  %s6563_s12 = inlined_call_operand.hbm [shape: f32[2,64,256], index: 12, kind: output, shape index: {}]  }
   0x1   :  { %18 = vsyncpa [#allocation12], 0 }
   0x2   :  { %19 = vsyncpa [#allocation10], 0 }
   0x3   :  { %21 = vsyncpa [#allocation10 + $0x1], 0  ;;  %s4802_s21 = smov 0   ;;  %s4804_s22 = smov 0  }
   0x4   :  { %s4806_s23 = smov 0   ;;  %s4808_s24 = smov 0  }
   0x5   :  { %s4810_s25 = smov 0   ;;  %s4812_s26 = smov 0  }
   0x6 LB: > { %6638 = sst [smem:[#allocation17_spill]] %s4705_s21  ;;  %s4037_s27 = sadd.s32 4294967295, %s4725_s26   ;;  %s4725_s26 = sphi %s4812_s26, %s27_s26   ;;  %s4721_s25 = sphi %s4810_s25, %s6821_s25   ;;  %s4717_s24 = sphi %s4808_s24, %s6820_s24   ;;  %s4713_s23 = sphi %s4806_s23, %s6824_s23   ;;  %s4709_s22 = sphi %s4804_s22, %s6823_s22   ;;  %s4705_s21 = sphi %s4802_s21, %s6822_s21  }
   0x7   : > { %6639 = sst [smem:[#allocation18_spill]] %s4713_s23  ;;  %s4038_s28 = sadd.s32 4294967294, %s4725_s26  }
   0x8   : > { %6640 = sst [smem:[#allocation19_spill]] %s4721_s25  ;;  %s46_s29 = sadd.s32 1, %s4721_s25 }
   0x9   : > { %s335_s30 = sadd.s32 1, %s4713_s23  ;;  %p48_p0 = scmp.ge.s32.totalorder %s46_s29, 2 }
   0xa   : > { %p345_p1 = scmp.ne.s32.totalorder %s4713_s23, %s4709_s22  ;;  %p346_p2 = scmp.eq.s32.totalorder %s4037_s27, 1 }
   0xb   : > { %p351_p3 = scmp.ne.s32.totalorder %s4709_s22, %s4705_s21  ;;  %s6826_s29 = smov (%p48_p0, %s46_s29), 0 }
   0xc   : > { %6641 = sst [smem:[#allocation20_spill]] %s6826_s29  ;;  %p4842_p4 = por %p346_p2, %p345_p1 }
   0xd   : > { %p352_p5 = scmp.eq.s32.totalorder %s4038_s28, 1  ;;  %s330_s14 = ssub.s32 %s4721_s25, %s6826_s29 }
   0xe   : > { %s6642_s13 = scalar_select %p4842_p4, 1, 0 }
   0xf   : > { %p4039_p6 = scmp.ge.s32.totalorder %s4725_s26, 1  ;;  %p333_p7 = scmp.eq.s32.totalorder %s330_s14, 0 }
  0x10   : > { %p4849_p8 = por %p352_p5, %p351_p3  ;;  %p359_p9 = scmp.lt.s32.totalorder %s4725_s26, 3 }
  0x11   : > { %s4855_s16 = scalar_select %p333_p7, %s4713_s23, %s335_s30  }
  0x12   : > { %s6643_s15 = scalar_select %p4849_p8, 1, 0 }
  0x13   : > { %6645 = sst [smem:[#allocation22_spill]] %s4855_s16  ;;  %p4857_p10 = pnand %p4039_p6, %p359_p9 }
  0x14   : > { %6644 = sst [smem:[#allocation21_spill]] %s6643_s15  ;;  %p4861_p11 = scmp.eq.s32.totalorder %s4037_s27, 0 }
  0x15   : > { %s6646_s17 = scalar_select %p4857_p10, 1, 0 }
  0x16   : > { %s6647_s18 = scalar_select %p4861_p11, 1, 0 }
  0x17   : > { %p4236_p12 = pneg %p4857_p10  ;;  %s4727_s19 = smov [#allocation8]  }
  0x18   : > { %s375_s20 = sshll.u32 %s4727_s19, 4  ;;  %s4728_s28 = smov [#allocation11]   ;;  %s376_s20 = int_to_ptr.vmem [resolvable:$true] %s375_s20 }
  0x19   : > { %s397_s14 = sshll.u32 %s4728_s28, 4  ;;  %p4869_p13 = pnand %p4861_p11, %p4236_p12  ;;  %s4873_s14 = int_to_ptr.vmem [resolvable:$true] %s397_s14 }
  0x1a   : > { %s4583_s25 = scalar_lea.hbm %s6556_s5, 16 }
  0x1b   : > { %p4584_p0 = scmp.ne.s32.totalorder %s6556_s5, %s4583_s25  ;;  %p4585_p1 = pneg %p4869_p13 }
  0x1c   : > { %p4590_p5 = scmp.lt.u32.totalorder %s4583_s25, %s6556_s5 }
  0x1d   : > { %p4586_p2 = pnand %p4585_p1, %p4584_p0 }
  0x1f   : > { %p4587_p3 = pneg %p4586_p2 }
  0x21   : > { %p4592_p6 = pnand %p4590_p5, %p4587_p3 }
  0x23   : > { %4595 = shalt.err (!%p4592_p6)
}
  0x24   : > { %s4596_s15 = scalar_lea.vmem %s376_s20, 16  ;;  %s4603_s23 = scalar_lea.vmem %s376_s20, 32 }
  0x25   : > { %p4597_p7 = scmp.ne.s32.totalorder %s376_s20, %s4596_s15  ;;  %p4604_p8 = scmp.lt.s32.totalorder %s376_s20, %s376_s20 }
  0x26   : > { %p4605_p4 = scmp.lt.s32.totalorder %s4603_s23, %s4596_s15 }
  0x27   : > { %p4599_p9 = pnand %p4597_p7, %p4585_p1 }
  0x28   : > { %p4606_p11 = por %p4605_p4, %p4604_p8 }
  0x29   : > { %p4600_p12 = pneg %p4599_p9 }
  0x2b   : > { %p4607_p10 = pnand %p4606_p11, %p4600_p12 }
  0x2d   : > { %4610 = shalt.err (!%p4607_p10)
}
  0x2e   : > { %4239 = dma.hbm_to_vmem [thread:$0]  (!%p4869_p13), %s6556_s5, 16, %s376_s20, [#allocation9]  }
  0x2f   : > { %s4611_s19 = scalar_lea.hbm %s6561_s10, 512 }
  0x30   : > { %p4612_p0 = scmp.ne.s32.totalorder %s6561_s10, %s4611_s19  ;;  %p4618_p10 = scmp.lt.u32.totalorder %s4611_s19, %s6561_s10 }
  0x32   : > { %p4614_p4 = pnand %p4612_p0, %p4585_p1 }
  0x34   : > { %p4615_p8 = pneg %p4614_p4 }
  0x36   : > { %p4620_p11 = pnand %p4618_p10, %p4615_p8 }
  0x38   : > { %4623 = shalt.err (!%p4620_p11)
}
  0x39   : > { %s4624_s20 = scalar_lea.vmem %s4873_s14, 512  ;;  %p4632_p6 = scmp.lt.s32.totalorder %s4873_s14, %s4873_s14 }
  0x3a   : > { %p4625_p2 = scmp.ne.s32.totalorder %s4873_s14, %s4624_s20  ;;  %p4633_p7 = scmp.lt.s32.totalorder %s4624_s20, %s4624_s20 }
  0x3c   : > { %p4627_p3 = pnand %p4625_p2, %p4585_p1  ;;  %p4634_p9 = por %p4633_p7, %p4632_p6 }
  0x3e   : > { %p4628_p5 = pneg %p4627_p3 }
  0x40   : > { %p4635_p12 = pnand %p4634_p9, %p4628_p5 }
  0x42   : > { %4638 = shalt.err (!%p4635_p12)
}
  0x43   : > { %s4729_s21 = smov 64   ;;  %s4730_s29 = smov 4  }
  0x44   : > { %4242 = dma.hbm_to_vmem [thread:$0]  (!%p4869_p13), %s6561_s10, 512, %s4873_s14, [#allocation12], %s4729_s21, %s4729_s21, %s4730_s29  }
  0x45   : > { %p6649_p0 = scmp.ne.s32.totalorder %s6646_s17, 0 }
  0x47   : > { %462 = sbr.rel (%p6649_p0) target bundleno = 1919 (0x77f), region = 68 }
  0x4e   : > { %p6650_p1 = scmp.ne.s32.totalorder %s6647_s18, 0 }
  0x50   : > { %4692 = dma.done.wait (%p6650_p1), [#allocation9], 16  }
  0x51   : > { %4694 = vsyncadd (%p6650_p1), [#allocation9], 4294967280 }
  0x52   : > { %4696 = dma.done.wait (%p6650_p1), [#allocation12], 512  }
  0x53   : > { %4698 = vsyncadd (%p6650_p1), [#allocation12], 4294966784  ;;  %p534_p4 = scmp.lt.s32.totalorder %s4717_s24, 1  ;;  %v4731_v0 = vmov 0   ;;  %v4311_v17 = vld [vmem:[%s6555_s4] sm:$0xff]   ;;  %v4312_v18 = vld [vmem:[%s6555_s4 + $0x8] sm:$0xff]  }
  0x54   : > { %4310 = vset.pattern.permute.xlu1 %v4731_v0  ;;  %4309 = vset.pattern.permute.xlu0 %v4731_v0  ;;  %v4313_v19 = vld [vmem:[%s6555_s4 + $0x10] sm:$0xff]   ;;  %v4314_v20 = vld [vmem:[%s6555_s4 + $0x18] sm:$0xff]   ;;  %vm796_vm0 = vcmask 523264   ;;  %vm1070_vm1 = vcmask 7168   ;;  %s530_s21 = sand.u32 1, %s4709_s22   ;;  %s4125_s25 = sshll.u32 %s4717_s24, 11 }
  0x55   : > { %s4936_s17 = scalar_select %p534_p4, %s4717_s24, 1  ;;  %4210 = vmatprep.subr.bf16.mxu1 %v4311_v17  ;;  %4170 = vmatprep.subr.bf16.mxu0 %v4311_v17 }
  0x56   : > { %4214 = vmatpush3.bf16.msra.mxu1 %v4311_v17  ;;  %4171 = vmatpush3.bf16.msra.mxu0 %v4311_v17  ;;  %s4046_s29 = sshll.u32 %s530_s21, 7  ;;  %s6505_s24 = scalar_lea.sflag [#allocation10], %s530_s21 }
  0x57   : > { %s4939_s14 = sshll.u32 %s4936_s17, 6  ;;  %4211 = vmatprep.subr.bf16.mxu1 %v4312_v18  ;;  %4172 = vmatprep.subr.bf16.mxu0 %v4312_v18  ;;  %s6464_s16 = scalar_lea.vmem [#allocation13], %s4046_s29 }
  0x58   : > { %s561_s18 = scalar_lea.vmem %s6553_s2, %s4939_s14  ;;  %s566_s15 = scalar_lea.vmem %s6554_s3, %s4939_s14 }
  0x59   : > { %v571_v1 = vld [vmem:[%s561_s18 + $0x10] sm:$0xff]  ;;  %v569_v2 = vld [vmem:[%s561_s18] sm:$0xff]  ;;  %v572_v3 = vld [vmem:[%s561_s18 + $0x18] sm:$0xff]  ;;  %s4985_s20 = scalar_lea.vmem %s6552_s1, %s4939_s14  ;;  %s3883_s30 = sshll.u32 %s6464_s16, 4  ;;  %s6498_s30 = int_to_ptr.vmem [resolvable:$true] %s3883_s30 }
  0x5a   : > { %617 = vperm.xlu1 %4310, %v571_v1   ;;  %607 = vperm.xlu0 %4309, %v569_v2   ;;  %v570_v4 = vld [vmem:[%s561_s18 + $0x8] sm:$0xff]  ;;  %v577_v6 = vld [vmem:[%s566_s15] sm:$0xff]  ;;  %v580_v9 = vld [vmem:[%s566_s15 + $0x18] sm:$0xff]  ;;  %p6814_p8 = scmp.ne.s32.totalorder %s6642_s13, 0  ;;  %s4734_s19 = smov [#allocation13]  }
  0x5b   : > { %v578_v5 = vld [vmem:[%s566_s15 + $0x8] sm:$0xff]  ;;  %v573_v8 = vld [vmem:[%s561_s18 + $0x20] sm:$0xff]  ;;  %v579_v10 = vld [vmem:[%s566_s15 + $0x10] sm:$0xff]  ;;  %4215 = vmatpush3.bf16.msra.mxu1 %v4312_v18  ;;  %4173 = vmatpush3.bf16.msra.mxu0 %v4312_v18  ;;  %s4643_s28 = sshll.u32 %s4734_s19, 4  ;;  %s4644_s28 = int_to_ptr.vmem [resolvable:$false] %s4643_s28 }
  0x5c   : > { %v574_v7 = vld [vmem:[%s561_s18 + $0x28] sm:$0xff]  ;;  %v576_v11 = vld [vmem:[%s561_s18 + $0x38] sm:$0xff]  ;;  %v575_v12 = vld [vmem:[%s561_s18 + $0x30] sm:$0xff]  ;;  %4212 = vmatprep.subr.bf16.mxu1 %v4313_v19  ;;  %4174 = vmatprep.subr.bf16.mxu0 %v4313_v19  ;;  %s4121_s18 = sshll.u32 %s4936_s17, 7  ;;  %s4645_s17 = scalar_lea.vmem %s4644_s28, 4096 }
  0x5d   : > { %v582_v13 = vld [vmem:[%s566_s15 + $0x28] sm:$0xff]  ;;  %v581_v14 = vld [vmem:[%s566_s15 + $0x20] sm:$0xff]  ;;  %v584_v15 = vld [vmem:[%s566_s15 + $0x38] sm:$0xff]  ;;  %p4646_p2 = scmp.lt.s32.totalorder %s6498_s30, %s4644_s28 }
  0x5e   : > { %622 = vperm.xlu1 %4310, %v572_v3   ;;  %612 = vperm.xlu0 %4309, %v570_v4   ;;  %v583_v16 = vld [vmem:[%s566_s15 + $0x30] sm:$0xff]  ;;  %s4965_s15 = scalar_lea.vmem %s6551_s0, %s4121_s18 }
  0x5f   : > { %4216 = vmatpush3.bf16.msra.mxu1 %v4313_v19  ;;  %4175 = vmatpush3.bf16.msra.mxu0 %v4313_v19  ;;  %v589_v23 = vld [vmem:[%s4965_s15] sm:$0xff]  ;;  %v590_v24 = vld [vmem:[%s4965_s15 + $0x8] sm:$0xff]  ;;  %v591_v26 = vld [vmem:[%s4965_s15 + $0x10] sm:$0xff] }
  0x60   : > { %4213 = vmatprep.subr.bf16.mxu1 %v4314_v20  ;;  %4176 = vmatprep.subr.bf16.mxu0 %v4314_v20  ;;  %v592_v27 = vld [vmem:[%s4965_s15 + $0x18] sm:$0xff]  ;;  %v593_v39 = vld [vmem:[%s4965_s15 + $0x20] sm:$0xff]  ;;  %v594_v42 = vld [vmem:[%s4965_s15 + $0x28] sm:$0xff] }
  0x61   : > { %v595_v43 = vld [vmem:[%s4965_s15 + $0x30] sm:$0xff]  ;;  %v596_v44 = vld [vmem:[%s4965_s15 + $0x38] sm:$0xff]  ;;  %v597_v61 = vld [vmem:[%s4965_s15 + $0x40] sm:$0xff] }
  0x62   : > { %668 = vperm.xlu1 %4310, %v578_v5   ;;  %663 = vperm.xlu0 %4309, %v577_v6   ;;  %v599_v57 = vld [vmem:[%s4965_s15 + $0x50] sm:$0xff]  ;;  %v600_v60 = vld [vmem:[%s4965_s15 + $0x58] sm:$0xff]  ;;  %v598_v62 = vld [vmem:[%s4965_s15 + $0x48] sm:$0xff] }
  0x63   : > { %4217 = vmatpush3.bf16.msra.mxu1 %v4314_v20  ;;  %4177 = vmatpush3.bf16.msra.mxu0 %v4314_v20 }
  0x66   : > { %632 = vperm.xlu1 %4310, %v574_v7   ;;  %627 = vperm.xlu0 %4309, %v573_v8  }
  0x6a   : > { %678 = vperm.xlu1 %4310, %v580_v9   ;;  %673 = vperm.xlu0 %4309, %v579_v10  }
  0x6e   : > { %642 = vperm.xlu1 %4310, %v576_v11   ;;  %637 = vperm.xlu0 %4309, %v575_v12  }
  0x72   : > { %688 = vperm.xlu1 %4310, %v582_v13   ;;  %683 = vperm.xlu0 %4309, %v581_v14  }
  0x76   : > { %698 = vperm.xlu1 %4310, %v584_v15   ;;  %693 = vperm.xlu0 %4309, %v583_v16  }
  0x7a   : > { %1203 = vperm.xlu1 %4310, %v570_v4   ;;  %1198 = vperm.xlu0 %4309, %v569_v2  }
  0x7e   : > { %1259 = vperm.xlu1 %4310, %v578_v5   ;;  %1254 = vperm.xlu0 %4309, %v577_v6   ;;  %v603_v6 = vld [vmem:[%s4965_s15 + $0x70] sm:$0xff] }
  0x82   : > { %1213 = vperm.xlu1 %4310, %v572_v3   ;;  %1208 = vperm.xlu0 %4309, %v571_v1  }
  0x86   : > { %1269 = vperm.xlu1 %4310, %v580_v9   ;;  %1264 = vperm.xlu0 %4309, %v579_v10   ;;  %v602_v9 = vld [vmem:[%s4965_s15 + $0x68] sm:$0xff] }
  0x8a   : > { %1223 = vperm.xlu1 %4310, %v574_v7   ;;  %1218 = vperm.xlu0 %4309, %v573_v8   ;;  %v604_v7 = vld [vmem:[%s4965_s15 + $0x78] sm:$0xff]  ;;  %v601_v8 = vld [vmem:[%s4965_s15 + $0x60] sm:$0xff] }
  0x8e   : > { %1279 = vperm.xlu1 %4310, %v582_v13   ;;  %1274 = vperm.xlu0 %4309, %v581_v14  }
  0x92   : > { %1233 = vperm.xlu1 %4310, %v576_v11   ;;  %1228 = vperm.xlu0 %4309, %v575_v12  }
  0x96   : > { %1289 = vperm.xlu1 %4310, %v584_v15   ;;  %1284 = vperm.xlu0 %4309, %v583_v16  }
  0xd9   : > { %v618_v21 = vpop.permute.xlu1 %617  ;;  %v608_v22 = vpop.permute.xlu0 %607 }
  0xda   : > { %v645_v29 = vmul.f32 %v608_v22, %v589_v23  ;;  %v646_v30 = vmul.f32 %v608_v22, %v590_v24  ;;  %v649_v47 = vmul.f32 %v618_v21, %v593_v39  ;;  %v650_v48 = vmul.f32 %v618_v21, %v594_v42  ;;  %v1173_v22 = vld [vmem:[%s4985_s20 + $0x8] sm:$0xff] }
  0xdd   : > { %v623_v25 = vpop.permute.xlu1 %622  ;;  %v613_v28 = vpop.permute.xlu0 %612 }
  0xde   : > { %v647_v31 = vmul.f32 %v613_v28, %v591_v26  ;;  %v648_v32 = vmul.f32 %v613_v28, %v592_v27  ;;  %v651_v49 = vmul.f32 %v623_v25, %v595_v43  ;;  %v652_v50 = vmul.f32 %v623_v25, %v596_v44  ;;  %v1172_v25 = vld [vmem:[%s4985_s20] sm:$0xff] }
  0xe1   : > { %v669_v33 = vpop.permute.xlu1 %668  ;;  %v664_v34 = vpop.permute.xlu0 %663 }
  0xe2   : > { %v703_v35 = vadd.f32 %v669_v33, %v647_v31  ;;  %v704_v36 = vadd.f32 %v669_v33, %v648_v32  ;;  %v701_v37 = vadd.f32 %v664_v34, %v645_v29  ;;  %v702_v38 = vadd.f32 %v664_v34, %v646_v30 }
  0xe3   : > { %v1182_v30 = vunpack.c.l.bf16 %v1173_v22  ;;  %v1183_v31 = vunpack.c.h.bf16 %v1173_v22  ;;  %v1180_v34 = vunpack.c.l.bf16 %v1172_v25 }
  0xe4   : > { %v718_v40 = vpack.c.bf16 %v704_v36, %v702_v38  ;;  %v717_v41 = vpack.c.bf16 %v703_v35, %v701_v37  ;;  %v1181_v35 = vunpack.c.h.bf16 %v1172_v25  ;;  %v1177_v25 = vld [vmem:[%s4985_s20 + $0x28] sm:$0xff] }
  0xe5   : > { %v633_v45 = vpop.permute.xlu1 %632  ;;  %v628_v46 = vpop.permute.xlu0 %627 }
  0xe6   : > { %756 = vxpose.xlu0.c.b16.start [1/4] (short) %v718_v40, 128  ;;  %740 = vxpose.xlu1.c.b16.start [1/4] (short) %v717_v41, 128  ;;  %v655_v2 = vmul.f32 %v633_v45, %v599_v57  ;;  %v656_v3 = vmul.f32 %v633_v45, %v600_v60  ;;  %v653_v4 = vmul.f32 %v628_v46, %v597_v61  ;;  %v1494_v57 = vld [vmem:[%s6560_s9] sm:$0xff]  ;;  %v1495_v60 = vld [vmem:[%s6560_s9 + $0x8] sm:$0xff] }
  0xe7   : > { %v654_v5 = vmul.f32 %v628_v46, %v598_v62  ;;  %v1498_v61 = vld [vmem:[%s6560_s9 + $0x20] sm:$0xff]  ;;  %v1497_v62 = vld [vmem:[%s6560_s9 + $0x18] sm:$0xff] }
  0xe9   : > { %v679_v51 = vpop.permute.xlu1 %678  ;;  %v674_v52 = vpop.permute.xlu0 %673 }
  0xea   : > { %v707_v53 = vadd.f32 %v679_v51, %v651_v49  ;;  %v708_v54 = vadd.f32 %v679_v51, %v652_v50  ;;  %v705_v55 = vadd.f32 %v674_v52, %v649_v47  ;;  %v706_v56 = vadd.f32 %v674_v52, %v650_v48  ;;  %v1325_v50 = vld [vmem:[%s6558_s7 + $0x8] sm:$0xff]  ;;  %v1327_v51 = vld [vmem:[%s6558_s7 + $0x18] sm:$0xff]  ;;  %v1324_v52 = vld [vmem:[%s6558_s7] sm:$0xff] }
  0xec   : > { %v719_v58 = vpack.c.bf16 %v707_v53, %v705_v55  ;;  %v720_v59 = vpack.c.bf16 %v708_v54, %v706_v56  ;;  %v1329_v53 = vld [vmem:[%s6558_s7 + $0x28] sm:$0xff]  ;;  %v1326_v54 = vld [vmem:[%s6558_s7 + $0x10] sm:$0xff]  ;;  %v1331_v55 = vld [vmem:[%s6558_s7 + $0x38] sm:$0xff] }
  0xed   : > { %v643_v63 = vpop.permute.xlu1 %642  ;;  %v638_v1 = vpop.permute.xlu0 %637  ;;  %v1328_v56 = vld [vmem:[%s6558_s7 + $0x20] sm:$0xff] }
  0xee   : > { %757 = vxpose.xlu0.c.b16.cont [2/4] (short) %v720_v59, 128  ;;  %741 = vxpose.xlu1.c.b16.cont [2/4] (short) %v719_v58, 128  ;;  %v659_v16 = vmul.f32 %v643_v63, %v603_v6  ;;  %v660_v17 = vmul.f32 %v643_v63, %v604_v7  ;;  %v657_v18 = vmul.f32 %v638_v1, %v601_v8  ;;  %v1330_v58 = vld [vmem:[%s6558_s7 + $0x30] sm:$0xff] }
  0xef   : > { %v658_v19 = vmul.f32 %v638_v1, %v602_v9  ;;  %v1496_v59 = vld [vmem:[%s6560_s9 + $0x10] sm:$0xff]  ;;  %v1499_v1 = vld [vmem:[%s6560_s9 + $0x28] sm:$0xff] }
  0xf0   : > { %v1500_v63 = vld [vmem:[%s6560_s9 + $0x30] sm:$0xff] }
  0xf1   : > { %v689_v10 = vpop.permute.xlu1 %688  ;;  %v684_v11 = vpop.permute.xlu0 %683 }
  0xf2   : > { %v711_v12 = vadd.f32 %v689_v10, %v655_v2  ;;  %v712_v13 = vadd.f32 %v689_v10, %v656_v3  ;;  %v709_v14 = vadd.f32 %v684_v11, %v653_v4  ;;  %v710_v15 = vadd.f32 %v684_v11, %v654_v5  ;;  %v1501_v2 = vld [vmem:[%s6560_s9 + $0x38] sm:$0xff] }
  0xf4   : > { %v721_v20 = vpack.c.bf16 %v711_v12, %v709_v14  ;;  %v722_v21 = vpack.c.bf16 %v712_v13, %v710_v15 }
  0xf5   : > { %v699_v23 = vpop.permute.xlu1 %698  ;;  %v694_v24 = vpop.permute.xlu0 %693 }
  0xf6   : > { %v715_v26 = vadd.f32 %v699_v23, %v659_v16  ;;  %v716_v27 = vadd.f32 %v699_v23, %v660_v17  ;;  %v713_v28 = vadd.f32 %v694_v24, %v657_v18  ;;  %v714_v29 = vadd.f32 %v694_v24, %v658_v19  ;;  %758 = vxpose.xlu0.c.b16.cont [3/4] (short) %v722_v21, 128  ;;  %v1175_v19 = vld [vmem:[%s4985_s20 + $0x18] sm:$0xff] }
  0xf7   : > { %742 = vxpose.xlu1.c.b16.cont [3/4] (short) %v721_v20, 128  ;;  %v1174_v20 = vld [vmem:[%s4985_s20 + $0x10] sm:$0xff]  ;;  %v1187_v23 = vunpack.c.h.bf16 %v1175_v19 }
  0xf8   : > { %v723_v32 = vpack.c.bf16 %v715_v26, %v713_v28  ;;  %v724_v33 = vpack.c.bf16 %v716_v27, %v714_v29  ;;  %v1185_v24 = vunpack.c.h.bf16 %v1174_v20  ;;  %v1176_v26 = vld [vmem:[%s4985_s20 + $0x20] sm:$0xff]  ;;  %v1186_v29 = vunpack.c.l.bf16 %v1175_v19 }
  0xf9   : > { %v1204_v36 = vpop.permute.xlu1 %1203  ;;  %v1199_v37 = vpop.permute.xlu0 %1198 }
  0xfa   : > { %759 = vxpose.xlu0.c.b16.end [4/4] (short) %v724_v33, 128  ;;  %v1238_v38 = vmul.f32 %v1204_v36, %v1182_v30  ;;  %v1239_v39 = vmul.f32 %v1204_v36, %v1183_v31  ;;  %v1236_v40 = vmul.f32 %v1199_v37, %v1180_v34  ;;  %v1237_v41 = vmul.f32 %v1199_v37, %v1181_v35  ;;  %v1179_v35 = vld [vmem:[%s4985_s20 + $0x38] sm:$0xff]  ;;  %v1178_v36 = vld [vmem:[%s4985_s20 + $0x30] sm:$0xff]  ;;  %s6496_s20 = scalar_lea.hbm %s6563_s12, %s4125_s25 }
  0xfb   : > { %743 = vxpose.xlu1.c.b16.end [4/4] (short) %v723_v32, 128  ;;  %v1184_v30 = vunpack.c.l.bf16 %v1174_v20  ;;  %v1191_v33 = vunpack.c.h.bf16 %v1177_v25  ;;  %v1189_v34 = vunpack.c.h.bf16 %v1176_v26 }
  0xfd   : > { %v1260_v42 = vpop.permute.xlu1 %1259  ;;  %v1255_v43 = vpop.permute.xlu0 %1254 }
  0xfe   : > { %v1294_v44 = vadd.f32 %v1260_v42, %v1238_v38  ;;  %v1295_v45 = vadd.f32 %v1260_v42, %v1239_v39  ;;  %v1292_v46 = vadd.f32 %v1255_v43, %v1236_v40  ;;  %v1293_v47 = vadd.f32 %v1255_v43, %v1237_v41 }
  0xff   : > { %v1190_v43 = vunpack.c.l.bf16 %v1177_v25  ;;  %v5146_v25 = vld [vmem:[#allocation8] ss:$0 sm:$0xff] }
 0x100   : > { %v4991_v48 = vpack.c.bf16 %v1294_v44, %v1292_v46  ;;  %v4993_v49 = vpack.c.bf16 %v1295_v45, %v1293_v47  ;;  %v1188_v44 = vunpack.c.l.bf16 %v1176_v26  ;;  %v1195_v47 = vunpack.c.h.bf16 %v1179_v35 }
 0x101   : > { %v1209_v3 = vpop.permute.xlu0 %1208  ;;  %v1214_v4 = vpop.permute.xlu1 %1213 }
 0x102   : > { %1405 = vmatprep.subr.bf16.mxu1 %v4993_v49  ;;  %v1243_v31 = vmul.f32 %v1214_v4, %v1187_v23  ;;  %v1241_v32 = vmul.f32 %v1209_v3, %v1185_v24  ;;  %v1242_v41 = vmul.f32 %v1214_v4, %v1186_v29  ;;  %v1240_v42 = vmul.f32 %v1209_v3, %v1184_v30 }
 0x105   : > { %v1265_v5 = vpop.permute.xlu0 %1264  ;;  %v1270_v6 = vpop.permute.xlu1 %1269 }
 0x106   : > { %v1299_v38 = vadd.f32 %v1270_v6, %v1243_v31  ;;  %v1297_v39 = vadd.f32 %v1265_v5, %v1241_v32 }
 0x109   : > { %v1219_v7 = vpop.permute.xlu0 %1218  ;;  %v1224_v8 = vpop.permute.xlu1 %1223 }
 0x10a   : > { %v1247_v45 = vmul.f32 %v1224_v8, %v1191_v33  ;;  %v1245_v46 = vmul.f32 %v1219_v7, %v1189_v34 }
 0x10d   : > { %v5044_v9 = vpop.permute.xlu0 %1274  ;;  %v5046_v10 = vpop.permute.xlu1 %1279 }
 0x10f   : > { %1339 = vperm.xlu1 %4310, %v1325_v50   ;;  %v1193_v50 = vunpack.c.h.bf16 %v1178_v36 }
 0x111   : > { %v5048_v11 = vpop.permute.xlu0 %1228  ;;  %v5050_v12 = vpop.permute.xlu1 %1233 }
 0x113   : > { %1349 = vperm.xlu1 %4310, %v1327_v51   ;;  %1334 = vperm.xlu0 %4309, %v1324_v52   ;;  %v1298_v51 = vadd.f32 %v1270_v6, %v1242_v41  ;;  %v1296_v52 = vadd.f32 %v1265_v5, %v1240_v42 }
 0x115   : > { %v5052_v13 = vpop.permute.xlu0 %1284  ;;  %v5054_v14 = vpop.permute.xlu1 %1289 }
 0x117   : > { %1359 = vperm.xlu1 %4310, %v1329_v53   ;;  %1344 = vperm.xlu0 %4309, %v1326_v54   ;;  %v1303_v54 = vadd.f32 %v5046_v10, %v1247_v45 }
 0x11b   : > { %1369 = vperm.xlu1 %4310, %v1331_v55   ;;  %1354 = vperm.xlu0 %4309, %v1328_v56   ;;  %v1301_v55 = vadd.f32 %v5044_v9, %v1245_v46 }
 0x11f   : > { %1504 = vperm.xlu1 %4310, %v1494_v57   ;;  %1364 = vperm.xlu0 %4309, %v1330_v58   ;;  %v1311_v57 = vpack.c.bf16 %v1299_v38, %v1297_v39  ;;  %v1246_v58 = vmul.f32 %v1224_v8, %v1190_v43  ;;  %v1313_v8 = vpack.c.bf16 %v1303_v54, %v1301_v55 }
 0x123   : > { %1514 = vperm.xlu1 %4310, %v1496_v59   ;;  %1509 = vperm.xlu0 %4309, %v1495_v60   ;;  %v1244_v59 = vmul.f32 %v1219_v7, %v1188_v44  ;;  %v1194_v60 = vunpack.c.l.bf16 %v1179_v35 }
 0x125   : > { %v1300_v3 = vadd.f32 %v5044_v9, %v1244_v59 }
 0x127   : > { %1524 = vperm.xlu1 %4310, %v1498_v61   ;;  %1519 = vperm.xlu0 %4309, %v1497_v62   ;;  %v1192_v61 = vunpack.c.l.bf16 %v1178_v36  ;;  %v1251_v62 = vmul.f32 %v5050_v12, %v1195_v47 }
 0x129   : > { %v1307_v5 = vadd.f32 %v5054_v14, %v1251_v62 }
 0x12b   : > { %1534 = vperm.xlu1 %4310, %v1500_v63   ;;  %1529 = vperm.xlu0 %4309, %v1499_v1   ;;  %v1249_v63 = vmul.f32 %v5048_v11, %v1193_v50  ;;  %v1310_v1 = vpack.c.bf16 %v1298_v51, %v1296_v52 }
 0x12d   : > { %v1305_v6 = vadd.f32 %v5052_v13, %v1249_v63 }
 0x12f   : > { %1539 = vperm.xlu1 %4310, %v1501_v2   ;;  %v1302_v2 = vadd.f32 %v5046_v10, %v1246_v58  ;;  %v1315_v23 = vpack.c.bf16 %v1307_v5, %v1305_v6 }
 0x131   : > { %v1312_v10 = vpack.c.bf16 %v1302_v2, %v1300_v3 }
 0x154   : > { %v5056_v15 = vpop.trf.xlu0 }
 0x155   : > { %v748_v16 = vpop.trf.xlu1 }
 0x156   : > { %4178 = vmatprep.mubr.msk.bf16.mxu0 %vm796_vm0, %v748_v16  ;;  %v1250_v16 = vmul.f32 %v5050_v12, %v1194_v60  ;;  %v4315_v12 = vld [vmem:[%s6557_s6] sm:$0xff]  }
 0x158   : > { %v5059_v17 = vpop.trf.xlu0  ;;  %v1306_v9 = vadd.f32 %v5054_v14, %v1250_v16  ;;  %v4319_v14 = vld [vmem:[%s6559_s8] sm:$0xff]  }
 0x159   : > { %v749_v18 = vpop.trf.xlu1 }
 0x15a   : > { %4179 = vmatmul.mubr.msk.bf16.vlgmr.msra.gmra.mrb[0].mxu0 %vm796_vm0, %v749_v18  ;;  %v1248_v18 = vmul.f32 %v5048_v11, %v1192_v61 }
 0x15c   : > { %v5064_v21 = vpop.trf.xlu0  ;;  %v1304_v19 = vadd.f32 %v5052_v13, %v1248_v18  ;;  %v4316_v13 = vld [vmem:[%s6557_s6 + $0x8] sm:$0xff]  }
 0x15d   : > { %v750_v22 = vpop.trf.xlu1 }
 0x15e   : > { %4182 = vmatprep.mubr.msk.bf16.mxu0 %vm796_vm0, %v750_v22  ;;  %v1314_v11 = vpack.c.bf16 %v1306_v9, %v1304_v19 }
 0x160   : > { %v5069_v27 = vpop.trf.xlu0 }
 0x161   : > { %v751_v28 = vpop.trf.xlu1 }
 0x162   : > { %4183 = vmatmul.mubr.msk.bf16.gmra.mrb[4].mxu0 %vm796_vm0, %v751_v28 }
 0x164   : > { %v768_v37 = vpop.trf.xlu0 }
 0x165   : > { %v752_v40 = vpop.trf.xlu1  ;;  %4202 = vmatprep.mubr.msk.bf16.mxu1 %vm796_vm0, %v768_v37 }
 0x166   : > { %4186 = vmatprep.mubr.msk.bf16.mxu0 %vm796_vm0, %v752_v40 }
 0x168   : > { %v769_v53 = vpop.trf.xlu0 }
 0x169   : > { %v753_v56 = vpop.trf.xlu1  ;;  %4203 = vmatmul.mubr.msk.bf16.vlgmr.msra.gmra.mrb[0].mxu1 %vm796_vm0, %v769_v53 }
 0x16a   : > { %4187 = vmatmul.mubr.msk.bf16.gmra.mrb[8].mxu0 %vm796_vm0, %v753_v56  ;;  %1406 = vmatpush1.bf16.msra.mxu1 %v4991_v48 }
 0x16b   : > { %1407 = vmatprep.subr.bf16.mxu1 %v1311_v57 }
 0x16c   : > { %v770_v4 = vpop.trf.xlu0 }
 0x16d   : > { %v754_v7 = vpop.trf.xlu1  ;;  %4206 = vmatprep.mubr.msk.bf16.mxu1 %vm796_vm0, %v770_v4 }
 0x16e   : > { %1408 = vmatpush1.bf16.msra.mxu1 %v1310_v1  ;;  %4190 = vmatprep.mubr.msk.bf16.mxu0 %vm796_vm0, %v754_v7 }
 0x16f   : > { %1409 = vmatprep.subr.bf16.mxu1 %v1313_v8 }
 0x170   : > { %v771_v20 = vpop.trf.xlu0 }
 0x171   : > { %v755_v22 = vpop.trf.xlu1  ;;  %4207 = vmatmul.mubr.msk.bf16.gmra.mrb[4].mxu1 %vm796_vm0, %v771_v20 }
 0x172   : > { %4191 = vmatmul.mubr.msk.bf16.gmra.mrb[12].mxu0 %vm796_vm0, %v755_v22  ;;  %1410 = vmatpush1.bf16.msra.mxu1 %v1312_v10 }
 0x173   : > { %4194 = vmatprep.mubr.msk.bf16.mxu0 %vm796_vm0, %v5056_v15  ;;  %1411 = vmatprep.subr.bf16.mxu1 %v1315_v23  ;;  %v4320_v15 = vld [vmem:[%s6559_s8 + $0x8] sm:$0xff]  }
 0x174   : > { %1437 = vmatprep.mubr.bf16.mxu1 %v4731_v0 }
 0x176   : > { %1412 = vmatpush1.bf16.msra.mxu1 %v1314_v11 }
 0x177   : > { %1574 = vmatprep.subr.bf16.mxu1 %v4993_v49  ;;  %v4318_v49 = vld [vmem:[%s6557_s6 + $0x18] sm:$0xff]  }
 0x179   : > { %4080 = vmatmul.mubr.msk.bf16.vlgmr.msra.gmra.mrb[8].mxu1 %vm796_vm0, %v4315_v12 }
 0x17a   : > { %4195 = vmatmul.mubr.msk.bf16.gmra.mrb[16].mxu0 %vm796_vm0, %v5059_v17  ;;  %1575 = vmatpush1.bf16.msra.mxu1 %v4991_v48  ;;  %v4317_v48 = vld [vmem:[%s6557_s6 + $0x10] sm:$0xff]  }
 0x17b   : > { %4198 = vmatprep.mubr.msk.bf16.mxu0 %vm796_vm0, %v5064_v21  ;;  %1576 = vmatprep.subr.bf16.mxu1 %v1311_v57  ;;  %v4321_v17 = vld [vmem:[%s6559_s8 + $0x10] sm:$0xff]   ;;  %v4322_v21 = vld [vmem:[%s6559_s8 + $0x18] sm:$0xff]  }
 0x17c   : > { %1447 = vmatprep.mubr.bf16.mxu1 %v4731_v0 }
 0x17e   : > { %1577 = vmatpush1.bf16.msra.mxu1 %v1310_v1 }
 0x17f   : > { %1578 = vmatprep.subr.bf16.mxu1 %v1313_v8 }
 0x181   : > { %4081 = vmatmul.mubr.msk.bf16.gmra.mrb[12].mxu1 %vm796_vm0, %v4316_v13 }
 0x182   : > { %4199 = vmatmul.mubr.msk.bf16.gmra.mrb[20].mxu0 %vm796_vm0, %v5069_v27  ;;  %1579 = vmatpush1.bf16.msra.mxu1 %v1312_v10 }
 0x183   : > { %1580 = vmatprep.subr.bf16.mxu1 %v1315_v23  ;;  %1457 = vmatprep.mubr.bf16.mxu1 %v4731_v0 }
 0x184   : > { %1796 = vmatprep.mubr.bf16.mxu0 %v4731_v0 }
 0x186   : > { %1581 = vmatpush1.bf16.msra.mxu1 %v1314_v11 }
 0x189   : > { %4082 = vmatmul.mubr.msk.bf16.gmra.mrb[16].mxu1 %vm796_vm0, %v4317_v48 }
 0x18a   : > { %1467 = vmatprep.mubr.bf16.mxu1 %v4731_v0 }
 0x191   : > { %4083 = vmatmul.mubr.msk.bf16.gmra.mrb[20].mxu1 %vm796_vm0, %v4318_v49 }
 0x192   : > { %1606 = vmatprep.mubr.bf16.mxu1 %v4731_v0 }
 0x199   : > { %4088 = vmatmul.mubr.msk.bf16.vlgmr.msra.gmra.mrb[24].mxu1 %vm796_vm0, %v4319_v14 }
 0x19a   : > { %1616 = vmatprep.mubr.bf16.mxu1 %v4731_v0 }
 0x1a1   : > { %4089 = vmatmul.mubr.msk.bf16.gmra.mrb[28].mxu1 %vm796_vm0, %v4320_v15 }
 0x1a2   : > { %1626 = vmatprep.mubr.bf16.mxu1 %v4731_v0 }
 0x1a9   : > { %4090 = vmatmul.mubr.msk.bf16.gmra.mrb[32].mxu1 %vm796_vm0, %v4321_v17 }
 0x1aa   : > { %1636 = vmatprep.mubr.bf16.mxu1 %v4731_v0 }
 0x1b1   : > { %4091 = vmatmul.mubr.msk.bf16.gmra.mrb[36].mxu1 %vm796_vm0, %v4322_v21 }
 0x22d   : > { %v4180_v24 = vpop.f32.mrb[0].mxu0 }
 0x22e   : > { %v888_v26 = vadd.f32 %v4180_v24, %v5146_v25  ;;  %v879_v27 = vpop.f32.mrb[1].mxu0 }
 0x22f   : > { %v880_v28 = vadd.f32 %v5146_v25, %v879_v27  ;;  %v4181_v29 = vpop.f32.mrb[2].mxu0 }
 0x230   : > { %v1008_v30 = vmul.f32 0.125, %v888_v26  ;;  %v891_v31 = vadd.f32 %v4181_v29, %v5146_v25  ;;  %v882_v32 = vpop.f32.mrb[3].mxu0 }
 0x231   : > { %v1006_v33 = vmul.f32 0.125, %v880_v28  ;;  %v883_v34 = vadd.f32 %v5146_v25, %v882_v32 }
 0x232   : > { %v1009_v35 = vmul.f32 0.125, %v891_v31 }
 0x233   : > { %v1007_v36 = vmul.f32 0.125, %v883_v34 }
 0x234   : > { %v1039_v37 = vpack.c.bf16 %v1009_v35, %v1008_v30 }
 0x235   : > { %v1038_v38 = vpack.c.bf16 %v1007_v36, %v1006_v33  ;;  %v4184_v39 = vpop.f32.mrb[4].mxu0 }
 0x236   : > { %1055 = vst.msk [vmem:[#allocation2 + $0x8] sm:$0xff] %vm796_vm0, %v1039_v37  ;;  %v904_v40 = vadd.f32 %v4184_v39, %v5146_v25  ;;  %v895_v41 = vpop.f32.mrb[5].mxu0 }
 0x237   : > { %1054 = vst.msk [vmem:[#allocation2] sm:$0xff] %vm796_vm0, %v1038_v38  ;;  %v896_v42 = vadd.f32 %v5146_v25, %v895_v41  ;;  %v4185_v43 = vpop.f32.mrb[6].mxu0 }
 0x238   : > { %v1012_v44 = vmul.f32 0.125, %v904_v40  ;;  %v907_v45 = vadd.f32 %v4185_v43, %v5146_v25  ;;  %v898_v46 = vpop.f32.mrb[7].mxu0 }
 0x239   : > { %v1010_v47 = vmul.f32 0.125, %v896_v42  ;;  %v899_v50 = vadd.f32 %v5146_v25, %v898_v46  ;;  %v1340_v42 = vpop.permute.xlu1 %1339 }
 0x23a   : > { %v1013_v51 = vmul.f32 0.125, %v907_v45  ;;  %v1335_v45 = vpop.permute.xlu0 %1334 }
 0x23b   : > { %v1011_v52 = vmul.f32 0.125, %v899_v50 }
 0x23c   : > { %v4204_v53 = vpop.f32.mrb[0].mxu1  ;;  %v1041_v54 = vpack.c.bf16 %v1013_v51, %v1012_v44 }
 0x23d   : > { %v984_v55 = vadd.f32 %v4204_v53, %v5146_v25  ;;  %v975_v56 = vpop.f32.mrb[1].mxu1  ;;  %v1040_v57 = vpack.c.bf16 %v1011_v52, %v1010_v47  ;;  %v4188_v58 = vpop.f32.mrb[8].mxu0 }
 0x23e   : > { %v976_v59 = vadd.f32 %v5146_v25, %v975_v56  ;;  %v4205_v60 = vpop.f32.mrb[2].mxu1  ;;  %1057 = vst.msk [vmem:[#allocation2 + $0x18] sm:$0xff] %vm796_vm0, %v1041_v54  ;;  %v920_v61 = vadd.f32 %v4188_v58, %v5146_v25  ;;  %v911_v62 = vpop.f32.mrb[9].mxu0 }
 0x23f   : > { %v987_v63 = vadd.f32 %v4205_v60, %v5146_v25  ;;  %v978_v1 = vpop.f32.mrb[3].mxu1  ;;  %1056 = vst.msk [vmem:[#allocation2 + $0x10] sm:$0xff] %vm796_vm0, %v1040_v57  ;;  %v912_v2 = vadd.f32 %v5146_v25, %v911_v62  ;;  %v4189_v3 = vpop.f32.mrb[10].mxu0  ;;  %v1032_v8 = vmul.f32 0.125, %v984_v55 }
 0x240   : > { %v979_v4 = vadd.f32 %v5146_v25, %v978_v1  ;;  %v1016_v5 = vmul.f32 0.125, %v920_v61  ;;  %v923_v6 = vadd.f32 %v4189_v3, %v5146_v25  ;;  %v914_v7 = vpop.f32.mrb[11].mxu0  ;;  %v1030_v9 = vmul.f32 0.125, %v976_v59 }
 0x241   : > { %v1033_v16 = vmul.f32 0.125, %v987_v63  ;;  %v1014_v18 = vmul.f32 0.125, %v912_v2  ;;  %v915_v10 = vadd.f32 %v5146_v25, %v914_v7 }
 0x242   : > { %v1031_v19 = vmul.f32 0.125, %v979_v4  ;;  %v1017_v20 = vmul.f32 0.125, %v923_v6 }
 0x243   : > { %v1051_v22 = vpack.c.bf16 %v1033_v16, %v1032_v8  ;;  %v1015_v23 = vmul.f32 0.125, %v915_v10  ;;  %v1350_v8 = vpop.permute.xlu1 %1349  ;;  %v1345_v10 = vpop.permute.xlu0 %1344 }
 0x244   : > { %v1050_v11 = vpack.c.bf16 %v1031_v19, %v1030_v9  ;;  %v4208_v12 = vpop.f32.mrb[4].mxu1  ;;  %v1043_v13 = vpack.c.bf16 %v1017_v20, %v1016_v5 }
 0x245   : > { %1067 = vst.msk [vmem:[#allocation2 + $0x68] sm:$0xff] %vm796_vm0, %v1051_v22  ;;  %v1000_v48 = vadd.f32 %v4208_v12, %v5146_v25  ;;  %v991_v49 = vpop.f32.mrb[5].mxu1  ;;  %v1042_v14 = vpack.c.bf16 %v1015_v23, %v1014_v18  ;;  %v4192_v15 = vpop.f32.mrb[12].mxu0 }
 0x246   : > { %1066 = vst.msk [vmem:[#allocation2 + $0x60] sm:$0xff] %vm796_vm0, %v1050_v11  ;;  %v992_v17 = vadd.f32 %v5146_v25, %v991_v49  ;;  %1059 = vst.msk [vmem:[#allocation2 + $0x28] sm:$0xff] %vm796_vm0, %v1043_v13  ;;  %v4209_v21 = vpop.f32.mrb[6].mxu1  ;;  %v936_v24 = vadd.f32 %v4192_v15, %v5146_v25  ;;  %v927_v26 = vpop.f32.mrb[13].mxu0 }
 0x247   : > { %v1003_v27 = vadd.f32 %v4209_v21, %v5146_v25  ;;  %1058 = vst.msk [vmem:[#allocation2 + $0x20] sm:$0xff] %vm796_vm0, %v1042_v14  ;;  %v994_v28 = vpop.f32.mrb[7].mxu1  ;;  %v928_v29 = vadd.f32 %v5146_v25, %v927_v26  ;;  %v4193_v30 = vpop.f32.mrb[14].mxu0  ;;  %v1036_v35 = vmul.f32 0.125, %v1000_v48 }
 0x248   : > { %v995_v31 = vadd.f32 %v5146_v25, %v994_v28  ;;  %v1020_v32 = vmul.f32 0.125, %v936_v24  ;;  %v939_v33 = vadd.f32 %v4193_v30, %v5146_v25  ;;  %v930_v34 = vpop.f32.mrb[15].mxu0  ;;  %v1034_v39 = vmul.f32 0.125, %v992_v17 }
 0x249   : > { %v1037_v36 = vmul.f32 0.125, %v1003_v27  ;;  %v1018_v37 = vmul.f32 0.125, %v928_v29  ;;  %v931_v38 = vadd.f32 %v5146_v25, %v930_v34 }
 0x24a   : > { %v1035_v40 = vmul.f32 0.125, %v995_v31  ;;  %v1021_v41 = vmul.f32 0.125, %v939_v33 }
 0x24b   : > { %v1053_v43 = vpack.c.bf16 %v1037_v36, %v1036_v35  ;;  %v1019_v44 = vmul.f32 0.125, %v931_v38 }
 0x24c   : > { %v1052_v46 = vpack.c.bf16 %v1035_v40, %v1034_v39  ;;  %v1045_v47 = vpack.c.bf16 %v1021_v41, %v1020_v32  ;;  %v1439_v50 = vpop.f32.mrb[8].mxu1  ;;  %v1355_v40 = vpop.permute.xlu0 %1354 }
 0x24d   : > { %1069 = vst.msk [vmem:[#allocation2 + $0x78] sm:$0xff] %vm796_vm0, %v1053_v43  ;;  %v1044_v51 = vpack.c.bf16 %v1019_v44, %v1018_v37  ;;  %v4196_v52 = vpop.f32.mrb[16].mxu0  ;;  %v1441_v53 = vpop.f32.mrb[9].mxu1  ;;  %v1440_v57 = vadd.f32 %v1439_v50, %v1335_v45 }
 0x24e   : > { %1068 = vst.msk [vmem:[#allocation2 + $0x70] sm:$0xff] %vm796_vm0, %v1052_v46  ;;  %1061 = vst.msk [vmem:[#allocation2 + $0x38] sm:$0xff] %vm796_vm0, %v1045_v47  ;;  %v952_v54 = vadd.f32 %v4196_v52, %v5146_v25  ;;  %v943_v55 = vpop.f32.mrb[17].mxu0  ;;  %v1443_v56 = vpop.f32.mrb[10].mxu1  ;;  %v1442_v62 = vadd.f32 %v1441_v53, %v1335_v45 }
 0x24f   : > { %1060 = vst.msk [vmem:[#allocation2 + $0x30] sm:$0xff] %vm796_vm0, %v1044_v51  ;;  %v944_v58 = vadd.f32 %v5146_v25, %v943_v55  ;;  %v4197_v59 = vpop.f32.mrb[18].mxu0  ;;  %v1444_v60 = vadd.f32 %v1443_v56, %v1340_v42  ;;  %v1445_v61 = vpop.f32.mrb[11].mxu1 }
 0x250   : > { %v955_v63 = vadd.f32 %v4197_v59, %v5146_v25  ;;  %v946_v1 = vpop.f32.mrb[19].mxu0  ;;  %v1446_v2 = vadd.f32 %v1445_v61, %v1340_v42  ;;  %v1024_v5 = vmul.f32 0.125, %v952_v54  ;;  %v1360_v37 = vpop.permute.xlu1 %1359 }
 0x251   : > { %v1478_v3 = vpack.c.bf16 %v1444_v60, %v1440_v57  ;;  %v947_v4 = vadd.f32 %v5146_v25, %v946_v1  ;;  %v1022_v16 = vmul.f32 0.125, %v944_v58  ;;  %v1365_v53 = vpop.permute.xlu0 %1364 }
 0x252   : > { %v1025_v6 = vmul.f32 0.125, %v955_v63  ;;  %v1479_v7 = vpack.c.bf16 %v1446_v2, %v1442_v62 }
 0x253   : > { %v1023_v18 = vmul.f32 0.125, %v947_v4 }
 0x254   : > { %v1047_v9 = vpack.c.bf16 %v1025_v6, %v1024_v5  ;;  %v1449_v19 = vpop.f32.mrb[12].mxu1  ;;  %1764 = vmatprep.subr.bf16.mxu0 %v1479_v7  ;;  %v1370_v51 = vpop.permute.xlu1 %1369  ;;  %v1699_v7 = vld [vmem:[#allocation2] sm:$0xff] }
 0x255   : > { %v1046_v20 = vpack.c.bf16 %v1023_v18, %v1022_v16  ;;  %v4200_v22 = vpop.f32.mrb[20].mxu0  ;;  %v1451_v23 = vpop.f32.mrb[13].mxu1  ;;  %1765 = vmatpush1.bf16.msra.mxu0 %v1478_v3  ;;  %v1450_v48 = vadd.f32 %v1449_v19, %v1345_v10 }
 0x256   : > { %1063 = vst.msk [vmem:[#allocation2 + $0x48] sm:$0xff] %vm796_vm0, %v1047_v9  ;;  %v968_v11 = vadd.f32 %v4200_v22, %v5146_v25  ;;  %v959_v12 = vpop.f32.mrb[21].mxu0  ;;  %v1453_v13 = vpop.f32.mrb[14].mxu1  ;;  %v1452_v21 = vadd.f32 %v1451_v23, %v1345_v10 }
 0x257   : > { %1062 = vst.msk [vmem:[#allocation2 + $0x40] sm:$0xff] %vm796_vm0, %v1046_v20  ;;  %v960_v49 = vadd.f32 %v5146_v25, %v959_v12  ;;  %v4201_v14 = vpop.f32.mrb[22].mxu0  ;;  %v1454_v15 = vadd.f32 %v1453_v13, %v1350_v8  ;;  %v1455_v17 = vpop.f32.mrb[15].mxu1 }
 0x258   : > { %v971_v24 = vadd.f32 %v4201_v14, %v5146_v25  ;;  %v962_v26 = vpop.f32.mrb[23].mxu0  ;;  %v1456_v27 = vadd.f32 %v1455_v17, %v1350_v8  ;;  %v1028_v30 = vmul.f32 0.125, %v968_v11  ;;  %v1505_v63 = vpop.permute.xlu1 %1504 }
 0x259   : > { %v1480_v28 = vpack.c.bf16 %v1454_v15, %v1450_v48  ;;  %v963_v29 = vadd.f32 %v5146_v25, %v962_v26  ;;  %v1026_v33 = vmul.f32 0.125, %v960_v49  ;;  %v1510_v2 = vpop.permute.xlu0 %1509  ;;  %v1700_v48 = vld [vmem:[#allocation2 + $0x8] sm:$0xff] }
 0x25a   : > { %v1029_v31 = vmul.f32 0.125, %v971_v24  ;;  %v1481_v32 = vpack.c.bf16 %v1456_v27, %v1452_v21 }
 0x25b   : > { %v1027_v34 = vmul.f32 0.125, %v963_v29 }
 0x25c   : > { %v1049_v35 = vpack.c.bf16 %v1029_v31, %v1028_v30  ;;  %v1459_v36 = vpop.f32.mrb[16].mxu1  ;;  %1766 = vmatprep.subr.bf16.mxu0 %v1481_v32  ;;  %v1515_v9 = vpop.permute.xlu1 %1514  ;;  %v1701_v32 = vld [vmem:[#allocation2 + $0x10] sm:$0xff] }
 0x25d   : > { %v1048_v38 = vpack.c.bf16 %v1027_v34, %v1026_v33  ;;  %v1461_v39 = vpop.f32.mrb[17].mxu1  ;;  %1767 = vmatpush1.bf16.msra.mxu0 %v1480_v28  ;;  %v1460_v42 = vadd.f32 %v1459_v36, %v1355_v40  ;;  %v1520_v22 = vpop.permute.xlu0 %1519 }
 0x25e   : > { %1065 = vst.msk [vmem:[#allocation2 + $0x58] sm:$0xff] %vm796_vm0, %v1049_v35  ;;  %v1463_v41 = vpop.f32.mrb[18].mxu1  ;;  %v1462_v44 = vadd.f32 %v1461_v39, %v1355_v40 }
 0x25f   : > { %1064 = vst.msk [vmem:[#allocation2 + $0x50] sm:$0xff] %vm796_vm0, %v1048_v38  ;;  %v1464_v25 = vadd.f32 %v1463_v41, %v1360_v37  ;;  %v1465_v43 = vpop.f32.mrb[19].mxu1 }
 0x260   : > { %v1466_v45 = vadd.f32 %v1465_v43, %v1360_v37  ;;  %v1525_v17 = vpop.permute.xlu1 %1524 }
 0x261   : > { %v1482_v46 = vpack.c.bf16 %v1464_v25, %v1460_v42  ;;  %v1530_v27 = vpop.permute.xlu0 %1529 }
 0x262   : > { %v1483_v47 = vpack.c.bf16 %v1466_v45, %v1462_v44  ;;  %v1702_v44 = vld [vmem:[#allocation2 + $0x18] sm:$0xff] }
 0x264   : > { %v1469_v50 = vpop.f32.mrb[20].mxu1  ;;  %1768 = vmatprep.subr.bf16.mxu0 %v1483_v47  ;;  %v1535_v33 = vpop.permute.xlu1 %1534 }
 0x265   : > { %v1471_v52 = vpop.f32.mrb[21].mxu1  ;;  %1769 = vmatpush1.bf16.msra.mxu0 %v1482_v46  ;;  %v1470_v55 = vadd.f32 %v1469_v50, %v1365_v53 }
 0x266   : > { %v1473_v54 = vpop.f32.mrb[22].mxu1  ;;  %v1472_v58 = vadd.f32 %v1471_v52, %v1365_v53  ;;  %v1704_v52 = vld [vmem:[#allocation2 + $0x28] sm:$0xff]  ;;  %v1705_v53 = vld [vmem:[#allocation2 + $0x30] sm:$0xff] }
 0x267   : > { %v1474_v56 = vadd.f32 %v1473_v54, %v1370_v51  ;;  %v1475_v57 = vpop.f32.mrb[23].mxu1  ;;  %v1706_v54 = vld [vmem:[#allocation2 + $0x38] sm:$0xff] }
 0x268   : > { %v1476_v59 = vadd.f32 %v1475_v57, %v1370_v51  ;;  %v1540_v40 = vpop.permute.xlu1 %1539  ;;  %v1703_v51 = vld [vmem:[#allocation2 + $0x20] sm:$0xff]  ;;  %v1709_v57 = vld [vmem:[#allocation2 + $0x50] sm:$0xff] }
 0x269   : > { %v1484_v60 = vpack.c.bf16 %v1474_v56, %v1470_v55  ;;  %v1707_v55 = vld [vmem:[#allocation2 + $0x40] sm:$0xff]  ;;  %v1708_v56 = vld [vmem:[#allocation2 + $0x48] sm:$0xff] }
 0x26a   : > { %v1485_v61 = vpack.c.bf16 %v1476_v59, %v1472_v58  ;;  %v1710_v58 = vld [vmem:[#allocation2 + $0x58] sm:$0xff]  ;;  %v1711_v59 = vld [vmem:[#allocation2 + $0x60] sm:$0xff] }
 0x26c   : > { %v1608_v62 = vpop.f32.mrb[24].mxu1  ;;  %1770 = vmatprep.subr.bf16.mxu0 %v1485_v61  ;;  %v1713_v61 = vld [vmem:[#allocation2 + $0x70] sm:$0xff] }
 0x26d   : > { %v1610_v1 = vpop.f32.mrb[25].mxu1  ;;  %1771 = vmatpush1.bf16.msra.mxu0 %v1484_v60  ;;  %v1609_v4 = vadd.f32 %v1608_v62, %v1505_v63  ;;  %v1712_v60 = vld [vmem:[#allocation2 + $0x68] sm:$0xff]  ;;  %v1714_v62 = vld [vmem:[#allocation2 + $0x78] sm:$0xff] }
 0x26e   : > { %v1612_v3 = vpop.f32.mrb[26].mxu1  ;;  %v1611_v8 = vadd.f32 %v1610_v1, %v1505_v63  ;;  %v4732_v63 = vmov -inf  }
 0x26f   : > { %v1613_v5 = vadd.f32 %v1612_v3, %v1510_v2  ;;  %v1614_v6 = vpop.f32.mrb[27].mxu1  ;;  %1071 = vst.msk [vmem:[#allocation6] sm:$0xff] %vm1070_vm1, %v4732_v63  ;;  %1072 = vst.msk [vmem:[#allocation6 + $0x8] sm:$0xff] %vm1070_vm1, %v4732_v63 }
 0x270   : > { %v1615_v16 = vadd.f32 %v1614_v6, %v1510_v2  ;;  %4092 = vmatmul.mubr.msk.bf16.vlgmr.msra.gmra.mrb[24].mxu0 %vm796_vm0, %v1699_v7  ;;  %1073 = vst.msk [vmem:[#allocation6 + $0x10] sm:$0xff] %vm1070_vm1, %v4732_v63  ;;  %1074 = vst.msk [vmem:[#allocation6 + $0x18] sm:$0xff] %vm1070_vm1, %v4732_v63 }
 0x271   : > { %v1647_v18 = vpack.c.bf16 %v1613_v5, %v1609_v4  ;;  %1806 = vmatprep.mubr.bf16.mxu0 %v4731_v0  ;;  %1075 = vst.msk [vmem:[#allocation6 + $0x20] sm:$0xff] %vm1070_vm1, %v4732_v63  ;;  %1076 = vst.msk [vmem:[#allocation6 + $0x28] sm:$0xff] %vm1070_vm1, %v4732_v63 }
 0x272   : > { %v1648_v10 = vpack.c.bf16 %v1615_v16, %v1611_v8  ;;  %1077 = vst.msk [vmem:[#allocation6 + $0x30] sm:$0xff] %vm1070_vm1, %v4732_v63  ;;  %1078 = vst.msk [vmem:[#allocation6 + $0x38] sm:$0xff] %vm1070_vm1, %v4732_v63 }
 0x273   : > { %1079 = vst.msk [vmem:[#allocation6 + $0x40] sm:$0xff] %vm1070_vm1, %v4732_v63  ;;  %1080 = vst.msk [vmem:[#allocation6 + $0x48] sm:$0xff] %vm1070_vm1, %v4732_v63 }
 0x274   : > { %v1618_v19 = vpop.f32.mrb[28].mxu1  ;;  %3046 = vmatprep.subr.bf16.mxu1 %v1648_v10  ;;  %1081 = vst.msk [vmem:[#allocation6 + $0x50] sm:$0xff] %vm1070_vm1, %v4732_v63  ;;  %1082 = vst.msk [vmem:[#allocation6 + $0x58] sm:$0xff] %vm1070_vm1, %v4732_v63 }
 0x275   : > { %v1620_v20 = vpop.f32.mrb[29].mxu1  ;;  %3047 = vmatpush1.bf16.xpose.msra.mxu1 %v1647_v18  ;;  %v1619_v11 = vadd.f32 %v1618_v19, %v1515_v9  ;;  %1083 = vst.msk [vmem:[#allocation6 + $0x60] sm:$0xff] %vm1070_vm1, %v4732_v63  ;;  %1084 = vst.msk [vmem:[#allocation6 + $0x68] sm:$0xff] %vm1070_vm1, %v4732_v63 }
 0x276   : > { %v1622_v23 = vpop.f32.mrb[30].mxu1  ;;  %v1621_v49 = vadd.f32 %v1620_v20, %v1515_v9  ;;  %1085 = vst.msk [vmem:[#allocation6 + $0x70] sm:$0xff] %vm1070_vm1, %v4732_v63  ;;  %1086 = vst.msk [vmem:[#allocation6 + $0x78] sm:$0xff] %vm1070_vm1, %v4732_v63 }
 0x277   : > { %v1623_v12 = vadd.f32 %v1622_v23, %v1520_v22  ;;  %v1624_v13 = vpop.f32.mrb[31].mxu1  ;;  %1087 = vst.msk [vmem:[#allocation6 + $0x80] sm:$0xff] %vm1070_vm1, %v4732_v63  ;;  %1088 = vst.msk [vmem:[#allocation6 + $0x88] sm:$0xff] %vm1070_vm1, %v4732_v63 }
 0x278   : > { %v1625_v14 = vadd.f32 %v1624_v13, %v1520_v22  ;;  %4093 = vmatmul.mubr.msk.bf16.gmra.mrb[28].mxu0 %vm796_vm0, %v1700_v48  ;;  %1089 = vst.msk [vmem:[#allocation6 + $0x90] sm:$0xff] %vm1070_vm1, %v4732_v63  ;;  %1090 = vst.msk [vmem:[#allocation6 + $0x98] sm:$0xff] %vm1070_vm1, %v4732_v63 }
 0x279   : > { %v1649_v15 = vpack.c.bf16 %v1623_v12, %v1619_v11  ;;  %1816 = vmatprep.mubr.bf16.mxu0 %v4731_v0  ;;  %1091 = vst.msk [vmem:[#allocation6 + $0xa0] sm:$0xff] %vm1070_vm1, %v4732_v63  ;;  %1092 = vst.msk [vmem:[#allocation6 + $0xa8] sm:$0xff] %vm1070_vm1, %v4732_v63 }
 0x27a   : > { %v1650_v21 = vpack.c.bf16 %v1625_v14, %v1621_v49  ;;  %1093 = vst.msk [vmem:[#allocation6 + $0xb0] sm:$0xff] %vm1070_vm1, %v4732_v63  ;;  %1094 = vst.msk [vmem:[#allocation6 + $0xb8] sm:$0xff] %vm1070_vm1, %v4732_v63 }
 0x27b   : > { %1095 = vst.msk [vmem:[#allocation6 + $0xc0] sm:$0xff] %vm1070_vm1, %v4732_v63  ;;  %1096 = vst.msk [vmem:[#allocation6 + $0xc8] sm:$0xff] %vm1070_vm1, %v4732_v63 }
 0x27c   : > { %v1628_v24 = vpop.f32.mrb[32].mxu1  ;;  %3048 = vmatprep.subr.bf16.mxu1 %v1650_v21  ;;  %1097 = vst.msk [vmem:[#allocation6 + $0xd0] sm:$0xff] %vm1070_vm1, %v4732_v63  ;;  %1098 = vst.msk [vmem:[#allocation6 + $0xd8] sm:$0xff] %vm1070_vm1, %v4732_v63 }
 0x27d   : > { %v1630_v26 = vpop.f32.mrb[33].mxu1  ;;  %3049 = vmatpush1.bf16.xpose.msra.mxu1 %v1649_v15  ;;  %v1629_v29 = vadd.f32 %v1628_v24, %v1525_v17  ;;  %1099 = vst.msk [vmem:[#allocation6 + $0xe0] sm:$0xff] %vm1070_vm1, %v4732_v63  ;;  %1100 = vst.msk [vmem:[#allocation6 + $0xe8] sm:$0xff] %vm1070_vm1, %v4732_v63 }
 0x27e   : > { %v1632_v28 = vpop.f32.mrb[34].mxu1  ;;  %v1631_v34 = vadd.f32 %v1630_v26, %v1525_v17  ;;  %1101 = vst.msk [vmem:[#allocation6 + $0xf0] sm:$0xff] %vm1070_vm1, %v4732_v63  ;;  %1102 = vst.msk [vmem:[#allocation6 + $0xf8] sm:$0xff] %vm1070_vm1, %v4732_v63  ;;  %v4733_v17 = vmov 0.0  }
 0x27f   : > { %v1633_v30 = vadd.f32 %v1632_v28, %v1530_v27  ;;  %v1634_v31 = vpop.f32.mrb[35].mxu1  ;;  %1136 = vst.msk [vmem:[#allocation5 + $0x8] sm:$0xff] %vm796_vm0, %v4733_v17  ;;  %1135 = vst.msk [vmem:[#allocation5] sm:$0xff] %vm796_vm0, %v4733_v17 }
 0x280   : > { %v1635_v35 = vadd.f32 %v1634_v31, %v1530_v27  ;;  %4094 = vmatmul.mubr.msk.bf16.gmra.mrb[32].mxu0 %vm796_vm0, %v1701_v32  ;;  %1103 = vst.msk [vmem:[#allocation7] sm:$0xff] %vm1070_vm1, %v4733_v17  ;;  %1104 = vst.msk [vmem:[#allocation7 + $0x8] sm:$0xff] %vm1070_vm1, %v4733_v17 }
 0x281   : > { %v1651_v36 = vpack.c.bf16 %v1633_v30, %v1629_v29  ;;  %1826 = vmatprep.mubr.bf16.mxu0 %v4731_v0  ;;  %1105 = vst.msk [vmem:[#allocation7 + $0x10] sm:$0xff] %vm1070_vm1, %v4733_v17  ;;  %1106 = vst.msk [vmem:[#allocation7 + $0x18] sm:$0xff] %vm1070_vm1, %v4733_v17 }
 0x282   : > { %v1652_v37 = vpack.c.bf16 %v1635_v35, %v1631_v34  ;;  %1107 = vst.msk [vmem:[#allocation7 + $0x20] sm:$0xff] %vm1070_vm1, %v4733_v17  ;;  %1108 = vst.msk [vmem:[#allocation7 + $0x28] sm:$0xff] %vm1070_vm1, %v4733_v17 }
 0x283   : > { %1109 = vst.msk [vmem:[#allocation7 + $0x30] sm:$0xff] %vm1070_vm1, %v4733_v17  ;;  %1110 = vst.msk [vmem:[#allocation7 + $0x38] sm:$0xff] %vm1070_vm1, %v4733_v17 }
 0x284   : > { %v1638_v38 = vpop.f32.mrb[36].mxu1  ;;  %3050 = vmatprep.subr.bf16.mxu1 %v1652_v37  ;;  %1111 = vst.msk [vmem:[#allocation7 + $0x40] sm:$0xff] %vm1070_vm1, %v4733_v17  ;;  %1112 = vst.msk [vmem:[#allocation7 + $0x48] sm:$0xff] %vm1070_vm1, %v4733_v17 }
 0x285   : > { %v1640_v39 = vpop.f32.mrb[37].mxu1  ;;  %3051 = vmatpush1.bf16.xpose.msra.mxu1 %v1651_v36  ;;  %v1639_v42 = vadd.f32 %v1638_v38, %v1535_v33  ;;  %1113 = vst.msk [vmem:[#allocation7 + $0x50] sm:$0xff] %vm1070_vm1, %v4733_v17  ;;  %1114 = vst.msk [vmem:[#allocation7 + $0x58] sm:$0xff] %vm1070_vm1, %v4733_v17 }
 0x286   : > { %v1642_v41 = vpop.f32.mrb[38].mxu1  ;;  %v1641_v45 = vadd.f32 %v1640_v39, %v1535_v33  ;;  %1115 = vst.msk [vmem:[#allocation7 + $0x60] sm:$0xff] %vm1070_vm1, %v4733_v17  ;;  %1116 = vst.msk [vmem:[#allocation7 + $0x68] sm:$0xff] %vm1070_vm1, %v4733_v17 }
 0x287   : > { %v1643_v25 = vadd.f32 %v1642_v41, %v1540_v40  ;;  %v1644_v43 = vpop.f32.mrb[39].mxu1  ;;  %1117 = vst.msk [vmem:[#allocation7 + $0x70] sm:$0xff] %vm1070_vm1, %v4733_v17  ;;  %1118 = vst.msk [vmem:[#allocation7 + $0x78] sm:$0xff] %vm1070_vm1, %v4733_v17 }
 0x288   : > { %v1645_v46 = vadd.f32 %v1644_v43, %v1540_v40  ;;  %4095 = vmatmul.mubr.msk.bf16.gmra.mrb[36].mxu0 %vm796_vm0, %v1702_v44  ;;  %1119 = vst.msk [vmem:[#allocation7 + $0x80] sm:$0xff] %vm1070_vm1, %v4733_v17  ;;  %1120 = vst.msk [vmem:[#allocation7 + $0x88] sm:$0xff] %vm1070_vm1, %v4733_v17 }
 0x289   : > { %v1653_v47 = vpack.c.bf16 %v1643_v25, %v1639_v42  ;;  %1836 = vmatprep.mubr.bf16.mxu0 %v4731_v0  ;;  %1121 = vst.msk [vmem:[#allocation7 + $0x90] sm:$0xff] %vm1070_vm1, %v4733_v17  ;;  %1122 = vst.msk [vmem:[#allocation7 + $0x98] sm:$0xff] %vm1070_vm1, %v4733_v17 }
 0x28a   : > { %v1654_v50 = vpack.c.bf16 %v1645_v46, %v1641_v45  ;;  %1123 = vst.msk [vmem:[#allocation7 + $0xa0] sm:$0xff] %vm1070_vm1, %v4733_v17  ;;  %1124 = vst.msk [vmem:[#allocation7 + $0xa8] sm:$0xff] %vm1070_vm1, %v4733_v17 }
 0x28b   : > { %1125 = vst.msk [vmem:[#allocation7 + $0xb0] sm:$0xff] %vm1070_vm1, %v4733_v17  ;;  %1126 = vst.msk [vmem:[#allocation7 + $0xb8] sm:$0xff] %vm1070_vm1, %v4733_v17 }
 0x28c   : > { %3052 = vmatprep.subr.bf16.mxu1 %v1654_v50  ;;  %1127 = vst.msk [vmem:[#allocation7 + $0xc0] sm:$0xff] %vm1070_vm1, %v4733_v17  ;;  %1128 = vst.msk [vmem:[#allocation7 + $0xc8] sm:$0xff] %vm1070_vm1, %v4733_v17 }
 0x28d   : > { %3053 = vmatpush1.bf16.xpose.msra.mxu1 %v1653_v47  ;;  %1129 = vst.msk [vmem:[#allocation7 + $0xd0] sm:$0xff] %vm1070_vm1, %v4733_v17  ;;  %1130 = vst.msk [vmem:[#allocation7 + $0xd8] sm:$0xff] %vm1070_vm1, %v4733_v17 }
 0x28e   : > { %1131 = vst.msk [vmem:[#allocation7 + $0xe0] sm:$0xff] %vm1070_vm1, %v4733_v17  ;;  %1132 = vst.msk [vmem:[#allocation7 + $0xe8] sm:$0xff] %vm1070_vm1, %v4733_v17 }
 0x28f   : > { %1133 = vst.msk [vmem:[#allocation7 + $0xf0] sm:$0xff] %vm1070_vm1, %v4733_v17  ;;  %1134 = vst.msk [vmem:[#allocation7 + $0xf8] sm:$0xff] %vm1070_vm1, %v4733_v17 }
 0x290   : > { %4096 = vmatmul.mubr.msk.bf16.gmra.mrb[40].mxu0 %vm796_vm0, %v1703_v51  ;;  %1137 = vst.msk [vmem:[#allocation5 + $0x10] sm:$0xff] %vm796_vm0, %v4733_v17  ;;  %1138 = vst.msk [vmem:[#allocation5 + $0x18] sm:$0xff] %vm796_vm0, %v4733_v17 }
 0x291   : > { %1846 = vmatprep.mubr.bf16.mxu0 %v4731_v0  ;;  %1139 = vst.msk [vmem:[#allocation5 + $0x20] sm:$0xff] %vm796_vm0, %v4733_v17  ;;  %1140 = vst.msk [vmem:[#allocation5 + $0x28] sm:$0xff] %vm796_vm0, %v4733_v17 }
 0x292   : > { %1141 = vst.msk [vmem:[#allocation5 + $0x30] sm:$0xff] %vm796_vm0, %v4733_v17  ;;  %1142 = vst.msk [vmem:[#allocation5 + $0x38] sm:$0xff] %vm796_vm0, %v4733_v17 }
 0x293   : > { %1143 = vst.msk [vmem:[#allocation5 + $0x40] sm:$0xff] %vm796_vm0, %v4733_v17  ;;  %1144 = vst.msk [vmem:[#allocation5 + $0x48] sm:$0xff] %vm796_vm0, %v4733_v17 }
 0x294   : > { %1145 = vst.msk [vmem:[#allocation5 + $0x50] sm:$0xff] %vm796_vm0, %v4733_v17  ;;  %1146 = vst.msk [vmem:[#allocation5 + $0x58] sm:$0xff] %vm796_vm0, %v4733_v17 }
 0x295   : > { %1147 = vst.msk [vmem:[#allocation5 + $0x60] sm:$0xff] %vm796_vm0, %v4733_v17  ;;  %1148 = vst.msk [vmem:[#allocation5 + $0x68] sm:$0xff] %vm796_vm0, %v4733_v17 }
 0x296   : > { %1149 = vst.msk [vmem:[#allocation5 + $0x70] sm:$0xff] %vm796_vm0, %v4733_v17  ;;  %1150 = vst.msk [vmem:[#allocation5 + $0x78] sm:$0xff] %vm796_vm0, %v4733_v17 }
 0x297   : > { %1151 = vst.msk [vmem:[#allocation5 + $0x80] sm:$0xff] %vm796_vm0, %v4733_v17  ;;  %1152 = vst.msk [vmem:[#allocation5 + $0x88] sm:$0xff] %vm796_vm0, %v4733_v17 }
 0x298   : > { %4097 = vmatmul.mubr.msk.bf16.gmra.mrb[44].mxu0 %vm796_vm0, %v1704_v52  ;;  %1153 = vst.msk [vmem:[#allocation5 + $0x90] sm:$0xff] %vm796_vm0, %v4733_v17  ;;  %1154 = vst.msk [vmem:[#allocation5 + $0x98] sm:$0xff] %vm796_vm0, %v4733_v17 }
 0x299   : > { %1856 = vmatprep.mubr.bf16.mxu0 %v4731_v0  ;;  %1155 = vst.msk [vmem:[#allocation5 + $0xa0] sm:$0xff] %vm796_vm0, %v4733_v17  ;;  %1156 = vst.msk [vmem:[#allocation5 + $0xa8] sm:$0xff] %vm796_vm0, %v4733_v17 }
 0x29a   : > { %1157 = vst.msk [vmem:[#allocation5 + $0xb0] sm:$0xff] %vm796_vm0, %v4733_v17  ;;  %1158 = vst.msk [vmem:[#allocation5 + $0xb8] sm:$0xff] %vm796_vm0, %v4733_v17 }
 0x29b   : > { %1159 = vst.msk [vmem:[#allocation5 + $0xc0] sm:$0xff] %vm796_vm0, %v4733_v17  ;;  %1160 = vst.msk [vmem:[#allocation5 + $0xc8] sm:$0xff] %vm796_vm0, %v4733_v17 }
 0x29c   : > { %1161 = vst.msk [vmem:[#allocation5 + $0xd0] sm:$0xff] %vm796_vm0, %v4733_v17  ;;  %1162 = vst.msk [vmem:[#allocation5 + $0xd8] sm:$0xff] %vm796_vm0, %v4733_v17 }
 0x29d   : > { %1163 = vst.msk [vmem:[#allocation5 + $0xe0] sm:$0xff] %vm796_vm0, %v4733_v17  ;;  %1164 = vst.msk [vmem:[#allocation5 + $0xe8] sm:$0xff] %vm796_vm0, %v4733_v17 }
 0x29e   : > { %1165 = vst.msk [vmem:[#allocation5 + $0xf0] sm:$0xff] %vm796_vm0, %v4733_v17  ;;  %1166 = vst.msk [vmem:[#allocation5 + $0xf8] sm:$0xff] %vm796_vm0, %v4733_v17 }
 0x2a0   : > { %4098 = vmatmul.mubr.msk.bf16.gmra.mrb[48].mxu0 %vm796_vm0, %v1705_v53 }
 0x2a1   : > { %1866 = vmatprep.mubr.bf16.mxu0 %v4731_v0 }
 0x2a8   : > { %4099 = vmatmul.mubr.msk.bf16.gmra.mrb[52].mxu0 %vm796_vm0, %v1706_v54 }
 0x2a9   : > { %1876 = vmatprep.mubr.bf16.mxu0 %v4731_v0 }
 0x2b0   : > { %4100 = vmatmul.mubr.msk.bf16.gmra.mrb[56].mxu0 %vm796_vm0, %v1707_v55 }
 0x2b1   : > { %1886 = vmatprep.mubr.bf16.mxu0 %v4731_v0 }
 0x2b8   : > { %4101 = vmatmul.mubr.msk.bf16.gmra.mrb[60].mxu0 %vm796_vm0, %v1708_v56 }
 0x2b9   : > { %1896 = vmatprep.mubr.bf16.mxu0 %v4731_v0 }
 0x2c0   : > { %4102 = vmatmul.mubr.msk.bf16.gmra.mrb[64].mxu0 %vm796_vm0, %v1709_v57 }
 0x2c1   : > { %1906 = vmatprep.mubr.bf16.mxu0 %v4731_v0 }
 0x2c8   : > { %4103 = vmatmul.mubr.msk.bf16.gmra.mrb[68].mxu0 %vm796_vm0, %v1710_v58 }
 0x2c9   : > { %1916 = vmatprep.mubr.bf16.mxu0 %v4731_v0 }
 0x2d0   : > { %4104 = vmatmul.mubr.msk.bf16.gmra.mrb[72].mxu0 %vm796_vm0, %v1711_v59 }
 0x2d1   : > { %1926 = vmatprep.mubr.bf16.mxu0 %v4731_v0 }
 0x2d8   : > { %4105 = vmatmul.mubr.msk.bf16.gmra.mrb[76].mxu0 %vm796_vm0, %v1712_v60 }
 0x2d9   : > { %1936 = vmatprep.mubr.bf16.mxu0 %v4731_v0 }
 0x2e0   : > { %4106 = vmatmul.mubr.msk.bf16.gmra.mrb[80].mxu0 %vm796_vm0, %v1713_v61 }
 0x2e1   : > { %1946 = vmatprep.mubr.bf16.mxu0 %v4731_v0 }
 0x2e8   : > { %4107 = vmatmul.mubr.msk.bf16.gmra.mrb[84].mxu0 %vm796_vm0, %v1714_v62 }
 0x343   : > { %v5259_v0 = vpop.f32.mrb[24].mxu0 }
 0x344   : > { %v5261_v1 = vpop.f32.mrb[25].mxu0 }
 0x345   : > { %v5263_v2 = vpop.f32.mrb[26].mxu0  ;;  %v1989_v3 = vmax.f32 %v5259_v0, %v5261_v1 }
 0x346   : > { %v5267_v4 = vpop.f32.mrb[27].mxu0 }
 0x347   : > { %1990 = vmax.xlane.f32.xlu0 %v1989_v3  ;;  %v1992_v5 = vmax.f32 %v5263_v2, %v5267_v4 }
 0x349   : > { %1993 = vmax.xlane.f32.xlu1 %v1992_v5 }
 0x34b   : > { %v5271_v6 = vpop.f32.mrb[28].mxu0 }
 0x34c   : > { %v5273_v7 = vpop.f32.mrb[29].mxu0 }
 0x34d   : > { %v5275_v8 = vpop.f32.mrb[30].mxu0  ;;  %v1995_v16 = vmax.f32 %v5271_v6, %v5273_v7 }
 0x34e   : > { %v5279_v18 = vpop.f32.mrb[31].mxu0 }
 0x34f   : > { %1996 = vmax.xlane.f32.xlu0 %v1995_v16  ;;  %v1998_v10 = vmax.f32 %v5275_v8, %v5279_v18 }
 0x353   : > { %1999 = vmax.xlane.f32.xlu0 %v1998_v10  ;;  %v5283_v9 = vpop.f32.mrb[32].mxu0 }
 0x354   : > { %v5285_v19 = vpop.f32.mrb[33].mxu0 }
 0x355   : > { %v5287_v20 = vpop.f32.mrb[34].mxu0  ;;  %v2001_v22 = vmax.f32 %v5283_v9, %v5285_v19 }
 0x356   : > { %v5291_v23 = vpop.f32.mrb[35].mxu0 }
 0x357   : > { %2002 = vmax.xlane.f32.xlu1 %v2001_v22  ;;  %v2004_v11 = vmax.f32 %v5287_v20, %v5291_v23 }
 0x359   : > { %2005 = vmax.xlane.f32.xlu0 %v2004_v11 }
 0x35b   : > { %v5295_v12 = vpop.f32.mrb[36].mxu0 }
 0x35c   : > { %v5297_v13 = vpop.f32.mrb[37].mxu0 }
 0x35d   : > { %v5299_v48 = vpop.f32.mrb[38].mxu0  ;;  %v2007_v49 = vmax.f32 %v5295_v12, %v5297_v13 }
 0x35e   : > { %v5303_v14 = vpop.f32.mrb[39].mxu0 }
 0x35f   : > { %2008 = vmax.xlane.f32.xlu1 %v2007_v49  ;;  %v2010_v15 = vmax.f32 %v5299_v48, %v5303_v14 }
 0x361   : > { %2011 = vmax.xlane.f32.xlu0 %v2010_v15 }
 0x363   : > { %v5438_v21 = vpop.f32.mrb[40].mxu0 }
 0x364   : > { %v5440_v24 = vpop.f32.mrb[41].mxu0 }
 0x365   : > { %v5442_v26 = vpop.f32.mrb[42].mxu0  ;;  %v2013_v27 = vmax.f32 %v5438_v21, %v5440_v24 }
 0x366   : > { %v5446_v28 = vpop.f32.mrb[43].mxu0 }
 0x367   : > { %2014 = vmax.xlane.f32.xlu1 %v2013_v27  ;;  %v2016_v29 = vmax.f32 %v5442_v26, %v5446_v28 }
 0x369   : > { %2017 = vmax.xlane.f32.xlu0 %v2016_v29 }
 0x36b   : > { %v5450_v30 = vpop.f32.mrb[44].mxu0 }
 0x36c   : > { %6651 = vst [vmem:[#allocation23_spill] sm:$0xff] %v5450_v30  ;;  %v5452_v31 = vpop.f32.mrb[45].mxu0 }
 0x36d   : > { %6652 = vst [vmem:[#allocation24_spill] sm:$0xff] %v5452_v31  ;;  %v5454_v32 = vpop.f32.mrb[46].mxu0  ;;  %v2019_v33 = vmax.f32 %v5450_v30, %v5452_v31  ;;  %v5778_v30 = vld [vmem:[#allocation6 + $0xa8] sm:$0xff] }
 0x36e   : > { %6653 = vst [vmem:[#allocation25_spill] sm:$0xff] %v5454_v32  ;;  %v5458_v34 = vpop.f32.mrb[47].mxu0 }
 0x36f   : > { %6654 = vst [vmem:[#allocation26_spill] sm:$0xff] %v5458_v34  ;;  %2020 = vmax.xlane.f32.xlu1 %v2019_v33  ;;  %v2022_v35 = vmax.f32 %v5454_v32, %v5458_v34  ;;  %v5755_v32 = vld [vmem:[#allocation6 + $0x98] sm:$0xff] }
 0x371   : > { %2023 = vmax.xlane.f32.xlu0 %v2022_v35 }
 0x373   : > { %v5462_v36 = vpop.f32.mrb[48].mxu0 }
 0x374   : > { %6655 = vst [vmem:[#allocation27_spill] sm:$0xff] %v5462_v36  ;;  %v5464_v37 = vpop.f32.mrb[49].mxu0 }
 0x375   : > { %6656 = vst [vmem:[#allocation28_spill] sm:$0xff] %v5464_v37  ;;  %v5466_v38 = vpop.f32.mrb[50].mxu0  ;;  %v2025_v39 = vmax.f32 %v5462_v36, %v5464_v37  ;;  %v5738_v36 = vld [vmem:[#allocation6 + $0x88] sm:$0xff] }
 0x376   : > { %6657 = vst [vmem:[#allocation29_spill] sm:$0xff] %v5466_v38  ;;  %v5470_v40 = vpop.f32.mrb[51].mxu0 }
 0x377   : > { %6658 = vst [vmem:[#allocation30_spill] sm:$0xff] %v5470_v40  ;;  %2026 = vmax.xlane.f32.xlu1 %v2025_v39  ;;  %v2028_v41 = vmax.f32 %v5466_v38, %v5470_v40  ;;  %v5718_v40 = vld [vmem:[#allocation6 + $0x70] sm:$0xff]  ;;  %v5720_v38 = vld [vmem:[#allocation6 + $0x78] sm:$0xff] }
 0x378   : > { %6700 = vst [vmem:[#allocation72_spill] sm:$0xff] %v5718_v40  ;;  %6701 = vst [vmem:[#allocation73_spill] sm:$0xff] %v5720_v38 }
 0x379   : > { %2029 = vmax.xlane.f32.xlu0 %v2028_v41 }
 0x37b   : > { %v5474_v42 = vpop.f32.mrb[52].mxu0 }
 0x37c   : > { %6659 = vst [vmem:[#allocation31_spill] sm:$0xff] %v5474_v42  ;;  %v5476_v25 = vpop.f32.mrb[53].mxu0 }
 0x37d   : > { %6660 = vst [vmem:[#allocation32_spill] sm:$0xff] %v5476_v25  ;;  %v5478_v43 = vpop.f32.mrb[54].mxu0  ;;  %v2031_v44 = vmax.f32 %v5474_v42, %v5476_v25 }
 0x37e   : > { %6661 = vst [vmem:[#allocation33_spill] sm:$0xff] %v5478_v43  ;;  %v5482_v45 = vpop.f32.mrb[55].mxu0 }
 0x37f   : > { %6662 = vst [vmem:[#allocation34_spill] sm:$0xff] %v5482_v45  ;;  %2032 = vmax.xlane.f32.xlu1 %v2031_v44  ;;  %v2034_v46 = vmax.f32 %v5478_v43, %v5482_v45  ;;  %v5700_v45 = vld [vmem:[#allocation6 + $0x60] sm:$0xff]  ;;  %v5702_v43 = vld [vmem:[#allocation6 + $0x68] sm:$0xff] }
 0x380   : > { %6696 = vst [vmem:[#allocation68_spill] sm:$0xff] %v5700_v45  ;;  %6697 = vst [vmem:[#allocation69_spill] sm:$0xff] %v5702_v43 }
 0x381   : > { %2035 = vmax.xlane.f32.xlu0 %v2034_v46 }
 0x383   : > { %v5486_v47 = vpop.f32.mrb[56].mxu0 }
 0x384   : > { %6663 = vst [vmem:[#allocation35_spill] sm:$0xff] %v5486_v47  ;;  %v5488_v50 = vpop.f32.mrb[57].mxu0 }
 0x385   : > { %6664 = vst [vmem:[#allocation36_spill] sm:$0xff] %v5488_v50  ;;  %v5490_v51 = vpop.f32.mrb[58].mxu0  ;;  %v2037_v52 = vmax.f32 %v5486_v47, %v5488_v50 }
 0x386   : > { %6665 = vst [vmem:[#allocation37_spill] sm:$0xff] %v5490_v51  ;;  %v5494_v53 = vpop.f32.mrb[59].mxu0 }
 0x387   : > { %6666 = vst [vmem:[#allocation38_spill] sm:$0xff] %v5494_v53  ;;  %2038 = vmax.xlane.f32.xlu1 %v2037_v52  ;;  %v2040_v54 = vmax.f32 %v5490_v51, %v5494_v53 }
 0x389   : > { %2041 = vmax.xlane.f32.xlu0 %v2040_v54 }
 0x38b   : > { %v5498_v55 = vpop.f32.mrb[60].mxu0 }
 0x38c   : > { %6667 = vst [vmem:[#allocation39_spill] sm:$0xff] %v5498_v55  ;;  %v5500_v56 = vpop.f32.mrb[61].mxu0 }
 0x38d   : > { %6668 = vst [vmem:[#allocation40_spill] sm:$0xff] %v5500_v56  ;;  %v5502_v57 = vpop.f32.mrb[62].mxu0  ;;  %v2043_v58 = vmax.f32 %v5498_v55, %v5500_v56 }
 0x38e   : > { %6669 = vst [vmem:[#allocation41_spill] sm:$0xff] %v5502_v57  ;;  %v5506_v59 = vpop.f32.mrb[63].mxu0 }
 0x38f   : > { %6670 = vst [vmem:[#allocation42_spill] sm:$0xff] %v5506_v59  ;;  %2044 = vmax.xlane.f32.xlu1 %v2043_v58  ;;  %v2046_v60 = vmax.f32 %v5502_v57, %v5506_v59  ;;  %v5684_v59 = vld [vmem:[#allocation6 + $0x58] sm:$0xff] }
 0x390   : > { %6695 = vst [vmem:[#allocation67_spill] sm:$0xff] %v5684_v59 }
 0x391   : > { %2047 = vmax.xlane.f32.xlu0 %v2046_v60 }
 0x393   : > { %v5510_v61 = vpop.f32.mrb[64].mxu0 }
 0x394   : > { %6671 = vst [vmem:[#allocation43_spill] sm:$0xff] %v5510_v61  ;;  %v5512_v62 = vpop.f32.mrb[65].mxu0 }
 0x395   : > { %6672 = vst [vmem:[#allocation44_spill] sm:$0xff] %v5512_v62  ;;  %v5514_v63 = vpop.f32.mrb[66].mxu0  ;;  %v2049_v3 = vmax.f32 %v5510_v61, %v5512_v62  ;;  %v5664_v62 = vld [vmem:[#allocation6 + $0x48] sm:$0xff] }
 0x396   : > { %6673 = vst [vmem:[#allocation45_spill] sm:$0xff] %v5514_v63  ;;  %v5518_v5 = vpop.f32.mrb[67].mxu0 }
 0x397   : > { %6674 = vst [vmem:[#allocation46_spill] sm:$0xff] %v5518_v5  ;;  %2050 = vmax.xlane.f32.xlu0 %v2049_v3  ;;  %v2052_v16 = vmax.f32 %v5514_v63, %v5518_v5 }
 0x399   : > { %2053 = vmax.xlane.f32.xlu1 %v2052_v16 }
 0x39b   : > { %v5522_v10 = vpop.f32.mrb[68].mxu0 }
 0x39c   : > { %6675 = vst [vmem:[#allocation47_spill] sm:$0xff] %v5522_v10  ;;  %v5524_v22 = vpop.f32.mrb[69].mxu0 }
 0x39d   : > { %6676 = vst [vmem:[#allocation48_spill] sm:$0xff] %v5524_v22  ;;  %v5526_v11 = vpop.f32.mrb[70].mxu0  ;;  %v2055_v49 = vmax.f32 %v5522_v10, %v5524_v22 }
 0x39e   : > { %6677 = vst [vmem:[#allocation49_spill] sm:$0xff] %v5526_v11  ;;  %v5530_v15 = vpop.f32.mrb[71].mxu0 }
 0x39f   : > { %6678 = vst [vmem:[#allocation50_spill] sm:$0xff] %v5530_v15  ;;  %2056 = vmax.xlane.f32.xlu0 %v2055_v49  ;;  %v2058_v17 = vmax.f32 %v5526_v11, %v5530_v15  ;;  %v5624_v15 = vld [vmem:[#allocation6 + $0x28] sm:$0xff] }
 0x3a1   : > { %2059 = vmax.xlane.f32.xlu1 %v2058_v17 }
 0x3a3   : > { %v5534_v27 = vpop.f32.mrb[72].mxu0 }
 0x3a4   : > { %6679 = vst [vmem:[#allocation51_spill] sm:$0xff] %v5534_v27  ;;  %v5536_v29 = vpop.f32.mrb[73].mxu0 }
 0x3a5   : > { %6680 = vst [vmem:[#allocation52_spill] sm:$0xff] %v5536_v29  ;;  %v5538_v33 = vpop.f32.mrb[74].mxu0  ;;  %v2061_v35 = vmax.f32 %v5534_v27, %v5536_v29  ;;  %v5617_v27 = vld [vmem:[#allocation6 + $0x20] sm:$0xff] }
 0x3a6   : > { %6681 = vst [vmem:[#allocation53_spill] sm:$0xff] %v5538_v33  ;;  %v5542_v39 = vpop.f32.mrb[75].mxu0 }
 0x3a7   : > { %6682 = vst [vmem:[#allocation54_spill] sm:$0xff] %v5542_v39  ;;  %2062 = vmax.xlane.f32.xlu0 %v2061_v35  ;;  %v2064_v41 = vmax.f32 %v5538_v33, %v5542_v39  ;;  %v5607_v33 = vld [vmem:[#allocation6 + $0x18] sm:$0xff] }
 0x3a9   : > { %2065 = vmax.xlane.f32.xlu1 %v2064_v41 }
 0x3ab   : > { %v5546_v44 = vpop.f32.mrb[76].mxu0 }
 0x3ac   : > { %6683 = vst [vmem:[#allocation55_spill] sm:$0xff] %v5546_v44  ;;  %v5548_v46 = vpop.f32.mrb[77].mxu0 }
 0x3ad   : > { %6684 = vst [vmem:[#allocation56_spill] sm:$0xff] %v5548_v46  ;;  %v5550_v52 = vpop.f32.mrb[78].mxu0  ;;  %v2067_v54 = vmax.f32 %v5546_v44, %v5548_v46  ;;  %v5584_v44 = vld [vmem:[#allocation6 + $0x8] sm:$0xff] }
 0x3ae   : > { %6685 = vst [vmem:[#allocation57_spill] sm:$0xff] %v5550_v52  ;;  %v5554_v58 = vpop.f32.mrb[79].mxu0 }
 0x3af   : > { %6686 = vst [vmem:[#allocation58_spill] sm:$0xff] %v5554_v58  ;;  %2068 = vmax.xlane.f32.xlu0 %v2067_v54  ;;  %v2070_v60 = vmax.f32 %v5550_v52, %v5554_v58 }
 0x3b1   : > { %2071 = vmax.xlane.f32.xlu1 %v2070_v60 }
 0x3b3   : > { %v5558_v3 = vpop.f32.mrb[80].mxu0 }
 0x3b4   : > { %6687 = vst [vmem:[#allocation59_spill] sm:$0xff] %v5558_v3  ;;  %v5560_v16 = vpop.f32.mrb[81].mxu0 }
 0x3b5   : > { %6688 = vst [vmem:[#allocation60_spill] sm:$0xff] %v5560_v16  ;;  %v5562_v49 = vpop.f32.mrb[82].mxu0  ;;  %v2073_v17 = vmax.f32 %v5558_v3, %v5560_v16  ;;  %v5582_v3 = vld [vmem:[#allocation6] sm:$0xff] }
 0x3b6   : > { %6689 = vst [vmem:[#allocation61_spill] sm:$0xff] %v5562_v49  ;;  %v5566_v35 = vpop.f32.mrb[83].mxu0 }
 0x3b7   : > { %6690 = vst [vmem:[#allocation62_spill] sm:$0xff] %v5566_v35  ;;  %2074 = vmax.xlane.f32.xlu0 %v2073_v17  ;;  %v2076_v41 = vmax.f32 %v5562_v49, %v5566_v35 }
 0x3b9   : > { %2077 = vmax.xlane.f32.xlu1 %v2076_v41 }
 0x3bb   : > { %v5570_v54 = vpop.f32.mrb[84].mxu0 }
 0x3bc   : > { %6691 = vst [vmem:[#allocation63_spill] sm:$0xff] %v5570_v54  ;;  %v5572_v58 = vpop.f32.mrb[85].mxu0 }
 0x3bd   : > { %6692 = vst [vmem:[#allocation64_spill] sm:$0xff] %v5572_v58  ;;  %v5576_v52 = vpop.f32.mrb[86].mxu0 }
 0x3be   : > { %6693 = vst [vmem:[#allocation65_spill] sm:$0xff] %v5576_v52  ;;  %v5578_v46 = vpop.f32.mrb[87].mxu0 }
 0x3bf   : > { %6694 = vst [vmem:[#allocation66_spill] sm:$0xff] %v5578_v46 }
 0x3d4   : > { %v1991_v17 = vpop.xlane.xlu0 %1990 }
 0x3d5   : > { %v5587_v41 = vmax.f32 %v5582_v3, %v1991_v17  ;;  %v5602_v17 = vld [vmem:[#allocation6 + $0x10] sm:$0xff] }
 0x3d6   : > { %v1994_v35 = vpop.xlane.xlu1 %1993 }
 0x3d7   : > { %3271 = vst.msk [vmem:[#allocation6] sm:$0xff] %vm1070_vm1, %v5587_v41  ;;  %v5594_v60 = vmax.f32 %v5584_v44, %v1994_v35  ;;  %2215 = vperm.xlu1 %4310, %v5587_v41  }
 0x3d9   : > { %3272 = vst.msk [vmem:[#allocation6 + $0x8] sm:$0xff] %vm1070_vm1, %v5594_v60  ;;  %2220 = vperm.xlu0 %4309, %v5594_v60  }
 0x3dc   : > { %v1997_v39 = vpop.xlane.xlu0 %1996 }
 0x3dd   : > { %v5605_v49 = vmax.f32 %v5602_v17, %v1997_v39 }
 0x3df   : > { %3273 = vst.msk [vmem:[#allocation6 + $0x10] sm:$0xff] %vm1070_vm1, %v5605_v49  ;;  %2225 = vperm.xlu0 %4309, %v5605_v49  }
 0x3e0   : > { %v2000_v16 = vpop.xlane.xlu0 %1999 }
 0x3e1   : > { %v5615_v29 = vmax.f32 %v5607_v33, %v2000_v16  ;;  %v5644_v16 = vld [vmem:[#allocation6 + $0x38] sm:$0xff] }
 0x3e3   : > { %3274 = vst.msk [vmem:[#allocation6 + $0x18] sm:$0xff] %vm1070_vm1, %v5615_v29  ;;  %2230 = vperm.xlu1 %4310, %v5615_v29  }
 0x3e4   : > { %v2003_v35 = vpop.xlane.xlu1 %2002 }
 0x3e5   : > { %v5627_v11 = vmax.f32 %v5617_v27, %v2003_v35  ;;  %v5642_v35 = vld [vmem:[#allocation6 + $0x30] sm:$0xff] }
 0x3e6   : > { %v2006_v22 = vpop.xlane.xlu0 %2005 }
 0x3e7   : > { %3275 = vst.msk [vmem:[#allocation6 + $0x20] sm:$0xff] %vm1070_vm1, %v5627_v11  ;;  %v5634_v39 = vmax.f32 %v5624_v15, %v2006_v22  ;;  %2235 = vperm.xlu0 %4309, %v5627_v11  }
 0x3e9   : > { %3276 = vst.msk [vmem:[#allocation6 + $0x28] sm:$0xff] %vm1070_vm1, %v5634_v39  ;;  %2240 = vperm.xlu1 %4310, %v5634_v39  }
 0x3ec   : > { %v2009_v5 = vpop.xlane.xlu1 %2008 }
 0x3ed   : > { %v5647_v63 = vmax.f32 %v5642_v35, %v2009_v5  ;;  %v5662_v5 = vld [vmem:[#allocation6 + $0x40] sm:$0xff] }
 0x3ee   : > { %v2012_v22 = vpop.xlane.xlu0 %2011 }
 0x3ef   : > { %3277 = vst.msk [vmem:[#allocation6 + $0x30] sm:$0xff] %vm1070_vm1, %v5647_v63  ;;  %v5654_v10 = vmax.f32 %v5644_v16, %v2012_v22  ;;  %2245 = vperm.xlu0 %4309, %v5647_v63  }
 0x3f1   : > { %3278 = vst.msk [vmem:[#allocation6 + $0x38] sm:$0xff] %vm1070_vm1, %v5654_v10  ;;  %2250 = vperm.xlu1 %4310, %v5654_v10  }
 0x3f4   : > { %v2015_v56 = vpop.xlane.xlu1 %2014 }
 0x3f5   : > { %v5667_v55 = vmax.f32 %v5662_v5, %v2015_v56  ;;  %v5682_v56 = vld [vmem:[#allocation6 + $0x50] sm:$0xff] }
 0x3f6   : > { %v2018_v22 = vpop.xlane.xlu0 %2017 }
 0x3f7   : > { %3279 = vst.msk [vmem:[#allocation6 + $0x40] sm:$0xff] %vm1070_vm1, %v5667_v55  ;;  %v5674_v61 = vmax.f32 %v5664_v62, %v2018_v22  ;;  %2255 = vperm.xlu0 %4309, %v5667_v55  }
 0x3f9   : > { %3280 = vst.msk [vmem:[#allocation6 + $0x48] sm:$0xff] %vm1070_vm1, %v5674_v61  ;;  %2260 = vperm.xlu1 %4310, %v5674_v61  }
 0x3fc   : > { %v2021_v53 = vpop.xlane.xlu1 %2020 }
 0x3fd   : > { %v5687_v51 = vmax.f32 %v5682_v56, %v2021_v53 }
 0x3fe   : > { %v2024_v22 = vpop.xlane.xlu0 %2023 }
 0x3ff   : > { %3281 = vst.msk [vmem:[#allocation6 + $0x50] sm:$0xff] %vm1070_vm1, %v5687_v51  ;;  %v5694_v57 = vmax.f32 %v5684_v59, %v2024_v22 }
 0x401   : > { %3282 = vst.msk [vmem:[#allocation6 + $0x58] sm:$0xff] %vm1070_vm1, %v5694_v57 }
 0x404   : > { %v2027_v53 = vpop.xlane.xlu1 %2026 }
 0x405   : > { %v5705_v25 = vmax.f32 %v5700_v45, %v2027_v53  ;;  %v6704_v45 = vmax.f32 %v5570_v54, %v5572_v58  ;;  %v6706_v54 = vsub.f32 %v5584_v44, %v5594_v60 }
 0x406   : > { %v2030_v50 = vpop.xlane.xlu0 %2029 }
 0x407   : > { %6698 = vst [vmem:[#allocation70_spill] sm:$0xff] %v5705_v25  ;;  %3283 = vst.msk [vmem:[#allocation6 + $0x60] sm:$0xff] %vm1070_vm1, %v5705_v25  ;;  %v5712_v22 = vmax.f32 %v5702_v43, %v2030_v50  ;;  %v5736_v43 = vld [vmem:[#allocation6 + $0x80] sm:$0xff]  ;;  %v2151_v31 = vmul.f32 1.442695, %v6706_v54  ;;  %v6708_v54 = vsub.f32 %v5602_v17, %v5605_v49 }
 0x409   : > { %6699 = vst [vmem:[#allocation71_spill] sm:$0xff] %v5712_v22  ;;  %3284 = vst.msk [vmem:[#allocation6 + $0x68] sm:$0xff] %vm1070_vm1, %v5712_v22  ;;  %4327 = vpow2.f32 %v2151_v31  ;;  %v6709_v31 = vsub.f32 %v5607_v33, %v5615_v29 }
 0x40c   : > { %v2033_v53 = vpop.xlane.xlu1 %2032 }
 0x40d   : > { %v5723_v37 = vmax.f32 %v5718_v40, %v2033_v53  ;;  %v5753_v40 = vld [vmem:[#allocation6 + $0x90] sm:$0xff] }
 0x40e   : > { %v2036_v42 = vpop.xlane.xlu0 %2035 }
 0x40f   : > { %6702 = vst [vmem:[#allocation74_spill] sm:$0xff] %v5723_v37  ;;  %3285 = vst.msk [vmem:[#allocation6 + $0x70] sm:$0xff] %vm1070_vm1, %v5723_v37  ;;  %v5730_v50 = vmax.f32 %v5720_v38, %v2036_v42 }
 0x411   : > { %6703 = vst [vmem:[#allocation75_spill] sm:$0xff] %v5730_v50  ;;  %3286 = vst.msk [vmem:[#allocation6 + $0x78] sm:$0xff] %vm1070_vm1, %v5730_v50 }
 0x413   : > { %v5805_v17 = vpop.eup %4327 }
 0x414   : > { %v2039_v53 = vpop.xlane.xlu1 %2038  ;;  %6710 = vst [vmem:[#allocation76_spill] sm:$0xff] %v5805_v17 }
 0x415   : > { %v5741_v34 = vmax.f32 %v5736_v43, %v2039_v53 }
 0x416   : > { %2080 = vmax.xlane.f32.xlu0 %v6704_v45  ;;  %v2042_v42 = vpop.xlane.xlu0 %2041  ;;  %v6705_v45 = vmax.f32 %v5576_v52, %v5578_v46  ;;  %v6707_v46 = vsub.f32 %v5582_v3, %v5587_v41  ;;  %v2153_v3 = vmul.f32 1.442695, %v6708_v54  ;;  %v5799_v41 = vld [vmem:[#allocation6 + $0xb8] sm:$0xff] }
 0x417   : > { %3287 = vst.msk [vmem:[#allocation6 + $0x80] sm:$0xff] %vm1070_vm1, %v5741_v34  ;;  %v5749_v47 = vmax.f32 %v5738_v36, %v2042_v42 }
 0x419   : > { %3288 = vst.msk [vmem:[#allocation6 + $0x88] sm:$0xff] %vm1070_vm1, %v5749_v47 }
 0x41c   : > { %v2045_v38 = vpop.xlane.xlu1 %2044 }
 0x41d   : > { %v5758_v53 = vmax.f32 %v5753_v40, %v2045_v38  ;;  %2083 = vmax.xlane.f32.xlu1 %v6705_v45  ;;  %v5773_v38 = vld [vmem:[#allocation6 + $0xa0] sm:$0xff]  ;;  %v2149_v45 = vmul.f32 1.442695, %v6707_v46  ;;  %v5793_v46 = vld [vmem:[#allocation6 + $0xb0] sm:$0xff] }
 0x41e   : > { %v2048_v58 = vpop.xlane.xlu0 %2047 }
 0x41f   : > { %3289 = vst.msk [vmem:[#allocation6 + $0x90] sm:$0xff] %vm1070_vm1, %v5758_v53  ;;  %v5766_v42 = vmax.f32 %v5755_v32, %v2048_v58  ;;  %4329 = vpow2.f32 %v2149_v45  ;;  %v6711_v45 = vsub.f32 %v5617_v27, %v5627_v11 }
 0x420   : > { %4331 = vpow2.f32 %v2153_v3  ;;  %v5821_v3 = vld [vmem:[#allocation6 + $0xc0] sm:$0xff] }
 0x421   : > { %3290 = vst.msk [vmem:[#allocation6 + $0x98] sm:$0xff] %vm1070_vm1, %v5766_v42  ;;  %v2157_v54 = vmul.f32 1.442695, %v6711_v45 }
 0x424   : > { %v2051_v52 = vpop.xlane.xlu0 %2050 }
 0x425   : > { %v5781_v58 = vmax.f32 %v5773_v38, %v2051_v52  ;;  %v2155_v52 = vmul.f32 1.442695, %v6709_v31  ;;  %v6712_v31 = vsub.f32 %v5624_v15, %v5634_v39 }
 0x426   : > { %v2054_v59 = vpop.xlane.xlu1 %2053 }
 0x427   : > { %3291 = vst.msk [vmem:[#allocation6 + $0xa0] sm:$0xff] %vm1070_vm1, %v5781_v58  ;;  %v5786_v44 = vmax.f32 %v5778_v30, %v2054_v59  ;;  %4333 = vpow2.f32 %v2155_v52  ;;  %v2159_v52 = vmul.f32 1.442695, %v6712_v31 }
 0x428   : > { %4335 = vpow2.f32 %v2157_v54  ;;  %v6714_v54 = vsub.f32 %v5642_v35, %v5647_v63 }
 0x429   : > { %3292 = vst.msk [vmem:[#allocation6 + $0xa8] sm:$0xff] %vm1070_vm1, %v5786_v44  ;;  %v5813_v33 = vpop.eup %4329  ;;  %4337 = vpow2.f32 %v2159_v52  ;;  %v5851_v52 = vld [vmem:[#allocation6 + $0xd0] sm:$0xff] }
 0x42a   : > { %v5833_v45 = vpop.eup %4331  ;;  %v2161_v31 = vmul.f32 1.442695, %v6714_v54 }
 0x42b   : > { %6713 = vst [vmem:[#allocation77_spill] sm:$0xff] %v5833_v45 }
 0x42c   : > { %2265 = vperm.xlu0 %4309, %v5687_v51   ;;  %v2057_v60 = vpop.xlane.xlu0 %2056  ;;  %4339 = vpow2.f32 %v2161_v31 }
 0x42d   : > { %v5802_v59 = vmax.f32 %v5793_v46, %v2057_v60 }
 0x42e   : > { %v2060_v49 = vpop.xlane.xlu1 %2059  ;;  %2270 = vperm.xlu1 %4310, %v5694_v57  }
 0x42f   : > { %3293 = vst.msk [vmem:[#allocation6 + $0xb0] sm:$0xff] %vm1070_vm1, %v5802_v59  ;;  %v5810_v29 = vmax.f32 %v5799_v41, %v2060_v49  ;;  %v5827_v49 = vld [vmem:[#allocation6 + $0xc8] sm:$0xff] }
 0x430   : > { %2829 = vperm.xlu0 %4309, %v5805_v17   ;;  %v2134_v17 = vsub.f32 %v5738_v36, %v5749_v47  ;;  %v5883_v36 = vld [vmem:[#allocation6 + $0xe0] sm:$0xff] }
 0x431   : > { %3294 = vst.msk [vmem:[#allocation6 + $0xb8] sm:$0xff] %vm1070_vm1, %v5810_v29  ;;  %v5841_v39 = vpop.eup %4333  ;;  %6717 = vst [vmem:[#allocation80_spill] sm:$0xff] %v5883_v36 }
 0x432   : > { %2824 = vperm.xlu1 %4310, %v5813_v33   ;;  %v5862_v54 = vpop.eup %4335 }
 0x433   : > { %6715 = vst [vmem:[#allocation78_spill] sm:$0xff] %v5862_v54 }
 0x434   : > { %2275 = vperm.xlu0 %4309, %v5705_v25   ;;  %v2063_v60 = vpop.xlane.xlu0 %2062 }
 0x435   : > { %v5830_v11 = vmax.f32 %v5821_v3, %v2063_v60 }
 0x436   : > { %v2066_v27 = vpop.xlane.xlu1 %2065  ;;  %2280 = vperm.xlu1 %4310, %v5712_v22  }
 0x437   : > { %3295 = vst.msk [vmem:[#allocation6 + $0xc0] sm:$0xff] %vm1070_vm1, %v5830_v11  ;;  %v5838_v15 = vmax.f32 %v5827_v49, %v2066_v27  ;;  %v2133_v27 = vsub.f32 %v5736_v43, %v5741_v34 }
 0x438   : > { %2834 = vperm.xlu0 %4309, %v5833_v45   ;;  %v5856_v45 = vld [vmem:[#allocation6 + $0xd8] sm:$0xff] }
 0x439   : > { %3296 = vst.msk [vmem:[#allocation6 + $0xc8] sm:$0xff] %vm1070_vm1, %v5838_v15  ;;  %v2181_v60 = vmul.f32 1.442695, %v2133_v27 }
 0x43a   : > { %2839 = vperm.xlu1 %4310, %v5841_v39  }
 0x43b   : > { %4341 = vpow2.f32 %v2181_v60 }
 0x43c   : > { %2285 = vperm.xlu0 %4309, %v5723_v37   ;;  %v2069_v25 = vpop.xlane.xlu0 %2068  ;;  %v2135_v37 = vsub.f32 %v5753_v40, %v5758_v53 }
 0x43d   : > { %v5859_v63 = vmax.f32 %v5851_v52, %v2069_v25  ;;  %v5874_v25 = vpop.eup %4337 }
 0x43e   : > { %v2072_v35 = vpop.xlane.xlu1 %2071  ;;  %2290 = vperm.xlu1 %4310, %v5730_v50   ;;  %6716 = vst [vmem:[#allocation79_spill] sm:$0xff] %v5874_v25  ;;  %v2185_v50 = vmul.f32 1.442695, %v2135_v37  ;;  %v5892_v27 = vpop.eup %4339  ;;  %v2137_v37 = vsub.f32 %v5773_v38, %v5781_v58  ;;  %v2139_v38 = vsub.f32 %v5793_v46, %v5802_v59 }
 0x43f   : > { %3297 = vst.msk [vmem:[#allocation6 + $0xd0] sm:$0xff] %vm1070_vm1, %v5859_v63  ;;  %v5871_v31 = vmax.f32 %v5856_v45, %v2072_v35  ;;  %v2183_v35 = vmul.f32 1.442695, %v2134_v17  ;;  %v6743_v17 = vld [vmem:[#allocation34_spill] sm:$0xff] }
 0x440   : > { %2844 = vperm.xlu0 %4309, %v5862_v54   ;;  %v5886_v54 = vld [vmem:[#allocation6 + $0xe8] sm:$0xff] }
 0x441   : > { %3298 = vst.msk [vmem:[#allocation6 + $0xd8] sm:$0xff] %vm1070_vm1, %v5871_v31  ;;  %4343 = vpow2.f32 %v2183_v35 }
 0x442   : > { %2849 = vperm.xlu1 %4310, %v5874_v25   ;;  %v2136_v25 = vsub.f32 %v5755_v32, %v5766_v42  ;;  %4345 = vpow2.f32 %v2185_v50  ;;  %v2138_v50 = vsub.f32 %v5778_v30, %v5786_v44 }
 0x444   : > { %2295 = vperm.xlu0 %4309, %v5741_v34   ;;  %v2075_v43 = vpop.xlane.xlu0 %2074  ;;  %v2187_v32 = vmul.f32 1.442695, %v2136_v25  ;;  %v2193_v25 = vmul.f32 1.442695, %v2139_v38 }
 0x445   : > { %v5889_v40 = vmax.f32 %v5883_v36, %v2075_v43  ;;  %v5912_v60 = vpop.eup %4341 }
 0x446   : > { %v2078_v22 = vpop.xlane.xlu1 %2077  ;;  %2300 = vperm.xlu1 %4310, %v5749_v47   ;;  %4347 = vpow2.f32 %v2187_v32 }
 0x447   : > { %6718 = vst [vmem:[#allocation81_spill] sm:$0xff] %v5889_v40  ;;  %3299 = vst.msk [vmem:[#allocation6 + $0xe0] sm:$0xff] %vm1070_vm1, %v5889_v40  ;;  %v5901_v34 = vmax.f32 %v5886_v54, %v2078_v22  ;;  %v2189_v22 = vmul.f32 1.442695, %v2137_v37 }
 0x448   : > { %2854 = vperm.xlu0 %4309, %v5892_v27  }
 0x449   : > { %3300 = vst.msk [vmem:[#allocation6 + $0xe8] sm:$0xff] %vm1070_vm1, %v5901_v34  ;;  %4349 = vpow2.f32 %v2189_v22 }
 0x44a   : > { %2310 = vperm.xlu1 %4310, %v5766_v42   ;;  %v2191_v42 = vmul.f32 1.442695, %v2138_v50 }
 0x44b   : > { %v5920_v43 = vpop.eup %4343 }
 0x44c   : > { %2305 = vperm.xlu0 %4309, %v5758_v53   ;;  %v5923_v53 = vpop.eup %4345  ;;  %4351 = vpow2.f32 %v2191_v42 }
 0x44d   : > { %4353 = vpow2.f32 %v2193_v25  ;;  %v6720_v25 = vsub.f32 %v5662_v5, %v5667_v55 }
 0x44e   : > { %2904 = vperm.xlu1 %4310, %v5912_v60  }
 0x450   : > { %2315 = vperm.xlu0 %4309, %v5781_v58   ;;  %v5930_v37 = vpop.eup %4347 }
 0x452   : > { %2909 = vperm.xlu1 %4310, %v5920_v43  }
 0x454   : > { %2914 = vperm.xlu0 %4309, %v5923_v53  }
 0x456   : > { %v2216_v35 = vpop.permute.xlu1 %2215  ;;  %2320 = vperm.xlu1 %4310, %v5786_v44   ;;  %v5935_v44 = vpop.eup %4349 }
 0x457   : > { %v2373_v30 = vsub.f32 %v5259_v0, %v2216_v35  ;;  %v2374_v46 = vsub.f32 %v5261_v1, %v2216_v35  ;;  %v6719_v0 = vsub.f32 %v5644_v16, %v5654_v10  ;;  %v2141_v35 = vsub.f32 %v5821_v3, %v5830_v11  ;;  %v5952_v55 = vpop.eup %4351 }
 0x458   : > { %2325 = vperm.xlu0 %4309, %v5802_v59   ;;  %v2221_v58 = vpop.permute.xlu0 %2220 }
 0x459   : > { %v2437_v32 = vmul.f32 1.442695, %v2373_v30  ;;  %v2439_v22 = vmul.f32 1.442695, %v2374_v46  ;;  %v2375_v50 = vsub.f32 %v5263_v2, %v2221_v58  ;;  %v2376_v38 = vsub.f32 %v5267_v4, %v2221_v58  ;;  %v5954_v58 = vpop.eup %4353 }
 0x45a   : > { %2919 = vperm.xlu1 %4310, %v5930_v37   ;;  %v2163_v1 = vmul.f32 1.442695, %v6719_v0  ;;  %v2165_v2 = vmul.f32 1.442695, %v6720_v25  ;;  %v2140_v4 = vsub.f32 %v5799_v41, %v5810_v29  ;;  %v2197_v3 = vmul.f32 1.442695, %v2141_v35 }
 0x45b   : > { %4355 = vpow2.f32 %v2437_v32  ;;  %v2441_v42 = vmul.f32 1.442695, %v2375_v50  ;;  %v2443_v59 = vmul.f32 1.442695, %v2376_v38 }
 0x45c   : > { %4357 = vpow2.f32 %v2439_v22  ;;  %2924 = vperm.xlu0 %4309, %v5935_v44   ;;  %v2195_v5 = vmul.f32 1.442695, %v2140_v4 }
 0x45d   : > { %4359 = vpow2.f32 %v2441_v42 }
 0x45e   : > { %4361 = vpow2.f32 %v2443_v59  ;;  %2330 = vperm.xlu1 %4310, %v5810_v29   ;;  %v2226_v10 = vpop.permute.xlu0 %2225 }
 0x45f   : > { %4363 = vpow2.f32 %v2163_v1  ;;  %v2377_v16 = vsub.f32 %v5271_v6, %v2226_v10  ;;  %v2378_v30 = vsub.f32 %v5273_v7, %v2226_v10 }
 0x460   : > { %2335 = vperm.xlu0 %4309, %v5830_v11   ;;  %4365 = vpow2.f32 %v2165_v2 }
 0x461   : > { %v2445_v41 = vmul.f32 1.442695, %v2377_v16  ;;  %v2447_v46 = vmul.f32 1.442695, %v2378_v30 }
 0x462   : > { %v2231_v32 = vpop.permute.xlu1 %2230  ;;  %2929 = vperm.xlu1 %4310, %v5952_v55  }
 0x463   : > { %4367 = vpow2.f32 %v2445_v41  ;;  %v2379_v29 = vsub.f32 %v5275_v8, %v2231_v32  ;;  %v2380_v6 = vsub.f32 %v5279_v18, %v2231_v32 }
 0x464   : > { %4369 = vpow2.f32 %v2447_v46  ;;  %2934 = vperm.xlu0 %4309, %v5954_v58  }
 0x465   : > { %v4356_v7 = vpop.eup %4355  ;;  %4371 = vpow2.f32 %v2195_v5  ;;  %v2449_v11 = vmul.f32 1.442695, %v2379_v29  ;;  %v2451_v22 = vmul.f32 1.442695, %v2380_v6  ;;  %v6721_v5 = vsub.f32 %v5664_v62, %v5674_v61 }
 0x466   : > { %v4358_v50 = vpop.eup %4357  ;;  %4373 = vpow2.f32 %v2197_v3  ;;  %2340 = vperm.xlu1 %4310, %v5838_v15   ;;  %v2236_v38 = vpop.permute.xlu0 %2235 }
 0x467   : > { %v4360_v0 = vpop.eup %4359  ;;  %4375 = vpow2.f32 %v2449_v11  ;;  %v2381_v1 = vsub.f32 %v5283_v9, %v2236_v38  ;;  %v2382_v8 = vsub.f32 %v5285_v19, %v2236_v38  ;;  %v5963_v42 = vadd.f32 %v4358_v50, %v4356_v7 }
 0x468   : > { %v4362_v18 = vpop.eup %4361  ;;  %4377 = vpow2.f32 %v2451_v22  ;;  %v2241_v59 = vpop.permute.xlu1 %2240  ;;  %2345 = vperm.xlu0 %4309, %v5859_v63   ;;  %v3014_v25 = vpack.c.bf16 %v4360_v0, %v4356_v7  ;;  %v2167_v41 = vmul.f32 1.442695, %v6721_v5 }
 0x469   : > { %v5966_v2 = vpop.eup %4363  ;;  %v2453_v4 = vmul.f32 1.442695, %v2381_v1  ;;  %v2455_v35 = vmul.f32 1.442695, %v2382_v8  ;;  %v2383_v10 = vsub.f32 %v5287_v20, %v2241_v59  ;;  %v2384_v16 = vsub.f32 %v5291_v23, %v2241_v59 }
 0x46a   : > { %2859 = vperm.xlu1 %4310, %v5966_v2   ;;  %v3015_v9 = vpack.c.bf16 %v4362_v18, %v4358_v50  ;;  %v5971_v19 = vadd.f32 %v4362_v18, %v4360_v0  ;;  %v5973_v30 = vpop.eup %4365 }
 0x46b   : > { %4379 = vpow2.f32 %v2453_v4  ;;  %v2457_v46 = vmul.f32 1.442695, %v2383_v10  ;;  %v2459_v3 = vmul.f32 1.442695, %v2384_v16 }
 0x46c   : > { %4381 = vpow2.f32 %v2455_v35  ;;  %3078 = vmatprep.mubr.bf16.mxu1 %v3015_v9  ;;  %2864 = vperm.xlu0 %4309, %v5973_v30  }
 0x46d   : > { %v4368_v20 = vpop.eup %4367  ;;  %4383 = vpow2.f32 %v2457_v46  ;;  %3079 = vmatmul.mubr.bf16.vlgmr.msra.gmra.mrb[40].mxu1 %v3014_v25 }
 0x46e   : > { %v4370_v23 = vpop.eup %4369  ;;  %4385 = vpow2.f32 %v2459_v3  ;;  %2350 = vperm.xlu1 %4310, %v5871_v31   ;;  %v2246_v32 = vpop.permute.xlu0 %2245 }
 0x46f   : > { %v5980_v29 = vpop.eup %4371  ;;  %4387 = vpow2.f32 %v2167_v41  ;;  %v2385_v61 = vsub.f32 %v5295_v12, %v2246_v32  ;;  %v2386_v62 = vsub.f32 %v5297_v13, %v2246_v32  ;;  %v5984_v6 = vadd.f32 %v4370_v23, %v4368_v20 }
 0x470   : > { %v5986_v7 = vpop.eup %4373  ;;  %v2251_v11 = vpop.permute.xlu1 %2250  ;;  %2355 = vperm.xlu0 %4309, %v5889_v40  }
 0x471   : > { %6722 = vst [vmem:[#allocation82_spill] sm:$0xff] %v5986_v7  ;;  %v4376_v22 = vpop.eup %4375  ;;  %v2461_v50 = vmul.f32 1.442695, %v2385_v61  ;;  %v2463_v38 = vmul.f32 1.442695, %v2386_v62  ;;  %v2387_v0 = vsub.f32 %v5299_v48, %v2251_v11  ;;  %v2388_v1 = vsub.f32 %v5303_v14, %v2251_v11 }
 0x472   : > { %v4378_v8 = vpop.eup %4377  ;;  %2939 = vperm.xlu1 %4310, %v5980_v29   ;;  %v3016_v12 = vpack.c.bf16 %v4376_v22, %v4368_v20 }
 0x473   : > { %4389 = vpow2.f32 %v2461_v50  ;;  %v2465_v13 = vmul.f32 1.442695, %v2387_v0  ;;  %v2467_v18 = vmul.f32 1.442695, %v2388_v1  ;;  %v3017_v59 = vpack.c.bf16 %v4378_v8, %v4370_v23 }
 0x474   : > { %4391 = vpow2.f32 %v2463_v38  ;;  %2944 = vperm.xlu0 %4309, %v5986_v7   ;;  %v5993_v25 = vadd.f32 %v4378_v8, %v4376_v22 }
 0x475   : > { %v4380_v4 = vpop.eup %4379  ;;  %4393 = vpow2.f32 %v2465_v13  ;;  %3086 = vmatprep.mubr.bf16.mxu1 %v3017_v59 }
 0x476   : > { %v4382_v35 = vpop.eup %4381  ;;  %4395 = vpow2.f32 %v2467_v18  ;;  %3087 = vmatmul.mubr.bf16.gmra.mrb[44].mxu1 %v3016_v12  ;;  %2360 = vperm.xlu1 %4310, %v5901_v34   ;;  %v2256_v48 = vpop.permute.xlu0 %2255 }
 0x477   : > { %v4384_v14 = vpop.eup %4383  ;;  %v2389_v10 = vsub.f32 %v5438_v21, %v2256_v48  ;;  %v2390_v16 = vsub.f32 %v5440_v24, %v2256_v48  ;;  %v5998_v9 = vadd.f32 %v4382_v35, %v4380_v4 }
 0x478   : > { %v4386_v5 = vpop.eup %4385  ;;  %v2261_v41 = vpop.permute.xlu1 %2260  ;;  %v3018_v46 = vpack.c.bf16 %v4384_v14, %v4380_v4 }
 0x479   : > { %v6000_v3 = vpop.eup %4387  ;;  %v2469_v20 = vmul.f32 1.442695, %v2389_v10  ;;  %v2471_v23 = vmul.f32 1.442695, %v2390_v16  ;;  %v2391_v32 = vsub.f32 %v5442_v26, %v2261_v41  ;;  %v2392_v61 = vsub.f32 %v5446_v28, %v2261_v41 }
 0x47a   : > { %2869 = vperm.xlu1 %4310, %v6000_v3   ;;  %v3019_v62 = vpack.c.bf16 %v4386_v5, %v4382_v35  ;;  %v6005_v11 = vadd.f32 %v4386_v5, %v4384_v14  ;;  %v6723_v10 = vsub.f32 %v5682_v56, %v5687_v51  ;;  %v6018_v5 = vld [vmem:[#allocation6 + $0xf0] sm:$0xff]  ;;  %v6725_v41 = vsub.f32 %v5827_v49, %v5838_v15  ;;  %v6034_v56 = vld [vmem:[#allocation6 + $0xf8] sm:$0xff] }
 0x47b   : > { %4397 = vpow2.f32 %v2469_v20  ;;  %v2473_v21 = vmul.f32 1.442695, %v2391_v32  ;;  %v2475_v24 = vmul.f32 1.442695, %v2392_v61  ;;  %6724 = vst [vmem:[#allocation83_spill] sm:$0xff] %v6018_v5  ;;  %v6727_v32 = vld [vmem:[#allocation67_spill] sm:$0xff] }
 0x47c   : > { %4399 = vpow2.f32 %v2471_v23  ;;  %3094 = vmatprep.mubr.bf16.mxu1 %v3019_v62  ;;  %v2169_v16 = vmul.f32 1.442695, %v6723_v10  ;;  %v6728_v61 = vsub.f32 %v6727_v32, %v5694_v57  ;;  %6729 = vst [vmem:[#allocation67_spill] sm:$0xff] %v6034_v56 }
 0x47d   : > { %v4390_v22 = vpop.eup %4389  ;;  %4401 = vpow2.f32 %v2473_v21 }
 0x47e   : > { %v4392_v50 = vpop.eup %4391  ;;  %4403 = vpow2.f32 %v2475_v24  ;;  %3095 = vmatmul.mubr.bf16.gmra.mrb[48].mxu1 %v3018_v46  ;;  %v2199_v46 = vmul.f32 1.442695, %v6725_v41  ;;  %v2171_v62 = vmul.f32 1.442695, %v6728_v61  ;;  %v6731_v24 = vld [vmem:[#allocation23_spill] sm:$0xff] }
 0x47f   : > { %v4394_v38 = vpop.eup %4393  ;;  %v6007_v0 = vadd.f32 %v4392_v50, %v4390_v22  ;;  %4405 = vpow2.f32 %v2169_v16  ;;  %v6736_v61 = vld [vmem:[#allocation27_spill] sm:$0xff] }
 0x480   : > { %v4396_v26 = vpop.eup %4395  ;;  %v3020_v28 = vpack.c.bf16 %v4394_v38, %v4390_v22  ;;  %4407 = vpow2.f32 %v2199_v46 }
 0x481   : > { %v3021_v1 = vpack.c.bf16 %v4396_v26, %v4392_v50  ;;  %v6009_v8 = vadd.f32 %v4396_v26, %v4394_v38  ;;  %4409 = vpow2.f32 %v2171_v62  ;;  %v6732_v50 = vld [vmem:[#allocation24_spill] sm:$0xff] }
 0x483   : > { %3102 = vmatprep.mubr.bf16.mxu1 %v3021_v1 }
 0x485   : > { %v4398_v12 = vpop.eup %4397 }
 0x486   : > { %v4400_v13 = vpop.eup %4399  ;;  %3103 = vmatmul.mubr.bf16.gmra.mrb[52].mxu1 %v3020_v28 }
 0x487   : > { %v4402_v18 = vpop.eup %4401  ;;  %v6011_v59 = vadd.f32 %v4400_v13, %v4398_v12 }
 0x488   : > { %v4404_v4 = vpop.eup %4403  ;;  %v3022_v35 = vpack.c.bf16 %v4402_v18, %v4398_v12 }
 0x489   : > { %v3023_v48 = vpack.c.bf16 %v4404_v4, %v4400_v13  ;;  %v6013_v14 = vadd.f32 %v4404_v4, %v4402_v18  ;;  %v6036_v49 = vpop.eup %4405  ;;  %v6733_v13 = vld [vmem:[#allocation25_spill] sm:$0xff]  ;;  %v6734_v4 = vld [vmem:[#allocation26_spill] sm:$0xff] }
 0x48a   : > { %v6053_v10 = vpop.eup %4407 }
 0x48b   : > { %3110 = vmatprep.mubr.bf16.mxu1 %v3023_v48  ;;  %6735 = vst [vmem:[#allocation23_spill] sm:$0xff] %v6053_v10  ;;  %v6058_v32 = vpop.eup %4409 }
 0x48e   : > { %3111 = vmatmul.mubr.bf16.gmra.mrb[56].mxu1 %v3022_v35 }
 0x4a3   : > { %v2081_v20 = vpop.xlane.xlu0 %2080 }
 0x4a4   : > { %v6024_v23 = vmax.f32 %v6018_v5, %v2081_v20  ;;  %v6747_v5 = vld [vmem:[#allocation38_spill] sm:$0xff] }
 0x4a6   : > { %6726 = vst [vmem:[#allocation84_spill] sm:$0xff] %v6024_v23  ;;  %3301 = vst.msk [vmem:[#allocation6 + $0xf0] sm:$0xff] %vm1070_vm1, %v6024_v23  ;;  %2365 = vperm.xlu0 %4309, %v6024_v23  }
 0x4aa   : > { %v2084_v15 = vpop.xlane.xlu1 %2083  ;;  %2874 = vperm.xlu0 %4309, %v6036_v49  }
 0x4ab   : > { %v6040_v57 = vmax.f32 %v6034_v56, %v2084_v15  ;;  %v2266_v21 = vpop.permute.xlu0 %2265  ;;  %v6737_v15 = vld [vmem:[#allocation28_spill] sm:$0xff] }
 0x4ac   : > { %v2393_v22 = vsub.f32 %v6731_v24, %v2266_v21  ;;  %v2394_v38 = vsub.f32 %v6732_v50, %v2266_v21 }
 0x4ad   : > { %6730 = vst [vmem:[#allocation85_spill] sm:$0xff] %v6040_v57  ;;  %3302 = vst.msk [vmem:[#allocation6 + $0xf8] sm:$0xff] %vm1070_vm1, %v6040_v57  ;;  %2370 = vperm.xlu1 %4310, %v6040_v57  }
 0x4ae   : > { %v2477_v28 = vmul.f32 1.442695, %v2393_v22  ;;  %v2479_v1 = vmul.f32 1.442695, %v2394_v38  ;;  %v2271_v12 = vpop.permute.xlu1 %2270  ;;  %v6738_v38 = vld [vmem:[#allocation29_spill] sm:$0xff] }
 0x4af   : > { %v2395_v18 = vsub.f32 %v6733_v13, %v2271_v12  ;;  %v2396_v35 = vsub.f32 %v6734_v4, %v2271_v12  ;;  %v6051_v48 = vpop.permute.xlu0 %2829  ;;  %v6739_v12 = vld [vmem:[#allocation30_spill] sm:$0xff] }
 0x4b0   : > { %4411 = vpow2.f32 %v2477_v28 }
 0x4b1   : > { %v2481_v16 = vmul.f32 1.442695, %v2395_v18  ;;  %v2483_v41 = vmul.f32 1.442695, %v2396_v35  ;;  %2949 = vperm.xlu1 %4310, %v6053_v10   ;;  %4413 = vpow2.f32 %v2479_v1 }
 0x4b2   : > { %v6056_v46 = vpop.permute.xlu1 %2824 }
 0x4b3   : > { %4415 = vpow2.f32 %v2481_v16  ;;  %v2276_v20 = vpop.permute.xlu0 %2275 }
 0x4b4   : > { %4417 = vpow2.f32 %v2483_v41  ;;  %v2397_v62 = vsub.f32 %v6736_v61, %v2276_v20  ;;  %v2398_v21 = vsub.f32 %v6737_v15, %v2276_v20  ;;  %v6740_v61 = vld [vmem:[#allocation31_spill] sm:$0xff]  ;;  %v6741_v15 = vld [vmem:[#allocation32_spill] sm:$0xff] }
 0x4b5   : > { %2879 = vperm.xlu1 %4310, %v6058_v32  }
 0x4b6   : > { %v2485_v24 = vmul.f32 1.442695, %v2397_v62  ;;  %v2487_v22 = vmul.f32 1.442695, %v2398_v21  ;;  %v2281_v50 = vpop.permute.xlu1 %2280 }
 0x4b7   : > { %v2399_v28 = vsub.f32 %v6738_v38, %v2281_v50  ;;  %v2400_v1 = vsub.f32 %v6739_v12, %v2281_v50  ;;  %v6065_v13 = vpop.permute.xlu0 %2834 }
 0x4b8   : > { %4419 = vpow2.f32 %v2485_v24 }
 0x4b9   : > { %4421 = vpow2.f32 %v2487_v22  ;;  %v2489_v18 = vmul.f32 1.442695, %v2399_v28  ;;  %v2491_v4 = vmul.f32 1.442695, %v2400_v1  ;;  %v6742_v1 = vld [vmem:[#allocation33_spill] sm:$0xff] }
 0x4ba   : > { %v4412_v35 = vpop.eup %4411  ;;  %v6067_v16 = vpop.permute.xlu1 %2839 }
 0x4bb   : > { %4423 = vpow2.f32 %v2489_v18  ;;  %v2286_v41 = vpop.permute.xlu0 %2285  ;;  %v4414_v20 = vpop.eup %4413 }
 0x4bc   : > { %4425 = vpow2.f32 %v2491_v4  ;;  %v2401_v62 = vsub.f32 %v6740_v61, %v2286_v41  ;;  %v2402_v21 = vsub.f32 %v6741_v15, %v2286_v41  ;;  %v6071_v51 = vadd.f32 %v4414_v20, %v4412_v35 }
 0x4bd   : > { %v4416_v38 = vpop.eup %4415 }
 0x4be   : > { %v4418_v50 = vpop.eup %4417  ;;  %v2493_v12 = vmul.f32 1.442695, %v2401_v62  ;;  %v2495_v24 = vmul.f32 1.442695, %v2402_v21  ;;  %v2291_v22 = vpop.permute.xlu1 %2290  ;;  %v3024_v28 = vpack.c.bf16 %v4416_v38, %v4412_v35 }
 0x4bf   : > { %v2403_v26 = vsub.f32 %v6742_v1, %v2291_v22  ;;  %v2404_v47 = vsub.f32 %v6743_v17, %v2291_v22  ;;  %v6075_v18 = vpop.permute.xlu0 %2844  ;;  %v3025_v7 = vpack.c.bf16 %v4418_v50, %v4414_v20  ;;  %v6077_v4 = vadd.f32 %v4418_v50, %v4416_v38  ;;  %v6744_v1 = vld [vmem:[#allocation35_spill] sm:$0xff]  ;;  %v6745_v22 = vld [vmem:[#allocation36_spill] sm:$0xff] }
 0x4c0   : > { %4427 = vpow2.f32 %v2493_v12 }
 0x4c1   : > { %4429 = vpow2.f32 %v2495_v24  ;;  %v2497_v41 = vmul.f32 1.442695, %v2403_v26  ;;  %v2499_v61 = vmul.f32 1.442695, %v2404_v47  ;;  %3118 = vmatprep.mubr.bf16.mxu1 %v3025_v7  ;;  %v6746_v24 = vld [vmem:[#allocation37_spill] sm:$0xff] }
 0x4c2   : > { %v4420_v15 = vpop.eup %4419  ;;  %3119 = vmatmul.mubr.bf16.gmra.mrb[60].mxu1 %v3024_v28  ;;  %v6079_v62 = vpop.permute.xlu1 %2849 }
 0x4c3   : > { %v4422_v21 = vpop.eup %4421  ;;  %4431 = vpow2.f32 %v2497_v41  ;;  %v2296_v35 = vpop.permute.xlu0 %2295 }
 0x4c4   : > { %4433 = vpow2.f32 %v2499_v61  ;;  %v2405_v17 = vsub.f32 %v6744_v1, %v2296_v35  ;;  %v2406_v23 = vsub.f32 %v6745_v22, %v2296_v35  ;;  %v6083_v20 = vadd.f32 %v4422_v21, %v4420_v15  ;;  %v6748_v22 = vld [vmem:[#allocation41_spill] sm:$0xff] }
 0x4c5   : > { %v4424_v38 = vpop.eup %4423 }
 0x4c6   : > { %v4426_v50 = vpop.eup %4425  ;;  %v2501_v12 = vmul.f32 1.442695, %v2405_v17  ;;  %v2503_v26 = vmul.f32 1.442695, %v2406_v23  ;;  %v2301_v47 = vpop.permute.xlu1 %2300  ;;  %v3026_v7 = vpack.c.bf16 %v4424_v38, %v4420_v15 }
 0x4c7   : > { %v2407_v28 = vsub.f32 %v6746_v24, %v2301_v47  ;;  %v2408_v10 = vsub.f32 %v6747_v5, %v2301_v47  ;;  %v6087_v57 = vpop.permute.xlu0 %2854  ;;  %v3027_v41 = vpack.c.bf16 %v4426_v50, %v4422_v21  ;;  %v6089_v61 = vadd.f32 %v4426_v50, %v4424_v38  ;;  %v6749_v5 = vld [vmem:[#allocation42_spill] sm:$0xff]  ;;  %v6750_v21 = vld [vmem:[#allocation39_spill] sm:$0xff]  ;;  %v6751_v50 = vld [vmem:[#allocation40_spill] sm:$0xff] }
 0x4c8   : > { %4435 = vpow2.f32 %v2501_v12 }
 0x4c9   : > { %4437 = vpow2.f32 %v2503_v26  ;;  %v2505_v35 = vmul.f32 1.442695, %v2407_v28  ;;  %v2507_v1 = vmul.f32 1.442695, %v2408_v10  ;;  %3126 = vmatprep.mubr.bf16.mxu1 %v3027_v41  ;;  %2630 = vadd.xlane.f32.xlu0 %v5963_v42 }
 0x4ca   : > { %v4428_v17 = vpop.eup %4427  ;;  %3127 = vmatmul.mubr.bf16.gmra.mrb[64].mxu1 %v3026_v7  ;;  %v2311_v23 = vpop.permute.xlu1 %2310 }
 0x4cb   : > { %v4430_v15 = vpop.eup %4429  ;;  %4439 = vpow2.f32 %v2505_v35  ;;  %v2411_v24 = vsub.f32 %v6748_v22, %v2311_v23  ;;  %v2412_v47 = vsub.f32 %v6749_v5, %v2311_v23  ;;  %v2306_v56 = vpop.permute.xlu0 %2305 }
 0x4cc   : > { %4441 = vpow2.f32 %v2507_v1  ;;  %v2409_v38 = vsub.f32 %v6750_v21, %v2306_v56  ;;  %v2410_v12 = vsub.f32 %v6751_v50, %v2306_v56  ;;  %v6096_v26 = vadd.f32 %v4430_v15, %v4428_v17  ;;  %v6753_v56 = vld [vmem:[#allocation43_spill] sm:$0xff]  ;;  %v6754_v50 = vld [vmem:[#allocation44_spill] sm:$0xff] }
 0x4cd   : > { %v4432_v10 = vpop.eup %4431  ;;  %v2513_v28 = vmul.f32 1.442695, %v2411_v24  ;;  %v2515_v42 = vmul.f32 1.442695, %v2412_v47  ;;  %2639 = vadd.xlane.f32.xlu0 %v5993_v25 }
 0x4ce   : > { %v4434_v7 = vpop.eup %4433  ;;  %v2509_v41 = vmul.f32 1.442695, %v2409_v38  ;;  %v2511_v35 = vmul.f32 1.442695, %v2410_v12  ;;  %v6099_v40 = vpop.permute.xlu1 %2904  ;;  %v3028_v22 = vpack.c.bf16 %v4432_v10, %v4428_v17 }
 0x4cf   : > { %6752 = vst [vmem:[#allocation24_spill] sm:$0xff] %v6099_v40  ;;  %4443 = vpow2.f32 %v2513_v28  ;;  %v2316_v23 = vpop.permute.xlu0 %2315  ;;  %v3029_v1 = vpack.c.bf16 %v4434_v7, %v4430_v15  ;;  %v6101_v5 = vadd.f32 %v4434_v7, %v4432_v10  ;;  %v6757_v7 = vld [vmem:[#allocation45_spill] sm:$0xff] }
 0x4d0   : > { %4445 = vpow2.f32 %v2515_v42  ;;  %v2413_v21 = vsub.f32 %v6753_v56, %v2316_v23  ;;  %v2414_v36 = vsub.f32 %v6754_v50, %v2316_v23  ;;  %v6759_v56 = vld [vmem:[#allocation47_spill] sm:$0xff]  ;;  %v6760_v50 = vld [vmem:[#allocation48_spill] sm:$0xff] }
 0x4d1   : > { %4447 = vpow2.f32 %v2509_v41  ;;  %3134 = vmatprep.mubr.bf16.mxu1 %v3029_v1  ;;  %2645 = vadd.xlane.f32.xlu0 %v6005_v11 }
 0x4d2   : > { %v4436_v25 = vpop.eup %4435  ;;  %4449 = vpow2.f32 %v2511_v35  ;;  %v2517_v24 = vmul.f32 1.442695, %v2413_v21  ;;  %v2519_v47 = vmul.f32 1.442695, %v2414_v36  ;;  %3135 = vmatmul.mubr.bf16.gmra.mrb[68].mxu1 %v3028_v22  ;;  %v6106_v17 = vpop.permute.xlu1 %2909  ;;  %v6758_v35 = vld [vmem:[#allocation46_spill] sm:$0xff] }
 0x4d3   : > { %6755 = vst [vmem:[#allocation25_spill] sm:$0xff] %v6106_v17  ;;  %v4438_v38 = vpop.eup %4437  ;;  %v6108_v15 = vpop.permute.xlu0 %2914 }
 0x4d4   : > { %6756 = vst [vmem:[#allocation26_spill] sm:$0xff] %v6108_v15  ;;  %4451 = vpow2.f32 %v2517_v24  ;;  %v6110_v12 = vadd.f32 %v4438_v38, %v4436_v25 }
 0x4d5   : > { %v4440_v10 = vpop.eup %4439  ;;  %4453 = vpow2.f32 %v2519_v47  ;;  %2651 = vadd.xlane.f32.xlu0 %v6009_v8 }
 0x4d6   : > { %v4442_v28 = vpop.eup %4441  ;;  %v2321_v42 = vpop.permute.xlu1 %2320  ;;  %v3030_v11 = vpack.c.bf16 %v4440_v10, %v4436_v25 }
 0x4d7   : > { %v2415_v41 = vsub.f32 %v6757_v7, %v2321_v42  ;;  %v2416_v36 = vsub.f32 %v6758_v35, %v2321_v42  ;;  %v2326_v22 = vpop.permute.xlu0 %2325  ;;  %v3031_v23 = vpack.c.bf16 %v4442_v28, %v4438_v38  ;;  %v6115_v1 = vadd.f32 %v4442_v28, %v4440_v10 }
 0x4d8   : > { %v2417_v21 = vsub.f32 %v6759_v56, %v2326_v22  ;;  %v2418_v24 = vsub.f32 %v6760_v50, %v2326_v22  ;;  %v6763_v50 = vld [vmem:[#allocation51_spill] sm:$0xff] }
 0x4d9   : > { %v4444_v15 = vpop.eup %4443  ;;  %v2521_v17 = vmul.f32 1.442695, %v2415_v41  ;;  %v2523_v47 = vmul.f32 1.442695, %v2416_v36  ;;  %3142 = vmatprep.mubr.bf16.mxu1 %v3031_v23  ;;  %2633 = vadd.xlane.f32.xlu1 %v5971_v19  ;;  %v6762_v23 = vld [vmem:[#allocation50_spill] sm:$0xff] }
 0x4da   : > { %v4446_v8 = vpop.eup %4445  ;;  %v2525_v25 = vmul.f32 1.442695, %v2417_v21  ;;  %v2527_v40 = vmul.f32 1.442695, %v2418_v24  ;;  %2657 = vadd.xlane.f32.xlu0 %v6013_v14  ;;  %3143 = vmatmul.mubr.bf16.gmra.mrb[72].mxu1 %v3030_v11  ;;  %v6121_v42 = vpop.permute.xlu1 %2919  ;;  %v6764_v24 = vld [vmem:[#allocation52_spill] sm:$0xff] }
 0x4db   : > { %v4448_v38 = vpop.eup %4447  ;;  %4455 = vpow2.f32 %v2521_v17  ;;  %v6123_v10 = vpop.permute.xlu0 %2924  ;;  %v6125_v28 = vadd.f32 %v4446_v8, %v4444_v15  ;;  %v6761_v17 = vld [vmem:[#allocation49_spill] sm:$0xff] }
 0x4dc   : > { %v4450_v7 = vpop.eup %4449  ;;  %4457 = vpow2.f32 %v2523_v47  ;;  %v3032_v41 = vpack.c.bf16 %v4444_v15, %v4448_v38 }
 0x4dd   : > { %4459 = vpow2.f32 %v2525_v25  ;;  %2636 = vadd.xlane.f32.xlu1 %v5984_v6  ;;  %v3033_v19 = vpack.c.bf16 %v4446_v8, %v4450_v7  ;;  %v6128_v35 = vadd.f32 %v4450_v7, %v4448_v38 }
 0x4de   : > { %v4452_v36 = vpop.eup %4451  ;;  %4461 = vpow2.f32 %v2527_v40  ;;  %2663 = vadd.xlane.f32.xlu0 %v6077_v4  ;;  %v2331_v14 = vpop.permute.xlu1 %2330 }
 0x4df   : > { %v4454_v11 = vpop.eup %4453  ;;  %3150 = vmatprep.mubr.bf16.mxu1 %v3033_v19  ;;  %v2419_v22 = vsub.f32 %v6761_v17, %v2331_v14  ;;  %v2420_v56 = vsub.f32 %v6762_v23, %v2331_v14  ;;  %v2336_v21 = vpop.permute.xlu0 %2335  ;;  %v6766_v23 = vld [vmem:[#allocation53_spill] sm:$0xff] }
 0x4e0   : > { %v2421_v15 = vsub.f32 %v6763_v50, %v2336_v21  ;;  %v2422_v47 = vsub.f32 %v6764_v24, %v2336_v21  ;;  %v6135_v6 = vadd.f32 %v4454_v11, %v4452_v36 }
 0x4e1   : > { %v2529_v8 = vmul.f32 1.442695, %v2419_v22  ;;  %v2531_v25 = vmul.f32 1.442695, %v2420_v56  ;;  %2642 = vadd.xlane.f32.xlu1 %v5998_v9 }
 0x4e2   : > { %v2533_v40 = vmul.f32 1.442695, %v2421_v15  ;;  %v2535_v4 = vmul.f32 1.442695, %v2422_v47  ;;  %2669 = vadd.xlane.f32.xlu0 %v6089_v61  ;;  %3151 = vmatmul.mubr.bf16.gmra.mrb[76].mxu1 %v3032_v41  ;;  %v6139_v38 = vpop.permute.xlu1 %2929  ;;  %v6767_v41 = vld [vmem:[#allocation54_spill] sm:$0xff]  ;;  %v6768_v47 = vld [vmem:[#allocation55_spill] sm:$0xff] }
 0x4e3   : > { %4463 = vpow2.f32 %v2529_v8  ;;  %v6141_v7 = vpop.permute.xlu0 %2934 }
 0x4e4   : > { %6765 = vst [vmem:[#allocation27_spill] sm:$0xff] %v6141_v7  ;;  %4465 = vpow2.f32 %v2531_v25  ;;  %v6769_v25 = vld [vmem:[#allocation56_spill] sm:$0xff] }
 0x4e5   : > { %v4456_v19 = vpop.eup %4455  ;;  %4467 = vpow2.f32 %v2533_v40  ;;  %2648 = vadd.xlane.f32.xlu1 %v6007_v0 }
 0x4e6   : > { %v4458_v14 = vpop.eup %4457  ;;  %4469 = vpow2.f32 %v2535_v4  ;;  %2675 = vadd.xlane.f32.xlu0 %v6101_v5  ;;  %v2341_v9 = vpop.permute.xlu1 %2340  ;;  %v3034_v17 = vpack.c.bf16 %v4456_v19, %v4452_v36 }
 0x4e7   : > { %v4460_v22 = vpop.eup %4459  ;;  %v2423_v61 = vsub.f32 %v6766_v23, %v2341_v9  ;;  %v2424_v56 = vsub.f32 %v6767_v41, %v2341_v9  ;;  %v2346_v21 = vpop.permute.xlu0 %2345  ;;  %v3035_v50 = vpack.c.bf16 %v4458_v14, %v4454_v11  ;;  %v2692_v15 = vadd.f32 %v4458_v14, %v4456_v19  ;;  %v6770_v41 = vld [vmem:[#allocation57_spill] sm:$0xff] }
 0x4e8   : > { %v4462_v24 = vpop.eup %4461  ;;  %v2425_v8 = vsub.f32 %v6768_v47, %v2346_v21  ;;  %v2426_v40 = vsub.f32 %v6769_v25, %v2346_v21 }
 0x4e9   : > { %v2537_v0 = vmul.f32 1.442695, %v2423_v61  ;;  %v2539_v7 = vmul.f32 1.442695, %v2424_v56  ;;  %3158 = vmatprep.mubr.bf16.mxu1 %v3035_v50  ;;  %2654 = vadd.xlane.f32.xlu1 %v6011_v59  ;;  %v6150_v5 = vadd.f32 %v4462_v24, %v4460_v22 }
 0x4ea   : > { %v2541_v36 = vmul.f32 1.442695, %v2425_v8  ;;  %v2543_v4 = vmul.f32 1.442695, %v2426_v40  ;;  %2678 = vadd.xlane.f32.xlu0 %v6110_v12  ;;  %3159 = vmatmul.mubr.bf16.gmra.mrb[80].mxu1 %v3034_v17  ;;  %v6153_v9 = vpop.permute.xlu1 %2859  ;;  %v6771_v17 = vld [vmem:[#allocation58_spill] sm:$0xff]  ;;  %v6773_v40 = vld [vmem:[#allocation60_spill] sm:$0xff] }
 0x4eb   : > { %4471 = vpow2.f32 %v2537_v0  ;;  %v6155_v11 = vpop.permute.xlu0 %2864 }
 0x4ec   : > { %4473 = vpow2.f32 %v2539_v7  ;;  %v6772_v7 = vld [vmem:[#allocation59_spill] sm:$0xff] }
 0x4ed   : > { %v4464_v19 = vpop.eup %4463  ;;  %4475 = vpow2.f32 %v2541_v36  ;;  %2660 = vadd.xlane.f32.xlu1 %v6071_v51 }
 0x4ee   : > { %v4466_v14 = vpop.eup %4465  ;;  %4477 = vpow2.f32 %v2543_v4  ;;  %2681 = vadd.xlane.f32.xlu0 %v6115_v1  ;;  %v2351_v59 = vpop.permute.xlu1 %2350  ;;  %v3036_v23 = vpack.c.bf16 %v4464_v19, %v4460_v22 }
 0x4ef   : > { %v4468_v61 = vpop.eup %4467  ;;  %v2427_v12 = vsub.f32 %v6770_v41, %v2351_v59  ;;  %v2428_v56 = vsub.f32 %v6771_v17, %v2351_v59  ;;  %v2356_v21 = vpop.permute.xlu0 %2355  ;;  %v3037_v50 = vpack.c.bf16 %v4466_v14, %v4462_v24  ;;  %v2698_v47 = vadd.f32 %v4466_v14, %v4464_v19 }
 0x4f0   : > { %v4470_v8 = vpop.eup %4469  ;;  %v2429_v25 = vsub.f32 %v6772_v7, %v2356_v21  ;;  %v2430_v0 = vsub.f32 %v6773_v40, %v2356_v21 }
 0x4f1   : > { %v2545_v51 = vmul.f32 1.442695, %v2427_v12  ;;  %v2547_v36 = vmul.f32 1.442695, %v2428_v56  ;;  %3166 = vmatprep.mubr.bf16.mxu1 %v3037_v50  ;;  %2666 = vadd.xlane.f32.xlu1 %v6083_v20  ;;  %v6164_v1 = vadd.f32 %v4470_v8, %v4468_v61  ;;  %v6774_v12 = vld [vmem:[#allocation61_spill] sm:$0xff]  ;;  %v6775_v56 = vld [vmem:[#allocation62_spill] sm:$0xff] }
 0x4f2   : > { %v2549_v22 = vmul.f32 1.442695, %v2429_v25  ;;  %v2551_v4 = vmul.f32 1.442695, %v2430_v0  ;;  %2687 = vadd.xlane.f32.xlu0 %v6125_v28  ;;  %3167 = vmatmul.mubr.bf16.gmra.mrb[84].mxu1 %v3036_v23  ;;  %v6167_v59 = vpop.permute.xlu1 %2939 }
 0x4f3   : > { %4479 = vpow2.f32 %v2545_v51 }
 0x4f4   : > { %4481 = vpow2.f32 %v2547_v36 }
 0x4f5   : > { %v4472_v24 = vpop.eup %4471  ;;  %4483 = vpow2.f32 %v2549_v22  ;;  %2672 = vadd.xlane.f32.xlu1 %v6096_v26  ;;  %v6776_v22 = vsub.f32 %v5851_v52, %v5859_v63 }
 0x4f6   : > { %v4474_v19 = vpop.eup %4473  ;;  %4485 = vpow2.f32 %v2551_v4  ;;  %2693 = vadd.xlane.f32.xlu0 %v2692_v15  ;;  %v2361_v14 = vpop.permute.xlu1 %2360  ;;  %v3038_v20 = vpack.c.bf16 %v4472_v24, %v4468_v61 }
 0x4f7   : > { %v4476_v41 = vpop.eup %4475  ;;  %v2431_v17 = vsub.f32 %v6774_v12, %v2361_v14  ;;  %v2432_v21 = vsub.f32 %v6775_v56, %v2361_v14  ;;  %v3039_v28 = vpack.c.bf16 %v4474_v19, %v4470_v8  ;;  %v2704_v23 = vadd.f32 %v4474_v19, %v4472_v24 }
 0x4f8   : > { %v4478_v50 = vpop.eup %4477  ;;  %v2201_v4 = vmul.f32 1.442695, %v6776_v22 }
 0x4f9   : > { %v2553_v7 = vmul.f32 1.442695, %v2431_v17  ;;  %v2555_v25 = vmul.f32 1.442695, %v2432_v21  ;;  %3174 = vmatprep.mubr.bf16.mxu1 %v3039_v28  ;;  %2684 = vadd.xlane.f32.xlu1 %v6128_v35  ;;  %v2707_v40 = vadd.f32 %v4478_v50, %v4476_v41  ;;  %v6779_v17 = vld [vmem:[#allocation64_spill] sm:$0xff] }
 0x4fa   : > { %2699 = vadd.xlane.f32.xlu0 %v2698_v47  ;;  %3175 = vmatmul.mubr.bf16.gmra.mrb[88].mxu1 %v3038_v20  ;;  %v6777_v47 = vsub.f32 %v5856_v45, %v5871_v31  ;;  %v6778_v31 = vld [vmem:[#allocation63_spill] sm:$0xff]  ;;  %v6191_v21 = vpop.permute.xlu1 %2869 }
 0x4fb   : > { %4487 = vpow2.f32 %v2553_v7 }
 0x4fc   : > { %4489 = vpow2.f32 %v2555_v25  ;;  %v2203_v24 = vmul.f32 1.442695, %v6777_v47  ;;  %v6780_v25 = vld [vmem:[#allocation65_spill] sm:$0xff] }
 0x4fd   : > { %v4480_v26 = vpop.eup %4479  ;;  %2690 = vadd.xlane.f32.xlu1 %v6135_v6  ;;  %4491 = vpow2.f32 %v2201_v4 }
 0x4fe   : > { %v4482_v15 = vpop.eup %4481  ;;  %v3040_v61 = vpack.c.bf16 %v4480_v26, %v4476_v41  ;;  %4493 = vpow2.f32 %v2203_v24 }
 0x4ff   : > { %v4484_v0 = vpop.eup %4483  ;;  %v3041_v51 = vpack.c.bf16 %v4482_v15, %v4478_v50  ;;  %v2710_v8 = vadd.f32 %v4482_v15, %v4480_v26  ;;  %v6781_v15 = vld [vmem:[#allocation66_spill] sm:$0xff] }
 0x500   : > { %v4486_v36 = vpop.eup %4485 }
 0x501   : > { %3182 = vmatprep.mubr.bf16.mxu1 %v3041_v51  ;;  %2696 = vadd.xlane.f32.xlu1 %v6150_v5  ;;  %v2713_v35 = vadd.f32 %v4486_v36, %v4484_v0  ;;  %v6187_v5 = vpop.permute.xlu0 %2944 }
 0x502   : > { %3183 = vmatmul.mubr.bf16.gmra.mrb[92].mxu1 %v3040_v61 }
 0x505   : > { %v4488_v6 = vpop.eup %4487 }
 0x506   : > { %v4490_v19 = vpop.eup %4489  ;;  %v3042_v14 = vpack.c.bf16 %v4488_v6, %v4484_v0 }
 0x507   : > { %v3043_v20 = vpack.c.bf16 %v4490_v19, %v4486_v36  ;;  %v2716_v41 = vadd.f32 %v4490_v19, %v4488_v6  ;;  %v6181_v52 = vpop.eup %4491  ;;  %v2790_v6 = vld [vmem:[#allocation5] sm:$0xff] }
 0x508   : > { %v6184_v63 = vpop.eup %4493 }
 0x509   : > { %3190 = vmatprep.mubr.bf16.mxu1 %v3043_v20 }
 0x50a   : > { %3191 = vmatmul.mubr.bf16.gmra.mrb[96].mxu1 %v3042_v14 }
 0x510   : > { %2954 = vperm.xlu0 %4309, %v6181_v52  }
 0x512   : > { %2959 = vperm.xlu1 %4310, %v6184_v63  }
 0x525   : > { %v2366_v45 = vpop.permute.xlu0 %2365 }
 0x526   : > { %v2433_v12 = vsub.f32 %v6778_v31, %v2366_v45  ;;  %v2434_v56 = vsub.f32 %v6779_v17, %v2366_v45  ;;  %v2791_v45 = vld [vmem:[#allocation5 + $0x8] sm:$0xff] }
 0x527   : > { %v2983_v31 = vmul.f32 %v6051_v48, %v2791_v45 }
 0x528   : > { %v2557_v28 = vmul.f32 1.442695, %v2433_v12  ;;  %v2559_v50 = vmul.f32 1.442695, %v2434_v56  ;;  %v2792_v56 = vld [vmem:[#allocation5 + $0x10] sm:$0xff] }
 0x52a   : > { %4495 = vpow2.f32 %v2557_v28 }
 0x52b   : > { %4497 = vpow2.f32 %v2559_v50 }
 0x52c   : > { %v2371_v7 = vpop.permute.xlu1 %2370 }
 0x52d   : > { %v2435_v26 = vsub.f32 %v6780_v25, %v2371_v7  ;;  %v2436_v61 = vsub.f32 %v6781_v15, %v2371_v7 }
 0x52f   : > { %v2561_v0 = vmul.f32 1.442695, %v2435_v26  ;;  %v2563_v51 = vmul.f32 1.442695, %v2436_v61  ;;  %2705 = vadd.xlane.f32.xlu0 %v2704_v23  ;;  %v2982_v23 = vmul.f32 %v6056_v46, %v2790_v6  ;;  %v2984_v46 = vmul.f32 %v6065_v13, %v2792_v56  ;;  %v2794_v61 = vld [vmem:[#allocation5 + $0x20] sm:$0xff]  ;;  %v6206_v13 = vpop.permute.xlu0 %2874  ;;  %v2570_v56 = vld [vmem:[#allocation7 + $0x28] sm:$0xff] }
 0x531   : > { %4499 = vpow2.f32 %v2561_v0  ;;  %v2795_v0 = vld [vmem:[#allocation5 + $0x28] sm:$0xff] }
 0x532   : > { %4501 = vpow2.f32 %v2563_v51  ;;  %v2986_v51 = vmul.f32 %v6075_v18, %v2794_v61  ;;  %v2568_v18 = vld [vmem:[#allocation7 + $0x18] sm:$0xff] }
 0x533   : > { %2711 = vadd.xlane.f32.xlu0 %v2710_v8  ;;  %v2572_v61 = vld [vmem:[#allocation7 + $0x38] sm:$0xff] }
 0x534   : > { %v4496_v36 = vpop.eup %4495 }
 0x535   : > { %v4498_v22 = vpop.eup %4497 }
 0x536   : > { %2702 = vadd.xlane.f32.xlu1 %v6164_v1  ;;  %v2719_v4 = vadd.f32 %v4498_v22, %v4496_v36 }
 0x537   : > { %2717 = vadd.xlane.f32.xlu0 %v2716_v41 }
 0x53a   : > { %2708 = vadd.xlane.f32.xlu1 %v2707_v40 }
 0x53b   : > { %v4500_v47 = vpop.eup %4499 }
 0x53c   : > { %v4502_v24 = vpop.eup %4501  ;;  %v3044_v19 = vpack.c.bf16 %v4500_v47, %v4496_v36 }
 0x53d   : > { %v2722_v14 = vadd.f32 %v4502_v24, %v4500_v47  ;;  %v3045_v20 = vpack.c.bf16 %v4502_v24, %v4498_v22  ;;  %v2987_v22 = vmul.f32 %v6079_v62, %v2795_v0  ;;  %v2565_v47 = vld [vmem:[#allocation7] sm:$0xff]  ;;  %v2799_v0 = vld [vmem:[#allocation5 + $0x48] sm:$0xff] }
 0x53e   : > { %2714 = vadd.xlane.f32.xlu1 %v2713_v35  ;;  %v2793_v35 = vld [vmem:[#allocation5 + $0x18] sm:$0xff] }
 0x53f   : > { %2723 = vadd.xlane.f32.xlu0 %v2722_v14  ;;  %3198 = vmatprep.mubr.bf16.mxu1 %v3045_v20  ;;  %v2985_v50 = vmul.f32 %v6067_v16, %v2793_v35  ;;  %v2796_v14 = vld [vmem:[#allocation5 + $0x30] sm:$0xff]  ;;  %v2597_v20 = vmul.f32 %v5813_v33, %v2565_v47  ;;  %v6215_v33 = vpop.permute.xlu1 %2949 }
 0x540   : > { %v3080_v8 = vpop.f32.mrb[40].mxu1  ;;  %3199 = vmatmul.mubr.bf16.gmra.mrb[100].mxu1 %v3044_v19  ;;  %v2988_v62 = vmul.f32 %v6087_v57, %v2796_v14  ;;  %v2604_v14 = vmul.f32 %v5966_v2, %v2572_v61  ;;  %v6791_v61 = vld [vmem:[#allocation68_spill] sm:$0xff] }
 0x541   : > { %v3207_v1 = vadd.f32 %v3080_v8, %v2982_v23  ;;  %v3082_v12 = vpop.f32.mrb[41].mxu1  ;;  %v2797_v23 = vld [vmem:[#allocation5 + $0x38] sm:$0xff] }
 0x542   : > { %v3083_v41 = vpop.f32.mrb[42].mxu1  ;;  %2720 = vadd.xlane.f32.xlu1 %v2719_v4  ;;  %v2989_v12 = vmul.f32 %v6153_v9, %v2797_v23 }
 0x543   : > { %3239 = vst.msk [vmem:[#allocation5] sm:$0xff] %vm796_vm0, %v3207_v1  ;;  %v3208_v40 = vadd.f32 %v3083_v41, %v2983_v31  ;;  %v3085_v17 = vpop.f32.mrb[43].mxu1  ;;  %v2600_v1 = vmul.f32 %v5841_v39, %v2568_v18  ;;  %v6785_v39 = vld [vmem:[#allocation79_spill] sm:$0xff] }
 0x544   : > { %v2602_v9 = vmul.f32 %v6785_v39, %v2570_v56 }
 0x545   : > { %3240 = vst.msk [vmem:[#allocation5 + $0x8] sm:$0xff] %vm796_vm0, %v3208_v40 }
 0x549   : > { %v3088_v28 = vpop.f32.mrb[44].mxu1 }
 0x54a   : > { %v3209_v7 = vadd.f32 %v3088_v28, %v2984_v46  ;;  %v3090_v25 = vpop.f32.mrb[45].mxu1  ;;  %v6782_v28 = vld [vmem:[#allocation69_spill] sm:$0xff] }
 0x54b   : > { %v3091_v48 = vpop.f32.mrb[46].mxu1 }
 0x54c   : > { %3241 = vst.msk [vmem:[#allocation5 + $0x10] sm:$0xff] %vm796_vm0, %v3209_v7  ;;  %v3210_v26 = vadd.f32 %v3091_v48, %v2985_v50  ;;  %v3093_v15 = vpop.f32.mrb[47].mxu1  ;;  %v6783_v50 = vld [vmem:[#allocation71_spill] sm:$0xff] }
 0x54d   : > { %v6784_v7 = vsub.f32 %v6782_v28, %v6783_v50  ;;  %v6790_v50 = vld [vmem:[#allocation77_spill] sm:$0xff] }
 0x54e   : > { %3242 = vst.msk [vmem:[#allocation5 + $0x18] sm:$0xff] %vm796_vm0, %v3210_v26  ;;  %v2798_v26 = vld [vmem:[#allocation5 + $0x40] sm:$0xff] }
 0x54f   : > { %v2175_v25 = vmul.f32 1.442695, %v6784_v7 }
 0x551   : > { %v3096_v36 = vpop.f32.mrb[48].mxu1  ;;  %4503 = vpow2.f32 %v2175_v25 }
 0x552   : > { %v3211_v4 = vadd.f32 %v3096_v36, %v2986_v51  ;;  %v3098_v16 = vpop.f32.mrb[49].mxu1  ;;  %v2990_v36 = vmul.f32 %v6155_v11, %v2798_v26  ;;  %v2569_v26 = vld [vmem:[#allocation7 + $0x20] sm:$0xff] }
 0x553   : > { %v3099_v24 = vpop.f32.mrb[50].mxu1  ;;  %v6787_v16 = vld [vmem:[#allocation75_spill] sm:$0xff] }
 0x554   : > { %3243 = vst.msk [vmem:[#allocation5 + $0x20] sm:$0xff] %vm796_vm0, %v3211_v4  ;;  %v3212_v6 = vadd.f32 %v3099_v24, %v2987_v22  ;;  %v3101_v19 = vpop.f32.mrb[51].mxu1  ;;  %v6786_v4 = vld [vmem:[#allocation73_spill] sm:$0xff] }
 0x555   : > { %v6788_v47 = vsub.f32 %v6786_v4, %v6787_v16  ;;  %v6794_v4 = vld [vmem:[#allocation78_spill] sm:$0xff] }
 0x556   : > { %3244 = vst.msk [vmem:[#allocation5 + $0x28] sm:$0xff] %vm796_vm0, %v3212_v6  ;;  %v2631_v45 = vpop.xlane.xlu0 %2630  ;;  %v6228_v6 = vpop.permute.xlu1 %2879  ;;  %v2601_v16 = vmul.f32 %v6794_v4, %v2569_v26 }
 0x557   : > { %v2725_v8 = vadd.f32 %v2631_v45, %v2597_v20  ;;  %v2179_v24 = vmul.f32 1.442695, %v6788_v47  ;;  %v2991_v20 = vmul.f32 %v6191_v21, %v2799_v0  ;;  %v6792_v0 = vld [vmem:[#allocation70_spill] sm:$0xff] }
 0x559   : > { %2758 = vst.msk [vmem:[#allocation7] sm:$0xff] %vm1070_vm1, %v2725_v8  ;;  %v3104_v31 = vpop.f32.mrb[52].mxu1  ;;  %v2566_v8 = vld [vmem:[#allocation7 + $0x8] sm:$0xff] }
 0x55a   : > { %v3213_v41 = vadd.f32 %v3104_v31, %v2988_v62  ;;  %v3106_v40 = vpop.f32.mrb[53].mxu1  ;;  %v2640_v17 = vpop.xlane.xlu0 %2639  ;;  %v2574_v31 = vld [vmem:[#allocation7 + $0x48] sm:$0xff] }
 0x55b   : > { %v3107_v35 = vpop.f32.mrb[54].mxu1  ;;  %v2728_v46 = vadd.f32 %v2640_v17, %v2600_v1  ;;  %v2606_v21 = vmul.f32 %v6000_v3, %v2574_v31  ;;  %v2567_v17 = vld [vmem:[#allocation7 + $0x10] sm:$0xff]  ;;  %v6240_v25 = vpop.eup %4503 }
 0x55c   : > { %3245 = vst.msk [vmem:[#allocation5 + $0x30] sm:$0xff] %vm796_vm0, %v3213_v41  ;;  %v3214_v57 = vadd.f32 %v3107_v35, %v2989_v12  ;;  %v3109_v48 = vpop.f32.mrb[55].mxu1  ;;  %v6789_v41 = vld [vmem:[#allocation76_spill] sm:$0xff]  ;;  %v2599_v7 = vmul.f32 %v6790_v50, %v2567_v17 }
 0x55d   : > { %2761 = vst.msk [vmem:[#allocation7 + $0x18] sm:$0xff] %vm1070_vm1, %v2728_v46  ;;  %v2598_v40 = vmul.f32 %v6789_v41, %v2566_v8  ;;  %v2576_v46 = vld [vmem:[#allocation7 + $0x58] sm:$0xff] }
 0x55e   : > { %3246 = vst.msk [vmem:[#allocation5 + $0x38] sm:$0xff] %vm796_vm0, %v3214_v57  ;;  %v2646_v15 = vpop.xlane.xlu0 %2645  ;;  %v2608_v48 = vmul.f32 %v6058_v32, %v2576_v46 }
 0x55f   : > { %v2730_v51 = vadd.f32 %v2646_v15, %v2602_v9  ;;  %v2578_v15 = vld [vmem:[#allocation7 + $0x68] sm:$0xff] }
 0x560   : > { %v3338_v22 = vld [vmem:[#allocation7] sm:$0xff]  ;;  %v2610_v32 = vmul.f32 %v6240_v25, %v2578_v15 }
 0x561   : > { %4505 = vrcp.f32 %v3338_v22  ;;  %2763 = vst.msk [vmem:[#allocation7 + $0x28] sm:$0xff] %vm1070_vm1, %v2730_v51  ;;  %v3112_v19 = vpop.f32.mrb[56].mxu1  ;;  %v6793_v51 = vsub.f32 %v6791_v61, %v6792_v0 }
 0x562   : > { %v3215_v45 = vadd.f32 %v3112_v19, %v2990_v36  ;;  %v3114_v18 = vpop.f32.mrb[57].mxu1  ;;  %v2652_v23 = vpop.xlane.xlu0 %2651  ;;  %4507 = vpow2.f32 %v2179_v24  ;;  %v2571_v24 = vld [vmem:[#allocation7 + $0x30] sm:$0xff] }
 0x563   : > { %v3115_v11 = vpop.f32.mrb[58].mxu1  ;;  %v2732_v62 = vadd.f32 %v2652_v23, %v2604_v14  ;;  %v2173_v36 = vmul.f32 1.442695, %v6793_v51  ;;  %v6795_v14 = vld [vmem:[#allocation72_spill] sm:$0xff]  ;;  %v2577_v51 = vld [vmem:[#allocation7 + $0x60] sm:$0xff] }
 0x564   : > { %3247 = vst.msk [vmem:[#allocation5 + $0x40] sm:$0xff] %vm796_vm0, %v3215_v45  ;;  %v3216_v1 = vadd.f32 %v3115_v11, %v2991_v20  ;;  %v3117_v12 = vpop.f32.mrb[59].mxu1  ;;  %v6796_v20 = vld [vmem:[#allocation74_spill] sm:$0xff] }
 0x565   : > { %2765 = vst.msk [vmem:[#allocation7 + $0x38] sm:$0xff] %vm1070_vm1, %v2732_v62  ;;  %v6797_v45 = vsub.f32 %v6795_v14, %v6796_v20  ;;  %v2580_v11 = vld [vmem:[#allocation7 + $0x78] sm:$0xff]  ;;  %4509 = vpow2.f32 %v2173_v36  ;;  %v2603_v12 = vmul.f32 %v5892_v27, %v2571_v24 }
 0x566   : > { %3248 = vst.msk [vmem:[#allocation5 + $0x48] sm:$0xff] %vm796_vm0, %v3216_v1  ;;  %v2634_v2 = vpop.xlane.xlu1 %2633  ;;  %v3341_v1 = vld [vmem:[#allocation7 + $0x18] sm:$0xff] }
 0x567   : > { %v2726_v56 = vadd.f32 %v2634_v2, %v2598_v40  ;;  %v2658_v35 = vpop.xlane.xlu0 %2657  ;;  %v2177_v18 = vmul.f32 1.442695, %v6797_v45  ;;  %v2573_v2 = vld [vmem:[#allocation7 + $0x40] sm:$0xff] }
 0x568   : > { %v2734_v28 = vadd.f32 %v2658_v35, %v2606_v21  ;;  %v2605_v50 = vmul.f32 %v5973_v30, %v2573_v2 }
 0x569   : > { %2759 = vst.msk [vmem:[#allocation7 + $0x8] sm:$0xff] %vm1070_vm1, %v2726_v56  ;;  %v2581_v56 = vld [vmem:[#allocation7 + $0x80] sm:$0xff] }
 0x56a   : > { %2767 = vst.msk [vmem:[#allocation7 + $0x48] sm:$0xff] %vm1070_vm1, %v2734_v28  ;;  %v2637_v57 = vpop.xlane.xlu1 %2636  ;;  %v3343_v28 = vld [vmem:[#allocation7 + $0x28] sm:$0xff] }
 0x56b   : > { %v4506_v39 = vpop.eup %4505  ;;  %v2727_v9 = vadd.f32 %v2637_v57, %v2599_v7  ;;  %v2664_v3 = vpop.xlane.xlu0 %2663  ;;  %v2613_v7 = vmul.f32 %v5912_v60, %v2581_v56  ;;  %v2575_v57 = vld [vmem:[#allocation7 + $0x50] sm:$0xff] }
 0x56c   : > { %v2736_v22 = vadd.f32 %v2664_v3, %v2608_v48  ;;  %3404 = vperm.xlu0 %4309, %v4506_v39   ;;  %v6251_v19 = vpop.eup %4507  ;;  %v2582_v39 = vld [vmem:[#allocation7 + $0x88] sm:$0xff]  ;;  %v3345_v15 = vld [vmem:[#allocation7 + $0x38] sm:$0xff]  ;;  %v2607_v61 = vmul.f32 %v6036_v49, %v2575_v57 }
 0x56d   : > { %2760 = vst.msk [vmem:[#allocation7 + $0x10] sm:$0xff] %vm1070_vm1, %v2727_v9  ;;  %v2612_v40 = vmul.f32 %v6251_v19, %v2580_v11  ;;  %v2614_v60 = vmul.f32 %v5920_v43, %v2582_v39 }
 0x56e   : > { %2769 = vst.msk [vmem:[#allocation7 + $0x58] sm:$0xff] %vm1070_vm1, %v2736_v22  ;;  %v2643_v47 = vpop.xlane.xlu1 %2642 }
 0x56f   : > { %v2729_v23 = vadd.f32 %v2643_v47, %v2601_v16  ;;  %v2670_v8 = vpop.xlane.xlu0 %2669  ;;  %v6266_v0 = vpop.eup %4509  ;;  %v2584_v16 = vld [vmem:[#allocation7 + $0x98] sm:$0xff] }
 0x570   : > { %v3339_v62 = vld [vmem:[#allocation7 + $0x8] sm:$0xff]  ;;  %v2738_v31 = vadd.f32 %v2670_v8, %v2610_v32  ;;  %v2609_v49 = vmul.f32 %v6266_v0, %v2577_v51  ;;  %v2616_v45 = vmul.f32 %v5930_v37, %v2584_v16 }
 0x571   : > { %4511 = vrcp.f32 %v3339_v62  ;;  %2762 = vst.msk [vmem:[#allocation7 + $0x20] sm:$0xff] %vm1070_vm1, %v2729_v23  ;;  %v3347_v14 = vld [vmem:[#allocation7 + $0x48] sm:$0xff] }
 0x572   : > { %2771 = vst.msk [vmem:[#allocation7 + $0x68] sm:$0xff] %vm1070_vm1, %v2738_v31  ;;  %v2649_v41 = vpop.xlane.xlu1 %2648  ;;  %4513 = vpow2.f32 %v2177_v18  ;;  %v2579_v18 = vld [vmem:[#allocation7 + $0x70] sm:$0xff]  ;;  %v2586_v62 = vld [vmem:[#allocation7 + $0xa8] sm:$0xff] }
 0x573   : > { %v2731_v21 = vadd.f32 %v2649_v41, %v2603_v12  ;;  %v2676_v17 = vpop.xlane.xlu0 %2675  ;;  %4515 = vrcp.f32 %v3341_v1  ;;  %v2618_v2 = vmul.f32 %v5952_v55, %v2586_v62 }
 0x574   : > { %v3340_v35 = vld [vmem:[#allocation7 + $0x10] sm:$0xff]  ;;  %v2740_v46 = vadd.f32 %v2676_v17, %v2612_v40 }
 0x575   : > { %4517 = vrcp.f32 %v3340_v35  ;;  %2764 = vst.msk [vmem:[#allocation7 + $0x30] sm:$0xff] %vm1070_vm1, %v2731_v21  ;;  %v2583_v21 = vld [vmem:[#allocation7 + $0x90] sm:$0xff] }
 0x576   : > { %2773 = vst.msk [vmem:[#allocation7 + $0x78] sm:$0xff] %vm1070_vm1, %v2740_v46  ;;  %v2655_v27 = vpop.xlane.xlu1 %2654  ;;  %4519 = vrcp.f32 %v3343_v28  ;;  %v2588_v46 = vld [vmem:[#allocation7 + $0xb8] sm:$0xff] }
 0x577   : > { %v2733_v48 = vadd.f32 %v2655_v27, %v2605_v50  ;;  %v2679_v26 = vpop.xlane.xlu0 %2678  ;;  %v2615_v27 = vmul.f32 %v5923_v53, %v2583_v21  ;;  %v2620_v55 = vmul.f32 %v5980_v29, %v2588_v46 }
 0x578   : > { %v3342_v9 = vld [vmem:[#allocation7 + $0x20] sm:$0xff]  ;;  %v2741_v3 = vadd.f32 %v2679_v26, %v2613_v7 }
 0x579   : > { %4521 = vrcp.f32 %v3342_v9  ;;  %2766 = vst.msk [vmem:[#allocation7 + $0x40] sm:$0xff] %vm1070_vm1, %v2733_v48  ;;  %v2585_v48 = vld [vmem:[#allocation7 + $0xa0] sm:$0xff] }
 0x57a   : > { %2774 = vst.msk [vmem:[#allocation7 + $0x80] sm:$0xff] %vm1070_vm1, %v2741_v3  ;;  %v2661_v30 = vpop.xlane.xlu1 %2660  ;;  %4523 = vrcp.f32 %v3345_v15  ;;  %v2617_v15 = vmul.f32 %v5935_v44, %v2585_v48 }
 0x57b   : > { %v4512_v36 = vpop.eup %4511  ;;  %v2735_v22 = vadd.f32 %v2661_v30, %v2607_v61  ;;  %v2682_v4 = vpop.xlane.xlu0 %2681  ;;  %v2587_v30 = vld [vmem:[#allocation7 + $0xb0] sm:$0xff] }
 0x57c   : > { %v3344_v47 = vld [vmem:[#allocation7 + $0x30] sm:$0xff]  ;;  %v2742_v32 = vadd.f32 %v2682_v4, %v2614_v60  ;;  %3409 = vperm.xlu1 %4310, %v4512_v36   ;;  %v6270_v24 = vpop.eup %4513  ;;  %v2619_v29 = vmul.f32 %v5954_v58, %v2587_v30  ;;  %v2801_v58 = vld [vmem:[#allocation5 + $0x58] sm:$0xff] }
 0x57d   : > { %4525 = vrcp.f32 %v3344_v47  ;;  %2768 = vst.msk [vmem:[#allocation7 + $0x50] sm:$0xff] %vm1070_vm1, %v2735_v22  ;;  %v4516_v20 = vpop.eup %4515  ;;  %v2611_v12 = vmul.f32 %v6270_v24, %v2579_v18  ;;  %v6798_v22 = vsub.f32 %v5886_v54, %v5901_v34  ;;  %v2800_v18 = vld [vmem:[#allocation5 + $0x50] sm:$0xff] }
 0x57e   : > { %2775 = vst.msk [vmem:[#allocation7 + $0x88] sm:$0xff] %vm1070_vm1, %v2742_v32  ;;  %v2667_v43 = vpop.xlane.xlu1 %2666  ;;  %4527 = vrcp.f32 %v3347_v14  ;;  %v2992_v34 = vmul.f32 %v6206_v13, %v2800_v18 }
 0x57f   : > { %v4518_v23 = vpop.eup %4517  ;;  %v2737_v8 = vadd.f32 %v2667_v43, %v2609_v49  ;;  %v2688_v11 = vpop.xlane.xlu0 %2687  ;;  %v2207_v4 = vmul.f32 1.442695, %v6798_v22  ;;  %v6799_v49 = vld [vmem:[#allocation80_spill] sm:$0xff] }
 0x580   : > { %v3346_v31 = vld [vmem:[#allocation7 + $0x40] sm:$0xff]  ;;  %v2744_v1 = vadd.f32 %v2688_v11, %v2616_v45  ;;  %3414 = vperm.xlu0 %4309, %v4518_v23   ;;  %3419 = vperm.xlu1 %4310, %v4516_v20   ;;  %v4520_v41 = vpop.eup %4519  ;;  %v6800_v20 = vld [vmem:[#allocation81_spill] sm:$0xff] }
 0x581   : > { %4529 = vrcp.f32 %v3346_v31  ;;  %2770 = vst.msk [vmem:[#allocation7 + $0x60] sm:$0xff] %vm1070_vm1, %v2737_v8  ;;  %v3354_v40 = vld [vmem:[#allocation7 + $0x80] sm:$0xff]  ;;  %v6801_v43 = vsub.f32 %v6799_v49, %v6800_v20  ;;  %v2993_v8 = vmul.f32 %v6228_v6, %v2801_v58 }
 0x582   : > { %2777 = vst.msk [vmem:[#allocation7 + $0x98] sm:$0xff] %vm1070_vm1, %v2744_v1  ;;  %v2673_v37 = vpop.xlane.xlu1 %2672  ;;  %4531 = vrcp.f32 %v3354_v40  ;;  %v3349_v1 = vld [vmem:[#allocation7 + $0x58] sm:$0xff] }
 0x583   : > { %v4522_v17 = vpop.eup %4521  ;;  %v2739_v56 = vadd.f32 %v2673_v37, %v2611_v12  ;;  %v2694_v35 = vpop.xlane.xlu0 %2693  ;;  %v2205_v45 = vmul.f32 1.442695, %v6801_v43 }
 0x584   : > { %v2746_v28 = vadd.f32 %v2694_v35, %v2618_v2  ;;  %3424 = vperm.xlu0 %4309, %v4522_v17   ;;  %3429 = vperm.xlu1 %4310, %v4520_v41   ;;  %v4524_v7 = vpop.eup %4523  ;;  %v3348_v13 = vld [vmem:[#allocation7 + $0x50] sm:$0xff] }
 0x585   : > { %v3355_v50 = vld [vmem:[#allocation7 + $0x88] sm:$0xff]  ;;  %2772 = vst.msk [vmem:[#allocation7 + $0x70] sm:$0xff] %vm1070_vm1, %v2739_v56 }
 0x586   : > { %4533 = vrcp.f32 %v3355_v50  ;;  %2779 = vst.msk [vmem:[#allocation7 + $0xa8] sm:$0xff] %vm1070_vm1, %v2746_v28  ;;  %v2685_v57 = vpop.xlane.xlu1 %2684 }
 0x587   : > { %v4526_v26 = vpop.eup %4525  ;;  %v2743_v39 = vadd.f32 %v2685_v57, %v2615_v27  ;;  %v2700_v9 = vpop.xlane.xlu0 %2699 }
 0x588   : > { %v2748_v3 = vadd.f32 %v2700_v9, %v2620_v55  ;;  %3434 = vperm.xlu0 %4309, %v4526_v26   ;;  %3439 = vperm.xlu1 %4310, %v4524_v7   ;;  %v4528_v61 = vpop.eup %4527  ;;  %v2806_v9 = vld [vmem:[#allocation5 + $0x80] sm:$0xff] }
 0x589   : > { %2776 = vst.msk [vmem:[#allocation7 + $0x90] sm:$0xff] %vm1070_vm1, %v2743_v39  ;;  %v3357_v51 = vld [vmem:[#allocation7 + $0x98] sm:$0xff] }
 0x58a   : > { %2781 = vst.msk [vmem:[#allocation7 + $0xb8] sm:$0xff] %vm1070_vm1, %v2748_v3  ;;  %v2691_v53 = vpop.xlane.xlu1 %2690  ;;  %4535 = vrcp.f32 %v3357_v51 }
 0x58b   : > { %v4530_v60 = vpop.eup %4529  ;;  %v2745_v36 = vadd.f32 %v2691_v53, %v2617_v15  ;;  %v2807_v15 = vld [vmem:[#allocation5 + $0x88] sm:$0xff] }
 0x58c   : > { %3444 = vperm.xlu0 %4309, %v4530_v60   ;;  %3449 = vperm.xlu1 %4310, %v4528_v61   ;;  %v4532_v16 = vpop.eup %4531  ;;  %v6802_v61 = vld [vmem:[#allocation24_spill] sm:$0xff]  ;;  %v6803_v60 = vld [vmem:[#allocation25_spill] sm:$0xff] }
 0x58d   : > { %2778 = vst.msk [vmem:[#allocation7 + $0xa0] sm:$0xff] %vm1070_vm1, %v2745_v36  ;;  %v3359_v54 = vld [vmem:[#allocation7 + $0xa8] sm:$0xff]  ;;  %v2998_v53 = vmul.f32 %v6802_v61, %v2806_v9  ;;  %v2999_v51 = vmul.f32 %v6803_v60, %v2807_v15  ;;  %v2812_v15 = vld [vmem:[#allocation5 + $0xb0] sm:$0xff] }
 0x58e   : > { %v2697_v44 = vpop.xlane.xlu1 %2696 }
 0x58f   : > { %v2747_v47 = vadd.f32 %v2697_v44, %v2619_v29  ;;  %v6324_v18 = vpop.permute.xlu0 %2954 }
 0x590   : > { %v4534_v32 = vpop.eup %4533  ;;  %v3356_v14 = vld [vmem:[#allocation7 + $0x90] sm:$0xff]  ;;  %3484 = vperm.xlu0 %4309, %v4532_v16  }
 0x591   : > { %4537 = vrcp.f32 %v3356_v14  ;;  %2780 = vst.msk [vmem:[#allocation7 + $0xb0] sm:$0xff] %vm1070_vm1, %v2747_v47  ;;  %3489 = vperm.xlu1 %4310, %v4534_v32   ;;  %v2808_v16 = vld [vmem:[#allocation5 + $0x90] sm:$0xff]  ;;  %v2809_v47 = vld [vmem:[#allocation5 + $0x98] sm:$0xff] }
 0x592   : > { %4539 = vpow2.f32 %v2207_v4  ;;  %v6804_v32 = vld [vmem:[#allocation26_spill] sm:$0xff] }
 0x593   : > { %4541 = vpow2.f32 %v2205_v45  ;;  %v3000_v14 = vmul.f32 %v6804_v32, %v2808_v16 }
 0x594   : > { %2884 = vperm.xlu0 %4309, %v6266_v0   ;;  %4543 = vrcp.f32 %v3359_v54  ;;  %v3358_v11 = vld [vmem:[#allocation7 + $0xa0] sm:$0xff]  ;;  %v4536_v41 = vpop.eup %4535  ;;  %v3361_v0 = vld [vmem:[#allocation7 + $0xb8] sm:$0xff] }
 0x595   : > { %v3120_v23 = vpop.f32.mrb[60].mxu1  ;;  %2889 = vperm.xlu1 %4310, %v6240_v25   ;;  %4545 = vrcp.f32 %v3358_v11 }
 0x596   : > { %v3217_v62 = vadd.f32 %v3120_v23, %v2992_v34  ;;  %v3122_v31 = vpop.f32.mrb[61].mxu1  ;;  %4547 = vrcp.f32 %v3349_v1  ;;  %v2590_v34 = vld [vmem:[#allocation7 + $0xc8] sm:$0xff] }
 0x597   : > { %v3123_v12 = vpop.f32.mrb[62].mxu1  ;;  %4549 = vrcp.f32 %v3348_v13  ;;  %v6805_v23 = vld [vmem:[#allocation67_spill] sm:$0xff]  ;;  %v6810_v13 = vld [vmem:[#allocation84_spill] sm:$0xff] }
 0x598   : > { %3249 = vst.msk [vmem:[#allocation5 + $0x50] sm:$0xff] %vm796_vm0, %v3217_v62  ;;  %v3218_v40 = vadd.f32 %v3123_v12, %v2993_v8  ;;  %v3125_v37 = vpop.f32.mrb[63].mxu1  ;;  %4551 = vrcp.f32 %v3361_v0  ;;  %v3360_v21 = vld [vmem:[#allocation7 + $0xb0] sm:$0xff]  ;;  %v2811_v31 = vld [vmem:[#allocation5 + $0xa8] sm:$0xff] }
 0x599   : > { %3499 = vperm.xlu1 %4310, %v4536_v41   ;;  %4553 = vrcp.f32 %v3360_v21  ;;  %v6806_v8 = vld [vmem:[#allocation85_spill] sm:$0xff]  ;;  %v6808_v1 = vld [vmem:[#allocation23_spill] sm:$0xff] }
 0x59a   : > { %3250 = vst.msk [vmem:[#allocation5 + $0x58] sm:$0xff] %vm796_vm0, %v3218_v40  ;;  %v6807_v11 = vsub.f32 %v6805_v23, %v6806_v8  ;;  %v2592_v40 = vld [vmem:[#allocation7 + $0xd8] sm:$0xff]  ;;  %v6809_v37 = vld [vmem:[#allocation83_spill] sm:$0xff] }
 0x59b   : > { %v4538_v25 = vpop.eup %4537  ;;  %v2815_v8 = vld [vmem:[#allocation5 + $0xc8] sm:$0xff] }
 0x59c   : > { %v6302_v6 = vpop.eup %4539  ;;  %3494 = vperm.xlu0 %4309, %v4538_v25   ;;  %v2211_v62 = vmul.f32 1.442695, %v6807_v11  ;;  %v6811_v25 = vsub.f32 %v6809_v37, %v6810_v13 }
 0x59d   : > { %v6304_v2 = vpop.f32.mrb[64].mxu1  ;;  %2969 = vperm.xlu1 %4310, %v6302_v6   ;;  %v6307_v56 = vpop.eup %4541 }
 0x59e   : > { %v3130_v17 = vpop.f32.mrb[65].mxu1  ;;  %v4544_v46 = vpop.eup %4543  ;;  %v2209_v0 = vmul.f32 1.442695, %v6811_v25  ;;  %4555 = vpow2.f32 %v2211_v62  ;;  %v3007_v25 = vmul.f32 %v6215_v33, %v2815_v8  ;;  %v2817_v33 = vld [vmem:[#allocation5 + $0xd8] sm:$0xff] }
 0x59f   : > { %v6309_v35 = vpop.f32.mrb[66].mxu1  ;;  %v4546_v50 = vpop.eup %4545  ;;  %v3625_v8 = vld [vmem:[%s6562_s11 + $0x38] sm:$0xff] }
 0x5a0   : > { %v3133_v28 = vpop.f32.mrb[67].mxu1  ;;  %2964 = vperm.xlu0 %4309, %v6307_v56   ;;  %v4548_v27 = vpop.eup %4547  ;;  %4557 = vpow2.f32 %v2209_v0 }
 0x5a1   : > { %3509 = vperm.xlu1 %4310, %v4544_v46   ;;  %v4550_v55 = vpop.eup %4549  ;;  %v3003_v46 = vmul.f32 %v6139_v38, %v2811_v31  ;;  %v6812_v38 = vld [vmem:[#allocation82_spill] sm:$0xff]  ;;  %v2595_v31 = vld [vmem:[#allocation7 + $0xf0] sm:$0xff] }
 0x5a2   : > { %v4552_v26 = vpop.eup %4551 }
 0x5a3   : > { %v4554_v3 = vpop.eup %4553 }
 0x5a4   : > { %3504 = vperm.xlu0 %4309, %v4546_v50  }
 0x5a5   : > { %v6312_v7 = vpop.f32.mrb[68].mxu1  ;;  %3459 = vperm.xlu1 %4310, %v4548_v27   ;;  %v6337_v27 = vpop.permute.xlu1 %2959 }
 0x5a6   : > { %v3138_v57 = vpop.f32.mrb[69].mxu1 }
 0x5a7   : > { %v6314_v48 = vpop.f32.mrb[70].mxu1 }
 0x5a8   : > { %v3141_v39 = vpop.f32.mrb[71].mxu1  ;;  %3454 = vperm.xlu0 %4309, %v4550_v55   ;;  %v2589_v55 = vld [vmem:[#allocation7 + $0xc0] sm:$0xff] }
 0x5a9   : > { %3519 = vperm.xlu1 %4310, %v4552_v26  }
 0x5ac   : > { %3514 = vperm.xlu0 %4309, %v4554_v3   ;;  %v2594_v3 = vld [vmem:[#allocation7 + $0xe8] sm:$0xff] }
 0x5ad   : > { %v3144_v30 = vpop.f32.mrb[72].mxu1  ;;  %2899 = vperm.xlu1 %4310, %v6251_v19   ;;  %v3001_v19 = vmul.f32 %v6121_v42, %v2809_v47  ;;  %v2622_v42 = vmul.f32 %v6808_v1, %v2590_v34 }
 0x5ae   : > { %v3223_v36 = vadd.f32 %v3144_v30, %v2998_v53  ;;  %v3146_v29 = vpop.f32.mrb[73].mxu1  ;;  %v2621_v53 = vmul.f32 %v6812_v38, %v2589_v55  ;;  %v2813_v30 = vld [vmem:[#allocation5 + $0xb8] sm:$0xff]  ;;  %v2816_v55 = vld [vmem:[#allocation5 + $0xd0] sm:$0xff] }
 0x5af   : > { %v3147_v22 = vpop.f32.mrb[74].mxu1  ;;  %v3005_v47 = vmul.f32 %v6167_v59, %v2813_v30  ;;  %v2596_v59 = vld [vmem:[#allocation7 + $0xf8] sm:$0xff] }
 0x5b0   : > { %3255 = vst.msk [vmem:[#allocation5 + $0x80] sm:$0xff] %vm796_vm0, %v3223_v36  ;;  %v3224_v4 = vadd.f32 %v3147_v22, %v2999_v51  ;;  %v3149_v44 = vpop.f32.mrb[75].mxu1  ;;  %2894 = vperm.xlu0 %4309, %v6270_v24   ;;  %v2810_v24 = vld [vmem:[#allocation5 + $0xa0] sm:$0xff]  ;;  %v2591_v51 = vld [vmem:[#allocation7 + $0xd0] sm:$0xff] }
 0x5b1   : > { %v3002_v12 = vmul.f32 %v6123_v10, %v2810_v24  ;;  %v2624_v10 = vmul.f32 %v6184_v63, %v2592_v40  ;;  %v2626_v63 = vmul.f32 %v6302_v6, %v2594_v3  ;;  %v6813_v36 = vld [vmem:[#allocation27_spill] sm:$0xff] }
 0x5b2   : > { %3256 = vst.msk [vmem:[#allocation5 + $0x88] sm:$0xff] %vm796_vm0, %v3224_v4  ;;  %v3004_v29 = vmul.f32 %v6813_v36, %v2812_v15  ;;  %v2814_v24 = vld [vmem:[#allocation5 + $0xc0] sm:$0xff]  ;;  %v3009_v15 = vmul.f32 %v6337_v27, %v2817_v33 }
 0x5b3   : > { %v3006_v1 = vmul.f32 %v6187_v5, %v2814_v24  ;;  %v3351_v5 = vld [vmem:[#allocation7 + $0x68] sm:$0xff]  ;;  %v3618_v24 = vld [vmem:[%s6562_s11] sm:$0xff] }
 0x5b5   : > { %v3152_v49 = vpop.f32.mrb[76].mxu1 }
 0x5b6   : > { %v3225_v20 = vadd.f32 %v3152_v49, %v3000_v14  ;;  %v3154_v43 = vpop.f32.mrb[77].mxu1 }
 0x5b7   : > { %v3155_v45 = vpop.f32.mrb[78].mxu1  ;;  %v2593_v43 = vld [vmem:[#allocation7 + $0xe0] sm:$0xff] }
 0x5b8   : > { %3257 = vst.msk [vmem:[#allocation5 + $0x90] sm:$0xff] %vm796_vm0, %v3225_v20  ;;  %v3226_v58 = vadd.f32 %v3155_v45, %v3001_v19  ;;  %v3157_v54 = vpop.f32.mrb[79].mxu1  ;;  %v2623_v19 = vmul.f32 %v6181_v52, %v2591_v51  ;;  %v4556_v45 = vpop.eup %4555  ;;  %v2625_v52 = vmul.f32 %v6307_v56, %v2593_v43  ;;  %v3322_v33 = vld [vmem:[#allocation5 + $0x80] sm:$0xff] }
 0x5b9   : > { %v4558_v23 = vpop.eup %4557  ;;  %v2628_v62 = vmul.f32 %v4556_v45, %v2596_v59 }
 0x5ba   : > { %3258 = vst.msk [vmem:[#allocation5 + $0x98] sm:$0xff] %vm796_vm0, %v3226_v58 }
 0x5bc   : > { %v2706_v41 = vpop.xlane.xlu0 %2705 }
 0x5bd   : > { %v2750_v21 = vadd.f32 %v2706_v41, %v2622_v42  ;;  %v3160_v17 = vpop.f32.mrb[80].mxu1 }
 0x5be   : > { %v3227_v28 = vadd.f32 %v3160_v17, %v3002_v12  ;;  %v3162_v50 = vpop.f32.mrb[81].mxu1 }
 0x5bf   : > { %2783 = vst.msk [vmem:[#allocation7 + $0xc8] sm:$0xff] %vm1070_vm1, %v2750_v21  ;;  %v3163_v57 = vpop.f32.mrb[82].mxu1  ;;  %v2627_v21 = vmul.f32 %v4558_v23, %v2595_v31 }
 0x5c0   : > { %3259 = vst.msk [vmem:[#allocation5 + $0xa0] sm:$0xff] %vm796_vm0, %v3227_v28  ;;  %v3228_v26 = vadd.f32 %v3163_v57, %v3003_v46  ;;  %v3165_v39 = vpop.f32.mrb[83].mxu1  ;;  %v2712_v9 = vpop.xlane.xlu0 %2711 }
 0x5c1   : > { %v2752_v61 = vadd.f32 %v2712_v9, %v2624_v10  ;;  %v3008_v39 = vmul.f32 %v6324_v18, %v2816_v55 }
 0x5c2   : > { %3260 = vst.msk [vmem:[#allocation5 + $0xa8] sm:$0xff] %vm796_vm0, %v3228_v26 }
 0x5c3   : > { %2785 = vst.msk [vmem:[#allocation7 + $0xd8] sm:$0xff] %vm1070_vm1, %v2752_v61  ;;  %v2703_v60 = vpop.xlane.xlu1 %2702 }
 0x5c4   : > { %v2749_v22 = vadd.f32 %v2703_v60, %v2621_v53  ;;  %v2718_v4 = vpop.xlane.xlu0 %2717  ;;  %v3350_v53 = vld [vmem:[#allocation7 + $0x60] sm:$0xff] }
 0x5c5   : > { %v2754_v44 = vadd.f32 %v2718_v4, %v2626_v63  ;;  %v3168_v16 = vpop.f32.mrb[84].mxu1  ;;  %v3353_v63 = vld [vmem:[#allocation7 + $0x78] sm:$0xff] }
 0x5c6   : > { %v3363_v32 = vld [vmem:[#allocation7 + $0xc8] sm:$0xff]  ;;  %2782 = vst.msk [vmem:[#allocation7 + $0xc0] sm:$0xff] %vm1070_vm1, %v2749_v22  ;;  %v3229_v14 = vadd.f32 %v3168_v16, %v3004_v29  ;;  %v3170_v49 = vpop.f32.mrb[85].mxu1  ;;  %v3352_v16 = vld [vmem:[#allocation7 + $0x70] sm:$0xff] }
 0x5c7   : > { %4559 = vrcp.f32 %v3363_v32  ;;  %2787 = vst.msk [vmem:[#allocation7 + $0xe8] sm:$0xff] %vm1070_vm1, %v2754_v44  ;;  %v3171_v6 = vpop.f32.mrb[86].mxu1  ;;  %v2709_v20 = vpop.xlane.xlu1 %2708 }
 0x5c8   : > { %3261 = vst.msk [vmem:[#allocation5 + $0xb0] sm:$0xff] %vm796_vm0, %v3229_v14  ;;  %v3230_v58 = vadd.f32 %v3171_v6, %v3005_v47  ;;  %v3173_v54 = vpop.f32.mrb[87].mxu1  ;;  %v2751_v34 = vadd.f32 %v2709_v20, %v2623_v19 }
 0x5ca   : > { %3262 = vst.msk [vmem:[#allocation5 + $0xb8] sm:$0xff] %vm796_vm0, %v3230_v58  ;;  %v3365_v42 = vld [vmem:[#allocation7 + $0xd8] sm:$0xff]  ;;  %v3619_v58 = vld [vmem:[%s6562_s11 + $0x8] sm:$0xff] }
 0x5cb   : > { %2784 = vst.msk [vmem:[#allocation7 + $0xd0] sm:$0xff] %vm1070_vm1, %v2751_v34  ;;  %v2715_v11 = vpop.xlane.xlu1 %2714  ;;  %v3621_v34 = vld [vmem:[%s6562_s11 + $0x18] sm:$0xff] }
 0x5cc   : > { %v2753_v12 = vadd.f32 %v2715_v11, %v2625_v52  ;;  %v2724_v41 = vpop.xlane.xlu0 %2723  ;;  %v3623_v52 = vld [vmem:[%s6562_s11 + $0x28] sm:$0xff] }
 0x5cd   : > { %v3362_v40 = vld [vmem:[#allocation7 + $0xc0] sm:$0xff]  ;;  %v2756_v37 = vadd.f32 %v2724_v41, %v2628_v62  ;;  %v3176_v13 = vpop.f32.mrb[88].mxu1 }
 0x5ce   : > { %4561 = vrcp.f32 %v3362_v40  ;;  %2786 = vst.msk [vmem:[#allocation7 + $0xe0] sm:$0xff] %vm1070_vm1, %v2753_v12  ;;  %v3231_v0 = vadd.f32 %v3176_v13, %v3006_v1  ;;  %v3178_v56 = vpop.f32.mrb[89].mxu1  ;;  %v3367_v9 = vld [vmem:[#allocation7 + $0xe8] sm:$0xff]  ;;  %v3622_v62 = vld [vmem:[%s6562_s11 + $0x20] sm:$0xff] }
 0x5cf   : > { %4563 = vrcp.f32 %v3365_v42  ;;  %2789 = vst.msk [vmem:[#allocation7 + $0xf8] sm:$0xff] %vm1070_vm1, %v2756_v37  ;;  %v3179_v17 = vpop.f32.mrb[90].mxu1  ;;  %v2721_v46 = vpop.xlane.xlu1 %2720  ;;  %v6388_v11 = vld [vmem:[#allocation11] sm:$0xff]   ;;  %v3624_v42 = vld [vmem:[%s6562_s11 + $0x30] sm:$0xff] }
 0x5d0   : > { %3263 = vst.msk [vmem:[#allocation5 + $0xc0] sm:$0xff] %vm796_vm0, %v3231_v0  ;;  %v3232_v28 = vadd.f32 %v3179_v17, %v3007_v25  ;;  %v3181_v50 = vpop.f32.mrb[91].mxu1  ;;  %v2755_v57 = vadd.f32 %v2721_v46, %v2627_v21  ;;  %4565 = vrcp.f32 %v3351_v5  ;;  %4162 = vmatprep.mubr.msk.bf16.mxu0 %vm796_vm0, %v6388_v11  ;;  %v3315_v0 = vld [vmem:[#allocation5 + $0x48] sm:$0xff]  ;;  %v3314_v21 = vld [vmem:[#allocation5 + $0x40] sm:$0xff] }
 0x5d1   : > { %v4560_v10 = vpop.eup %4559  ;;  %v3307_v46 = vld [vmem:[#allocation5 + $0x8] sm:$0xff] }
 0x5d2   : > { %3264 = vst.msk [vmem:[#allocation5 + $0xc8] sm:$0xff] %vm796_vm0, %v3232_v28  ;;  %3529 = vperm.xlu1 %4310, %v4560_v10   ;;  %v3364_v26 = vld [vmem:[#allocation7 + $0xd0] sm:$0xff] }
 0x5d3   : > { %2788 = vst.msk [vmem:[#allocation7 + $0xf0] sm:$0xff] %vm1070_vm1, %v2755_v57  ;;  %4567 = vrcp.f32 %v3364_v26  ;;  %v3306_v57 = vld [vmem:[#allocation5] sm:$0xff] }
 0x5d4   : > { %4569 = vrcp.f32 %v3367_v9 }
 0x5d5   : > { %v3184_v3 = vpop.f32.mrb[92].mxu1  ;;  %4571 = vrcp.f32 %v3350_v53  ;;  %v3366_v18 = vld [vmem:[#allocation7 + $0xe0] sm:$0xff]  ;;  %v2803_v53 = vld [vmem:[#allocation5 + $0x68] sm:$0xff] }
 0x5d6   : > { %v3233_v61 = vadd.f32 %v3184_v3, %v3008_v39  ;;  %v3186_v38 = vpop.f32.mrb[93].mxu1  ;;  %2979 = vperm.xlu1 %4310, %v4556_v45   ;;  %4573 = vrcp.f32 %v3353_v63  ;;  %v3369_v27 = vld [vmem:[#allocation7 + $0xf8] sm:$0xff]  ;;  %v3323_v39 = vld [vmem:[#allocation5 + $0x88] sm:$0xff] }
 0x5d7   : > { %v3187_v30 = vpop.f32.mrb[94].mxu1  ;;  %4575 = vrcp.f32 %v3366_v18  ;;  %v2802_v38 = vld [vmem:[#allocation5 + $0x60] sm:$0xff] }
 0x5d8   : > { %v4562_v60 = vpop.eup %4561  ;;  %3265 = vst.msk [vmem:[#allocation5 + $0xd0] sm:$0xff] %vm796_vm0, %v3233_v61  ;;  %v3234_v51 = vadd.f32 %v3187_v30, %v3009_v15  ;;  %v3189_v36 = vpop.f32.mrb[95].mxu1  ;;  %4577 = vrcp.f32 %v3369_v27 }
 0x5d9   : > { %v4564_v29 = vpop.eup %4563  ;;  %3524 = vperm.xlu0 %4309, %v4562_v60   ;;  %4579 = vrcp.f32 %v3352_v16 }
 0x5da   : > { %3266 = vst.msk [vmem:[#allocation5 + $0xd8] sm:$0xff] %vm796_vm0, %v3234_v51  ;;  %3539 = vperm.xlu1 %4310, %v4564_v29   ;;  %v4566_v22 = vpop.eup %4565  ;;  %v3368_v19 = vld [vmem:[#allocation7 + $0xf0] sm:$0xff] }
 0x5db   : > { %4581 = vrcp.f32 %v3368_v19 }
 0x5dd   : > { %v6366_v4 = vpop.f32.mrb[96].mxu1  ;;  %2974 = vperm.xlu0 %4309, %v4558_v23   ;;  %v4568_v32 = vpop.eup %4567  ;;  %v3620_v23 = vld [vmem:[%s6562_s11 + $0x10] sm:$0xff] }
 0x5de   : > { %v3194_v44 = vpop.f32.mrb[97].mxu1  ;;  %3469 = vperm.xlu1 %4310, %v4566_v22   ;;  %v4570_v49 = vpop.eup %4569 }
 0x5df   : > { %v6368_v47 = vpop.f32.mrb[98].mxu1  ;;  %v4572_v6 = vpop.eup %4571 }
 0x5e0   : > { %v3197_v14 = vpop.f32.mrb[99].mxu1  ;;  %v4574_v20 = vpop.eup %4573 }
 0x5e1   : > { %3534 = vperm.xlu0 %4309, %v4568_v32   ;;  %v4576_v43 = vpop.eup %4575  ;;  %v3309_v32 = vld [vmem:[#allocation5 + $0x18] sm:$0xff]  ;;  %v3308_v14 = vld [vmem:[#allocation5 + $0x10] sm:$0xff] }
 0x5e2   : > { %3549 = vperm.xlu1 %4310, %v4570_v49   ;;  %v4578_v45 = vpop.eup %4577 }
 0x5e3   : > { %v4580_v54 = vpop.eup %4579 }
 0x5e5   : > { %3464 = vperm.xlu0 %4309, %v4572_v6   ;;  %v4582_v59 = vpop.eup %4581 }
 0x5e6   : > { %3479 = vperm.xlu1 %4310, %v4574_v20  }
 0x5e9   : > { %3544 = vperm.xlu0 %4309, %v4576_v43   ;;  %v2819_v43 = vld [vmem:[#allocation5 + $0xe8] sm:$0xff] }
 0x5ea   : > { %3559 = vperm.xlu1 %4310, %v4578_v45   ;;  %v3325_v45 = vld [vmem:[#allocation5 + $0x98] sm:$0xff] }
 0x5eb   : > { %v3405_v31 = vpop.permute.xlu0 %3404 }
 0x5ec   : > { %v3562_v55 = vmul.f32 %v3405_v31, %v3306_v57 }
 0x5ed   : > { %3474 = vperm.xlu0 %4309, %v4580_v54  }
 0x5ee   : > { %3633 = vperm.xlu1 %4310, %v3619_v58   ;;  %v3324_v58 = vld [vmem:[#allocation5 + $0x90] sm:$0xff] }
 0x5f1   : > { %3554 = vperm.xlu0 %4309, %v4582_v59  }
 0x5f2   : > { %3643 = vperm.xlu1 %4310, %v3621_v34  }
 0x5f5   : > { %3628 = vperm.xlu0 %4309, %v3618_v24  }
 0x5f6   : > { %3653 = vperm.xlu1 %4310, %v3623_v52  }
 0x5f9   : > { %3638 = vperm.xlu0 %4309, %v3620_v23   ;;  %v2818_v23 = vld [vmem:[#allocation5 + $0xe0] sm:$0xff] }
 0x5fa   : > { %3663 = vperm.xlu1 %4310, %v3625_v8  }
 0x5fb   : > { %v3410_v1 = vpop.permute.xlu1 %3409 }
 0x5fc   : > { %v3563_v50 = vmul.f32 %v3410_v1, %v3307_v46  ;;  %v3326_v46 = vld [vmem:[#allocation5 + $0xa0] sm:$0xff] }
 0x5fd   : > { %3648 = vperm.xlu0 %4309, %v3622_v62   ;;  %v3311_v62 = vld [vmem:[#allocation5 + $0x28] sm:$0xff] }
 0x5fe   : > { %v3594_v15 = vpack.c.bf16 %v3563_v50, %v3562_v55 }
 0x5ff   : > { %v3420_v12 = vpop.permute.xlu1 %3419  ;;  %v3415_v41 = vpop.permute.xlu0 %3414 }
 0x600   : > { %v3699_v22 = vsel %vm796_vm0, %v3594_v15, 0  ;;  %v3565_v19 = vmul.f32 %v3420_v12, %v3309_v32  ;;  %v3564_v6 = vmul.f32 %v3415_v41, %v3308_v14 }
 0x601   : > { %3658 = vperm.xlu0 %4309, %v3624_v42  }
 0x602   : > { %v3595_v34 = vpack.c.bf16 %v3565_v19, %v3564_v6  ;;  %v2821_v19 = vld [vmem:[#allocation5 + $0xf8] sm:$0xff] }
 0x603   : > { %v3430_v40 = vpop.permute.xlu1 %3429  ;;  %v3425_v37 = vpop.permute.xlu0 %3424 }
 0x604   : > { %v3567_v42 = vmul.f32 %v3430_v40, %v3311_v62 }
 0x607   : > { %v6398_v13 = vpop.permute.xlu1 %3439  ;;  %v6400_v25 = vpop.permute.xlu0 %3434 }
 0x60b   : > { %v3450_v56 = vpop.permute.xlu1 %3449  ;;  %v3445_v17 = vpop.permute.xlu0 %3444 }
 0x60c   : > { %v6402_v5 = vmul.f32 %v3450_v56, %v3315_v0  ;;  %v6404_v28 = vmul.f32 %v3445_v17, %v3314_v21  ;;  %v3702_v56 = vsel %vm796_vm0, %v3595_v34, 0  ;;  %v3327_v17 = vld [vmem:[#allocation5 + $0xa8] sm:$0xff] }
 0x60e   : > { %v3598_v10 = vpack.c.bf16 %v6402_v5, %v6404_v28 }
 0x60f   : > { %v3485_v26 = vpop.permute.xlu0 %3484 }
 0x610   : > { %v3490_v9 = vpop.permute.xlu1 %3489  ;;  %v3578_v3 = vmul.f32 %v3485_v26, %v3322_v33  ;;  %v3313_v33 = vld [vmem:[#allocation5 + $0x38] sm:$0xff]  ;;  %v3312_v26 = vld [vmem:[#allocation5 + $0x30] sm:$0xff] }
 0x611   : > { %v3579_v61 = vmul.f32 %v3490_v9, %v3323_v39  ;;  %v3569_v9 = vmul.f32 %v6398_v13, %v3313_v33 }
 0x613   : > { %v3602_v30 = vpack.c.bf16 %v3579_v61, %v3578_v3  ;;  %v6408_v60 = vpop.f32.mrb[100].mxu1  ;;  %v2885_v63 = vpop.permute.xlu0 %2884  ;;  %v3568_v3 = vmul.f32 %v6400_v25, %v3312_v26  ;;  %v2805_v61 = vld [vmem:[#allocation5 + $0x78] sm:$0xff] }
 0x614   : > { %v3202_v51 = vpop.f32.mrb[101].mxu1  ;;  %v2890_v36 = vpop.permute.xlu1 %2889  ;;  %v2994_v29 = vmul.f32 %v2885_v63, %v2802_v38  ;;  %v3329_v38 = vld [vmem:[#allocation5 + $0xb8] sm:$0xff] }
 0x615   : > { %v2995_v18 = vmul.f32 %v2890_v36, %v2803_v53  ;;  %v6410_v27 = vpop.f32.mrb[102].mxu1  ;;  %4218 = vmatprep.subr.msk.bf16.mxu0 %vm796_vm0, %v3602_v30  ;;  %v3328_v53 = vld [vmem:[#allocation5 + $0xb0] sm:$0xff]  ;;  %v3597_v63 = vpack.c.bf16 %v3569_v9, %v3568_v3 }
 0x616   : > { %v3219_v44 = vadd.f32 %v6304_v2, %v2994_v29  ;;  %v3205_v16 = vpop.f32.mrb[103].mxu1  ;;  %4147 = vmatpush3.bf16.xpose.msra.mxu0 %v3699_v22  ;;  %v2804_v22 = vld [vmem:[#allocation5 + $0x70] sm:$0xff] }
 0x617   : > { %v3220_v49 = vadd.f32 %v6309_v35, %v2995_v18  ;;  %v3310_v35 = vld [vmem:[#allocation5 + $0x20] sm:$0xff]  ;;  %v3708_v32 = vsel %vm796_vm0, %v3597_v63, 0 }
 0x618   : > { %3251 = vst.msk [vmem:[#allocation5 + $0x60] sm:$0xff] %vm796_vm0, %v3219_v44  ;;  %v3500_v20 = vpop.permute.xlu1 %3499  ;;  %v3566_v12 = vmul.f32 %v3425_v37, %v3310_v35  ;;  %v3317_v35 = vld [vmem:[#allocation5 + $0x58] sm:$0xff] }
 0x619   : > { %3252 = vst.msk [vmem:[#allocation5 + $0x68] sm:$0xff] %vm796_vm0, %v3220_v49  ;;  %v3581_v59 = vmul.f32 %v3500_v20, %v3325_v45  ;;  %v3330_v45 = vld [vmem:[#allocation5 + $0xc0] sm:$0xff] }
 0x61a   : > { %v3596_v57 = vpack.c.bf16 %v3567_v42, %v3566_v12  ;;  %v3333_v42 = vld [vmem:[#allocation5 + $0xd8] sm:$0xff]  ;;  %v3332_v12 = vld [vmem:[#allocation5 + $0xd0] sm:$0xff] }
 0x61b   : > { %v3495_v54 = vpop.permute.xlu0 %3494 }
 0x61c   : > { %v2970_v2 = vpop.permute.xlu1 %2969  ;;  %v3580_v24 = vmul.f32 %v3495_v54, %v3324_v58 }
 0x61d   : > { %v3011_v52 = vmul.f32 %v2970_v2, %v2819_v43  ;;  %v3331_v43 = vld [vmem:[#allocation5 + $0xc8] sm:$0xff]  ;;  %v2820_v2 = vld [vmem:[#allocation5 + $0xf0] sm:$0xff] }
 0x61e   : > { %v3603_v8 = vpack.c.bf16 %v3581_v59, %v3580_v24 }
 0x61f   : > { %v3236_v31 = vadd.f32 %v6368_v47, %v3011_v52  ;;  %v2965_v1 = vpop.permute.xlu0 %2964  ;;  %v3316_v52 = vld [vmem:[#allocation5 + $0x50] sm:$0xff] }
 0x620   : > { %v3510_v41 = vpop.permute.xlu1 %3509  ;;  %v3010_v0 = vmul.f32 %v2965_v1, %v2818_v23  ;;  %4219 = vmatprep.subr.msk.bf16.mxu0 %vm796_vm0, %v3603_v8 }
 0x621   : > { %3268 = vst.msk [vmem:[#allocation5 + $0xe8] sm:$0xff] %vm796_vm0, %v3236_v31  ;;  %4149 = vmatpush3.bf16.xpose.msra.mxu0 %v3702_v56  ;;  %v3583_v55 = vmul.f32 %v3510_v41, %v3327_v17 }
 0x622   : > { %v3235_v21 = vadd.f32 %v6366_v4, %v3010_v0  ;;  %v3705_v4 = vsel %vm796_vm0, %v3596_v57, 0 }
 0x623   : > { %v3505_v50 = vpop.permute.xlu0 %3504 }
 0x624   : > { %3267 = vst.msk [vmem:[#allocation5 + $0xe0] sm:$0xff] %vm796_vm0, %v3235_v21  ;;  %v3460_v47 = vpop.permute.xlu1 %3459  ;;  %v3582_v40 = vmul.f32 %v3505_v50, %v3326_v46  ;;  %v3318_v50 = vld [vmem:[#allocation5 + $0x60] sm:$0xff] }
 0x625   : > { %v3573_v31 = vmul.f32 %v3460_v47, %v3317_v35 }
 0x626   : > { %v3604_v37 = vpack.c.bf16 %v3583_v55, %v3582_v40 }
 0x627   : > { %v3455_v39 = vpop.permute.xlu0 %3454 }
 0x628   : > { %v3520_v15 = vpop.permute.xlu1 %3519  ;;  %4220 = vmatprep.subr.msk.bf16.mxu0 %vm796_vm0, %v3604_v37  ;;  %v3572_v23 = vmul.f32 %v3455_v39, %v3316_v52  ;;  %v3335_v55 = vld [vmem:[#allocation5 + $0xe8] sm:$0xff] }
 0x629   : > { %4151 = vmatpush3.bf16.xpose.msra.mxu0 %v3705_v4  ;;  %v3585_v51 = vmul.f32 %v3520_v15, %v3329_v38 }
 0x62a   : > { %v3599_v0 = vpack.c.bf16 %v3573_v31, %v3572_v23 }
 0x62b   : > { %v3515_v30 = vpop.permute.xlu0 %3514  ;;  %v3334_v40 = vld [vmem:[#allocation5 + $0xe0] sm:$0xff] }
 0x62c   : > { %v2900_v36 = vpop.permute.xlu1 %2899  ;;  %v3584_v29 = vmul.f32 %v3515_v30, %v3328_v53  ;;  %v3714_v28 = vsel %vm796_vm0, %v3599_v0, 0  ;;  %v3825_v0 = vld [vmem:[%s4965_s15 + $0x30] sm:$0xff] }
 0x62d   : > { %v2997_v18 = vmul.f32 %v2900_v36, %v2805_v61 }
 0x62e   : > { %v3605_v44 = vpack.c.bf16 %v3585_v51, %v3584_v29 }
 0x62f   : > { %v3222_v13 = vadd.f32 %v6314_v48, %v2997_v18  ;;  %v2895_v25 = vpop.permute.xlu0 %2894 }
 0x630   : > { %v2996_v16 = vmul.f32 %v2895_v25, %v2804_v22  ;;  %4221 = vmatprep.subr.msk.bf16.mxu0 %vm796_vm0, %v3605_v44  ;;  %v4324_v25 = vld [vmem:[#allocation11 + $0x8] sm:$0xff]  }
 0x631   : > { %3254 = vst.msk [vmem:[#allocation5 + $0x78] sm:$0xff] %vm796_vm0, %v3222_v13  ;;  %4153 = vmatpush3.bf16.xpose.msra.mxu0 %v3708_v32  ;;  %v4326_v32 = vld [vmem:[#allocation11 + $0x18] sm:$0xff]  }
 0x632   : > { %v3221_v14 = vadd.f32 %v6312_v7, %v2996_v16  ;;  %v4325_v16 = vld [vmem:[#allocation11 + $0x10] sm:$0xff]  }
 0x634   : > { %3253 = vst.msk [vmem:[#allocation5 + $0x70] sm:$0xff] %vm796_vm0, %v3221_v14 }
 0x638   : > { %v3321_v38 = vld [vmem:[#allocation5 + $0x78] sm:$0xff] }
 0x63b   : > { %v3320_v3 = vld [vmem:[#allocation5 + $0x70] sm:$0xff] }
 0x651   : > { %v3530_v49 = vpop.permute.xlu1 %3529 }
 0x652   : > { %v3587_v54 = vmul.f32 %v3530_v49, %v3331_v43  ;;  %v3819_v49 = vld [vmem:[%s4965_s15] sm:$0xff] }
 0x655   : > { %v2980_v6 = vpop.permute.xlu1 %2979 }
 0x656   : > { %v3013_v20 = vmul.f32 %v2980_v6, %v2821_v19 }
 0x658   : > { %v3238_v48 = vadd.f32 %v6410_v27, %v3013_v20  ;;  %v3525_v58 = vpop.permute.xlu0 %3524  ;;  %v3711_v27 = vsel %vm796_vm0, %v3598_v10, 0  ;;  %v3319_v10 = vld [vmem:[#allocation5 + $0x68] sm:$0xff] }
 0x659   : > { %v3540_v34 = vpop.permute.xlu1 %3539  ;;  %v3586_v59 = vmul.f32 %v3525_v58, %v3330_v45  ;;  %v3820_v20 = vld [vmem:[%s4965_s15 + $0x8] sm:$0xff]  ;;  %v3821_v58 = vld [vmem:[%s4965_s15 + $0x10] sm:$0xff] }
 0x65a   : > { %3270 = vst.msk [vmem:[#allocation5 + $0xf8] sm:$0xff] %vm796_vm0, %v3238_v48  ;;  %v3589_v56 = vmul.f32 %v3540_v34, %v3333_v42 }
 0x65b   : > { %v3606_v24 = vpack.c.bf16 %v3587_v54, %v3586_v59 }
 0x65c   : > { %v2975_v7 = vpop.permute.xlu0 %2974 }
 0x65d   : > { %v3470_v8 = vpop.permute.xlu1 %3469  ;;  %v3012_v62 = vmul.f32 %v2975_v7, %v2820_v2  ;;  %4222 = vmatprep.subr.msk.bf16.mxu0 %vm796_vm0, %v3606_v24  ;;  %v3822_v2 = vld [vmem:[%s4965_s15 + $0x18] sm:$0xff] }
 0x65e   : > { %4155 = vmatpush3.bf16.xpose.msra.mxu0 %v3711_v27  ;;  %v3823_v27 = vld [vmem:[%s4965_s15 + $0x20] sm:$0xff] }
 0x65f   : > { %v3237_v1 = vadd.f32 %v6408_v60, %v3012_v62  ;;  %v3575_v60 = vmul.f32 %v3470_v8, %v3319_v10 }
 0x660   : > { %v3535_v41 = vpop.permute.xlu0 %3534 }
 0x661   : > { %3269 = vst.msk [vmem:[#allocation5 + $0xf0] sm:$0xff] %vm796_vm0, %v3237_v1  ;;  %v3588_v21 = vmul.f32 %v3535_v41, %v3332_v12  ;;  %v3550_v17 = vpop.permute.xlu1 %3549  ;;  %v3337_v63 = vld [vmem:[#allocation5 + $0xf8] sm:$0xff]  ;;  %v3824_v1 = vld [vmem:[%s4965_s15 + $0x28] sm:$0xff] }
 0x662   : > { %v3591_v33 = vmul.f32 %v3550_v17, %v3335_v55  ;;  %v3827_v55 = vld [vmem:[%s4965_s15 + $0x40] sm:$0xff] }
 0x663   : > { %v3607_v46 = vpack.c.bf16 %v3589_v56, %v3588_v21 }
 0x664   : > { %v3465_v57 = vpop.permute.xlu0 %3464 }
 0x665   : > { %v3574_v5 = vmul.f32 %v3465_v57, %v3318_v50  ;;  %4223 = vmatprep.subr.msk.bf16.mxu0 %vm796_vm0, %v3607_v46  ;;  %v3480_v47 = vpop.permute.xlu1 %3479  ;;  %v3826_v46 = vld [vmem:[%s4965_s15 + $0x38] sm:$0xff] }
 0x666   : > { %4157 = vmatpush3.bf16.xpose.msra.mxu0 %v3714_v28  ;;  %v3577_v30 = vmul.f32 %v3480_v47, %v3321_v38 }
 0x667   : > { %v3600_v26 = vpack.c.bf16 %v3575_v60, %v3574_v5 }
 0x668   : > { %v3545_v37 = vpop.permute.xlu0 %3544  ;;  %v3336_v51 = vld [vmem:[#allocation5 + $0xf0] sm:$0xff] }
 0x669   : > { %v3590_v39 = vmul.f32 %v3545_v37, %v3334_v40  ;;  %v3717_v61 = vsel %vm796_vm0, %v3600_v26, 0  ;;  %v3560_v53 = vpop.permute.xlu1 %3559  ;;  %v3828_v37 = vld [vmem:[%s4965_s15 + $0x48] sm:$0xff] }
 0x66a   : > { %v3593_v29 = vmul.f32 %v3560_v53, %v3337_v63 }
 0x66b   : > { %v3608_v9 = vpack.c.bf16 %v3591_v33, %v3590_v39 }
 0x66c   : > { %v3475_v15 = vpop.permute.xlu0 %3474 }
 0x66d   : > { %v3576_v4 = vmul.f32 %v3475_v15, %v3320_v3  ;;  %4224 = vmatprep.subr.msk.bf16.mxu0 %vm796_vm0, %v3608_v9  ;;  %v3634_v43 = vpop.permute.xlu1 %3633  ;;  %v3829_v9 = vld [vmem:[%s4965_s15 + $0x50] sm:$0xff] }
 0x66e   : > { %4159 = vmatpush3.bf16.xpose.msra.mxu0 %v3717_v61  ;;  %v3830_v61 = vld [vmem:[%s4965_s15 + $0x58] sm:$0xff] }
 0x66f   : > { %v3601_v18 = vpack.c.bf16 %v3577_v30, %v3576_v4 }
 0x670   : > { %v3555_v36 = vpop.permute.xlu0 %3554 }
 0x671   : > { %v3592_v22 = vmul.f32 %v3555_v36, %v3336_v51  ;;  %v3720_v13 = vsel %vm796_vm0, %v3601_v18, 0  ;;  %v3644_v42 = vpop.permute.xlu1 %3643 }
 0x673   : > { %v3609_v44 = vpack.c.bf16 %v3593_v29, %v3592_v22  ;;  %v3831_v29 = vld [vmem:[%s4965_s15 + $0x60] sm:$0xff] }
 0x675   : > { %4225 = vmatprep.subr.msk.bf16.mxu0 %vm796_vm0, %v3609_v44  ;;  %v3654_v33 = vpop.permute.xlu1 %3653  ;;  %v3832_v44 = vld [vmem:[%s4965_s15 + $0x68] sm:$0xff] }
 0x676   : > { %4161 = vmatpush3.bf16.xpose.msra.mxu0 %v3720_v13 }
 0x679   : > { %v3664_v13 = vpop.permute.xlu1 %3663 }
 0x67d   : > { %4163 = vmatmul.mubr.msk.bf16.vlgmr.msra.gmra.mrb[88].mxu0 %vm796_vm0, %v6388_v11  ;;  %v3629_v11 = vpop.permute.xlu0 %3628 }
 0x67e   : > { %4164 = vmatprep.mubr.msk.bf16.mxu0 %vm796_vm0, %v4324_v25 }
 0x681   : > { %v3639_v8 = vpop.permute.xlu0 %3638 }
 0x685   : > { %4165 = vmatmul.mubr.msk.bf16.gmra.mrb[92].mxu0 %vm796_vm0, %v4324_v25  ;;  %v3649_v10 = vpop.permute.xlu0 %3648 }
 0x686   : > { %4166 = vmatprep.mubr.msk.bf16.mxu0 %vm796_vm0, %v4325_v16 }
 0x689   : > { %v3659_v51 = vpop.permute.xlu0 %3658 }
 0x68d   : > { %4167 = vmatmul.mubr.msk.bf16.gmra.mrb[96].mxu0 %vm796_vm0, %v4325_v16 }
 0x68e   : > { %4168 = vmatprep.mubr.msk.bf16.mxu0 %vm796_vm0, %v4326_v32 }
 0x695   : > { %4169 = vmatmul.mubr.msk.bf16.gmra.mrb[100].mxu0 %vm796_vm0, %v4326_v32  ;;  %v3833_v32 = vld [vmem:[%s4965_s15 + $0x70] sm:$0xff] }
 0x750   : > { %v3780_v14 = vpop.f32.mrb[88].mxu0 }
 0x751   : > { %v3781_v19 = vadd.f32 %v3780_v14, %v3629_v11  ;;  %v3782_v6 = vpop.f32.mrb[89].mxu0 }
 0x752   : > { %v3783_v48 = vadd.f32 %v3782_v6, %v3629_v11  ;;  %v3784_v45 = vpop.f32.mrb[90].mxu0 }
 0x753   : > { %v3835_v54 = vadd.f32 %v3819_v49, %v3781_v19  ;;  %v3785_v34 = vadd.f32 %v3784_v45, %v3634_v43  ;;  %v3786_v59 = vpop.f32.mrb[91].mxu0  ;;  %v3834_v19 = vld [vmem:[%s4965_s15 + $0x78] sm:$0xff]  ;;  %s4639_s15 = scalar_lea.vmem %s6498_s30, 2048 }
 0x754   : > { %v3836_v24 = vadd.f32 %v3820_v20, %v3783_v48  ;;  %v3787_v52 = vadd.f32 %v3786_v59, %v3634_v43  ;;  %p4640_p13 = scmp.ne.s32.totalorder %s6498_s30, %s4639_s15  ;;  %p4647_p3 = scmp.lt.s32.totalorder %s4645_s17, %s4639_s15 }
 0x755   : > { %3851 = vst [vmem:[%s6464_s16] sm:$0xff] %v3835_v54  ;;  %v3837_v7 = vadd.f32 %v3821_v58, %v3785_v34 }
 0x756   : > { %3852 = vst [vmem:[%s6464_s16 + $0x8] sm:$0xff] %v3836_v24  ;;  %v3838_v23 = vadd.f32 %v3822_v2, %v3787_v52  ;;  %p4641_p10 = pnand %p4640_p13, %p6814_p8  ;;  %p4648_p5 = por %p4647_p3, %p4646_p2 }
 0x757   : > { %3853 = vst [vmem:[%s6464_s16 + $0x10] sm:$0xff] %v3837_v7 }
 0x758   : > { %3854 = vst [vmem:[%s6464_s16 + $0x18] sm:$0xff] %v3838_v23  ;;  %v3790_v62 = vpop.f32.mrb[92].mxu0  ;;  %p4642_p11 = pneg %p4641_p10 }
 0x759   : > { %v3791_v35 = vadd.f32 %v3790_v62, %v3639_v8  ;;  %v3792_v31 = vpop.f32.mrb[93].mxu0 }
 0x75a   : > { %v3793_v12 = vadd.f32 %v3792_v31, %v3639_v8  ;;  %v3794_v41 = vpop.f32.mrb[94].mxu0  ;;  %p4649_p6 = pnand %p4648_p5, %p4642_p11 }
 0x75b   : > { %v3839_v56 = vadd.f32 %v3823_v27, %v3791_v35  ;;  %v3795_v21 = vadd.f32 %v3794_v41, %v3644_v42  ;;  %v3796_v17 = vpop.f32.mrb[95].mxu0 }
 0x75c   : > { %v3840_v50 = vadd.f32 %v3824_v1, %v3793_v12  ;;  %v3797_v57 = vadd.f32 %v3796_v17, %v3644_v42 }
 0x75d   : > { %3855 = vst [vmem:[%s6464_s16 + $0x20] sm:$0xff] %v3839_v56  ;;  %v3841_v5 = vadd.f32 %v3825_v0, %v3795_v21 }
 0x75e   : > { %3856 = vst [vmem:[%s6464_s16 + $0x28] sm:$0xff] %v3840_v50  ;;  %v3842_v28 = vadd.f32 %v3826_v46, %v3797_v57 }
 0x75f   : > { %3857 = vst [vmem:[%s6464_s16 + $0x30] sm:$0xff] %v3841_v5 }
 0x760   : > { %3858 = vst [vmem:[%s6464_s16 + $0x38] sm:$0xff] %v3842_v28  ;;  %v3800_v60 = vpop.f32.mrb[96].mxu0 }
 0x761   : > { %v3801_v47 = vadd.f32 %v3800_v60, %v3649_v10  ;;  %v3802_v40 = vpop.f32.mrb[97].mxu0 }
 0x762   : > { %v3803_v26 = vadd.f32 %v3802_v40, %v3649_v10  ;;  %v3804_v39 = vpop.f32.mrb[98].mxu0 }
 0x763   : > { %v3843_v3 = vadd.f32 %v3827_v55, %v3801_v47  ;;  %v3805_v15 = vadd.f32 %v3804_v39, %v3654_v33  ;;  %v3806_v4 = vpop.f32.mrb[99].mxu0 }
 0x764   : > { %v3844_v38 = vadd.f32 %v3828_v37, %v3803_v26  ;;  %v3807_v53 = vadd.f32 %v3806_v4, %v3654_v33 }
 0x765   : > { %3859 = vst [vmem:[%s6464_s16 + $0x40] sm:$0xff] %v3843_v3  ;;  %v3845_v30 = vadd.f32 %v3829_v9, %v3805_v15 }
 0x766   : > { %3860 = vst [vmem:[%s6464_s16 + $0x48] sm:$0xff] %v3844_v38  ;;  %v3846_v63 = vadd.f32 %v3830_v61, %v3807_v53 }
 0x767   : > { %3861 = vst [vmem:[%s6464_s16 + $0x50] sm:$0xff] %v3845_v30 }
 0x768   : > { %3862 = vst [vmem:[%s6464_s16 + $0x58] sm:$0xff] %v3846_v63  ;;  %v3810_v36 = vpop.f32.mrb[100].mxu0 }
 0x769   : > { %v3811_v18 = vadd.f32 %v3810_v36, %v3659_v51  ;;  %v3812_v22 = vpop.f32.mrb[101].mxu0 }
 0x76a   : > { %v3813_v25 = vadd.f32 %v3812_v22, %v3659_v51  ;;  %v3814_v16 = vpop.f32.mrb[102].mxu0 }
 0x76b   : > { %v3847_v11 = vadd.f32 %v3831_v29, %v3811_v18  ;;  %v3815_v14 = vadd.f32 %v3814_v16, %v3664_v13  ;;  %v3816_v49 = vpop.f32.mrb[103].mxu0 }
 0x76c   : > { %v3848_v6 = vadd.f32 %v3832_v44, %v3813_v25  ;;  %v3817_v20 = vadd.f32 %v3816_v49, %v3664_v13 }
 0x76d   : > { %3863 = vst [vmem:[%s6464_s16 + $0x60] sm:$0xff] %v3847_v11  ;;  %v3849_v43 = vadd.f32 %v3833_v32, %v3815_v14 }
 0x76e   : > { %3864 = vst [vmem:[%s6464_s16 + $0x68] sm:$0xff] %v3848_v6  ;;  %v3850_v48 = vadd.f32 %v3834_v19, %v3817_v20 }
 0x76f   : > { %3865 = vst [vmem:[%s6464_s16 + $0x70] sm:$0xff] %v3849_v43 }
 0x770   : > { %3866 = vst [vmem:[%s6464_s16 + $0x78] sm:$0xff] %v3850_v48 }
 0x771   : > { %4652 = shalt.err (!%p4649_p6)
}
 0x772   : > { %s4653_s23 = scalar_lea.hbm %s6496_s20, 2048  ;;  %s4657_s29 = scalar_lea.hbm %s6563_s12, 4096 }
 0x773   : > { %p4654_p7 = scmp.ne.s32.totalorder %s6496_s20, %s4653_s23  ;;  %p4658_p0 = scmp.lt.u32.totalorder %s6496_s20, %s6563_s12 }
 0x774   : > { %p4659_p1 = scmp.lt.u32.totalorder %s4657_s29, %s4653_s23  ;;  %p4661_p13 = scmp.lt.u32.totalorder %s4653_s23, %s6496_s20 }
 0x775   : > { %p4655_p9 = pnand %p4654_p7, %p6814_p8 }
 0x776   : > { %p4660_p4 = por %p4659_p1, %p4658_p0 }
 0x777   : > { %p4656_p12 = pneg %p4655_p9 }
 0x778   : > { %p4662_p10 = por %p4661_p13, %p4660_p4 }
 0x77a   : > { %p4663_p11 = pnand %p4662_p10, %p4656_p12 }
 0x77c   : > { %4666 = shalt.err (!%p4663_p11)
}
 0x77d   : > { %s4735_s27 = smov 256   ;;  %s4736_s18 = smov 16  }
 0x77e   : > { %4234 = dma.vmem_to_hbm [thread:$0]  (%p6814_p8), %s6498_s30, 2048, %s6496_s20, %s6505_s24, %s4735_s27, %s4735_s27, %s4736_s18  }
 0x77f PF: > { %s6815_s15 = sld [smem:[#allocation17_spill]]  ;;  %s6816_s19 = sld [smem:[#allocation21_spill]] }
 0x780   : > { %p4251_p2 = scmp.ge.s32.totalorder %s4725_s26, 2 }
 0x785   : > { %s3898_s28 = sand.u32 1, %s6815_s15   ;;  %p6817_p3 = scmp.ne.s32.totalorder %s6816_s19, 0 }
 0x786   : > { %s3899_s17 = scalar_lea.sflag [#allocation10], %s3898_s28 }
 0x787   : > { %p4244_p5 = pnand %p4251_p2, %p6817_p3 }
 0x789   : > { %4700 = dma.done.wait (!%p4244_p5), %s3899_s17, 2048  }
 0x78a   : > { %4702 = vsyncadd (!%p4244_p5), %s3899_s17, 4294965248  ;;  %s27_s26 = sadd.s32 1, %s4725_s26   ;;  %s6818_s23 = sld [smem:[#allocation18_spill]] }
 0x78b   : > { %p24_p6 = scmp.ge.s32.totalorder %s27_s26, 4   ;;  %s6819_s14 = sld [smem:[#allocation22_spill]] }
 0x78c   : > { %s6820_s24 = sld [smem:[#allocation19_spill]]  ;;  %s6821_s25 = sld [smem:[#allocation20_spill]] }
 0x78d   : > { %s6822_s21 = smov %s4709_s22  ;;  %26 = sbr.rel (!%p24_p6) target bundleno = 6 (0x6), region = 137 }
 0x790   : > { %s6823_s22 = smov %s6818_s23 }
 0x791   : > { %s6824_s23 = smov %s6819_s14 }
 0x794   :  { %3904 = vsyncpa [#allocation9], 1 }
 0x795   :  { %3906 = vsyncpa [#allocation9 + $0x1], 1 }
 0x796   :  { %3907 = vsyncpa [#allocation12], 1 }
 0x797   :  { %3908 = vsyncpa [#allocation10], 1 }
 0x798   :  { %3910 = vsyncpa [#allocation10 + $0x1], 1 }

</bundles_post_ra>
